<compile_context>
chip_gen: v7x
topology: tpu7x:2x2x1
jax: 0.10.0
libtpu: 0.0.40
codegen_flags: <defaults>
</compile_context>

<pallas_src>
import functools

import jax
import jax.numpy as jnp
import numpy as np
from jax.experimental import pallas as pl
from jax.experimental.pallas import tpu as pltpu


# ----------------------------------------------------------------------------
# Tiled per-layer Linear kernel (used for large / real-width layers)
# ----------------------------------------------------------------------------
def _linear_kernel(x_ref, w_ref, b_ref, o_ref, *, apply_relu, tk):
    """One (N-tile, K-tile) step of y = x @ W + b (optional ReLU).

    x is fully resident (block index constant); the output block is resident
    across the K axis, so we accumulate straight into it (no scratch).
    """
    k = pl.program_id(1)
    nk = pl.num_programs(1)

    @pl.when(k == 0)
    def _():
        o_ref[...] = jnp.zeros_like(o_ref)

    off = pl.multiple_of(k * tk, tk)
    xk = x_ref[:, pl.ds(off, tk)]
    o_ref[...] += jnp.dot(
        xk.astype(w_ref.dtype), w_ref[...], preferred_element_type=jnp.float32
    )

    @pl.when(k == nk - 1)
    def _():
        y = o_ref[...] + b_ref[...]
        if apply_relu:
            y = jnp.maximum(y, 0.0)
        o_ref[...] = y


def _round_up(v, m):
    return -(-v // m) * m


def pallas_linear(x, w, b, *, apply_relu, tn=512, tk=2048):
    """y = x @ w + b (w is (in, out)); optional fused ReLU.

    Handles non-lane-aligned widths (e.g. 43201) by zero-padding K / N once
    per call and slicing the result.
    """
    M, K = x.shape
    Kw, N = w.shape
    assert K == Kw and b.shape == (1, N)

    tn = min(tn, _round_up(N, 256))
    tk = min(tk, _round_up(K, 256))
    Kp, Np = _round_up(K, tk), _round_up(N, tn)
    if Kp != K:
        x = jnp.pad(x, ((0, 0), (0, Kp - K)))
        w = jnp.pad(w, ((0, Kp - K), (0, 0)))
    if Np != N:
        w = jnp.pad(w, ((0, 0), (0, Np - N)))
        b = jnp.pad(b, ((0, 0), (0, Np - N)))

    kernel = functools.partial(_linear_kernel, apply_relu=apply_relu, tk=tk)
    out = pl.pallas_call(
        kernel,
        out_shape=jax.ShapeDtypeStruct((M, Np), jnp.float32),
        grid_spec=pltpu.PrefetchScalarGridSpec(
            num_scalar_prefetch=0,
            grid=(Np // tn, Kp // tk),
            in_specs=[
                pl.BlockSpec((M, Kp), lambda j, k: (0, 0)),   # x, fully resident
                pl.BlockSpec((tk, tn), lambda j, k: (k, j)),  # weight tile (bf16)
                pl.BlockSpec((1, tn), lambda j, k: (0, j)),   # bias tile
            ],
            out_specs=pl.BlockSpec((M, tn), lambda j, k: (0, j)),
        ),
        compiler_params=pltpu.CompilerParams(
            dimension_semantics=("parallel", "arbitrary")
        ),
    )(x, w, b)
    return out[:, :N] if Np != N else out


# ----------------------------------------------------------------------------
# Fused mu / log_var heads + reparameterize kernel (tiny weights, no grid)
# ----------------------------------------------------------------------------
def _heads_reparam_kernel(enc_ref, w_ref, b_ref, eps_ref,
                          mu_ref, lv_ref, z_ref, *, latent_dim):
    y = jnp.dot(
        enc_ref[...].astype(w_ref.dtype), w_ref[...],
        preferred_element_type=jnp.float32,
    ) + b_ref[...]
    mu = y[:, :latent_dim]
    lv = y[:, latent_dim:]
    mu_ref[...] = mu
    lv_ref[...] = lv
    z_ref[...] = mu + eps_ref[...] * jnp.exp(0.5 * lv)


def pallas_heads_reparam(encoded, w_cat, b_cat, eps, latent_dim):
    M = encoded.shape[0]
    kernel = functools.partial(_heads_reparam_kernel, latent_dim=latent_dim)
    out_shapes = (
        jax.ShapeDtypeStruct((M, latent_dim), jnp.float32),  # mu
        jax.ShapeDtypeStruct((M, latent_dim), jnp.float32),  # log_var
        jax.ShapeDtypeStruct((M, latent_dim), jnp.float32),  # z
    )
    return pl.pallas_call(kernel, out_shape=out_shapes)(encoded, w_cat, b_cat, eps)


# ----------------------------------------------------------------------------
# Fully fused VAE forward (encoder + heads + reparam + decoder in ONE call)
# ----------------------------------------------------------------------------
def _fused_vae_kernel(*refs, n_enc, n_dec, latent_dim):
    idx = 0
    x_ref = refs[idx]; idx += 1
    eps_ref = refs[idx]; idx += 1
    enc_w = refs[idx: idx + n_enc]; idx += n_enc
    enc_b = refs[idx: idx + n_enc]; idx += n_enc
    hw_ref = refs[idx]; idx += 1
    hb_ref = refs[idx]; idx += 1
    dec_w = refs[idx: idx + n_dec]; idx += n_dec
    dec_b = refs[idx: idx + n_dec]; idx += n_dec
    enc_o, dec_o, mu_o, lv_o = refs[idx: idx + 4]

    # encoder: Linear + ReLU stack
    h = x_ref[...]
    for i in range(n_enc):
        w = enc_w[i][...]
        h = jnp.dot(h.astype(w.dtype), w, preferred_element_type=jnp.float32)
        h = jnp.maximum(h + enc_b[i][...], 0.0)
    enc_o[...] = h

    # mu / log_var heads (single concatenated matmul) + reparameterize
    y = jnp.dot(h.astype(hw_ref.dtype), hw_ref[...],
                preferred_element_type=jnp.float32) + hb_ref[...]
    mu = y[:, :latent_dim]
    lv = y[:, latent_dim:]
    mu_o[...] = mu
    lv_o[...] = lv
    h = mu + eps_ref[...] * jnp.exp(0.5 * lv)

    # decoder: Linear + ReLU, final layer has no ReLU
    for i in range(n_dec):
        w = dec_w[i][...]
        h = jnp.dot(h.astype(w.dtype), w, preferred_element_type=jnp.float32)
        h = h + dec_b[i][...]
        if i < n_dec - 1:
            h = jnp.maximum(h, 0.0)
    dec_o[...] = h


def pallas_vae_fused(x, eps, enc_params, heads_w, heads_b, dec_params, latent_dim):
    M = x.shape[0]
    input_size = dec_params[-1][0].shape[1]
    n_enc, n_dec = len(enc_params), len(dec_params)
    enc_ws = [w for w, _ in enc_params]
    enc_bs = [b for _, b in enc_params]
    dec_ws = [w for w, _ in dec_params]
    dec_bs = [b for _, b in dec_params]
    kernel = functools.partial(
        _fused_vae_kernel, n_enc=n_enc, n_dec=n_dec, latent_dim=latent_dim
    )
    out_shapes = (
        jax.ShapeDtypeStruct((M, latent_dim), jnp.float32),   # encoded
        jax.ShapeDtypeStruct((M, input_size), jnp.float32),   # decoded
        jax.ShapeDtypeStruct((M, latent_dim), jnp.float32),   # mu
        jax.ShapeDtypeStruct((M, latent_dim), jnp.float32),   # log_var
    )
    # No grid: all weights resident in VMEM (only valid for small stacks).
    return pl.pallas_call(kernel, out_shape=out_shapes)(
        x, eps, *enc_ws, *enc_bs, heads_w, heads_b, *dec_ws, *dec_bs
    )


# ----------------------------------------------------------------------------
# VAE model (parameters + forward), mirroring the PyTorch module structure
# ----------------------------------------------------------------------------
_FUSED_WEIGHT_BUDGET_BYTES = 16 * 1024 * 1024  # stay well under v7x 64 MiB VMEM


def _init_linear(key, fan_in, fan_out, weight_dtype=jnp.bfloat16):
    # PyTorch nn.Linear default init: U(-1/sqrt(fan_in), 1/sqrt(fan_in))
    kw, kb = jax.random.split(key)
    bound = 1.0 / np.sqrt(fan_in)
    w = jax.random.uniform(kw, (fan_in, fan_out), jnp.float32, -bound, bound)
    b = jax.random.uniform(kb, (1, fan_out), jnp.float32, -bound, bound)
    return w.astype(weight_dtype), b


def _stack_bytes(params):
    return sum(int(w.size) * w.dtype.itemsize + int(b.size) * b.dtype.itemsize
               for w, b in params)


class PallasVAE:
    def __init__(self, input_size, latent_dim=128,
                 hidden_dims=(512, 384, 256, 128), key=None):
        if key is None:
            key = jax.random.PRNGKey(0)
        self.input_size = input_size
        self.latent_dim = latent_dim

        enc_dims = [input_size, *hidden_dims, latent_dim]
        dec_dims = [latent_dim, *hidden_dims[::-1], input_size]

        keys = jax.random.split(key, len(enc_dims) - 1 + len(dec_dims) - 1 + 2)
        ki = iter(keys)

        self.enc_params = [
            _init_linear(next(ki), enc_dims[i], enc_dims[i + 1])
            for i in range(len(enc_dims) - 1)
        ]
        self.dec_params = [
            _init_linear(next(ki), dec_dims[i], dec_dims[i + 1])
            for i in range(len(dec_dims) - 1)
        ]
        # mu / log_var heads fused into one (latent, 2*latent) matmul
        w_mu, b_mu = _init_linear(next(ki), latent_dim, latent_dim)
        w_lv, b_lv = _init_linear(next(ki), latent_dim, latent_dim)
        self.heads_w = jnp.concatenate([w_mu, w_lv], axis=1)   # (L, 2L) bf16
        self.heads_b = jnp.concatenate([b_mu, b_lv], axis=1)   # (1, 2L) f32

        self._param_bytes = (
            _stack_bytes(self.enc_params)
            + _stack_bytes(self.dec_params)
            + int(self.heads_w.size) * self.heads_w.dtype.itemsize
            + int(self.heads_b.size) * self.heads_b.dtype.itemsize
        )

    # --- per-layer weight-streaming path (used for the real 43201-wide config)
    def _forward_layered(self, x, eps):
        h = x
        for (w, b) in self.enc_params:
            h = pallas_linear(h, w, b, apply_relu=True)
        encoded = h
        mu, log_var, z = pallas_heads_reparam(
            encoded, self.heads_w, self.heads_b, eps, self.latent_dim
        )
        h = z
        n = len(self.dec_params)
        for i, (w, b) in enumerate(self.dec_params):
            h = pallas_linear(h, w, b, apply_relu=(i < n - 1))
        return encoded, h, mu, log_var

    def forward(self, x, eps_key):
        # TODO(synk): torch.randn_like lives outside the kernel; eps is drawn
        # with jax.random and passed in (returned so references can reuse it).
        eps = jax.random.normal(eps_key, (x.shape[0], self.latent_dim), jnp.float32)
        if self._param_bytes <= _FUSED_WEIGHT_BUDGET_BYTES:
            encoded, decoded, mu, log_var = pallas_vae_fused(
                x, eps, self.enc_params, self.heads_w, self.heads_b,
                self.dec_params, self.latent_dim
            )
        else:
            encoded, decoded, mu, log_var = self._forward_layered(x, eps)
        return encoded, decoded, mu, log_var, eps


# ----------------------------------------------------------------------------
# Pure-JAX reference (same bf16 weights, same eps) for correctness checking
# ----------------------------------------------------------------------------
def _reference_forward(model, x, eps):
    def lin(h, w, b, relu):
        y = jnp.dot(h.astype(w.dtype), w, preferred_element_type=jnp.float32) + b
        return jnp.maximum(y, 0.0) if relu else y

    h = x
    for (w, b) in model.enc_params:
        h = lin(h, w, b, True)
    encoded = h
    y = jnp.dot(encoded.astype(model.heads_w.dtype), model.heads_w,
                preferred_element_type=jnp.float32) + model.heads_b
    L = model.latent_dim
    mu, lv = y[:, :L], y[:, L:]
    z = mu + eps * jnp.exp(0.5 * lv)
    h = z
    n = len(model.dec_params)
    for i, (w, b) in enumerate(model.dec_params):
        h = lin(h, w, b, i < n - 1)
    return encoded, h, mu, lv


if __name__ == "__main__":
    batch = 8
    input_size = 384
    latent_dim = 128

    key = jax.random.PRNGKey(0)
    k_params, k_x, k_eps, k_t = jax.random.split(key, 4)

    model = PallasVAE(input_size, latent_dim=latent_dim, key=k_params)
    x = jax.random.normal(k_x, (batch, input_size), jnp.float32)

    # ---- fully fused forward (single pallas_call) ----
    encoded, decoded, mu, log_var, eps = model.forward(x, k_eps)
    jax.block_until_ready((encoded, decoded, mu, log_var))

    r_enc, r_dec, r_mu, r_lv = _reference_forward(model, x, eps)
    for got, ref in ((encoded, r_enc), (mu, r_mu), (log_var, r_lv), (decoded, r_dec)):
        np.testing.assert_allclose(np.asarray(got), np.asarray(ref),
                                   rtol=5e-3, atol=5e-3)

    # ---- layered (weight-streaming) path: the path used for the real
    # 43201 / 21600 / 10800 / 4096-wide configuration ----
    l_enc, l_dec, l_mu, l_lv = model._forward_layered(x, eps)
    jax.block_until_ready((l_enc, l_dec, l_mu, l_lv))
    for got, ref in ((l_enc, r_enc), (l_mu, r_mu), (l_lv, r_lv), (l_dec, r_dec)):
        np.testing.assert_allclose(np.asarray(got), np.asarray(ref),
                                   rtol=5e-3, atol=5e-3)

    # ---- tiled kernel with multiple K / N tiles ----
    kx, kw, kb, kx2, kw2, kb2 = jax.random.split(k_t, 6)
    xt = jax.random.normal(kx, (batch, 1024), jnp.float32)
    wt = (0.05 * jax.random.normal(kw, (1024, 512), jnp.float32)).astype(jnp.bfloat16)
    bt = 0.05 * jax.random.normal(kb, (1, 512), jnp.float32)
    yt = pallas_linear(xt, wt, bt, apply_relu=True, tn=256, tk=256)
    rt = jnp.maximum(
        jnp.dot(xt.astype(jnp.bfloat16), wt, preferred_element_type=jnp.float32) + bt,
        0.0,
    )
    np.testing.assert_allclose(np.asarray(yt), np.asarray(rt), rtol=1e-2, atol=1e-2)

    # ---- ragged (non-128-multiple) widths, like the real 43201 layer ----
    xr = jax.random.normal(kx2, (batch, 600), jnp.float32)
    wr = (0.05 * jax.random.normal(kw2, (600, 433), jnp.float32)).astype(jnp.bfloat16)
    br = 0.05 * jax.random.normal(kb2, (1, 433), jnp.float32)
    yr = pallas_linear(xr, wr, br, apply_relu=False, tn=256, tk=256)
    rr = jnp.dot(xr.astype(jnp.bfloat16), wr, preferred_element_type=jnp.float32) + br
    np.testing.assert_allclose(np.asarray(yr), np.asarray(rr), rtol=1e-2, atol=1e-2)

    print("KERNEL_OK")
</pallas_src>

<mosaic_0001>
module attributes {stable_mosaic.version = 11 : i64} {
  func.func @_fused_vae_kernel(%arg0: memref<8x384xf32, #tpu.memory_space<vmem>>, %arg1: memref<8x128xf32, #tpu.memory_space<vmem>>, %arg2: memref<384x512xbf16, #tpu.memory_space<vmem>>, %arg3: memref<512x384xbf16, #tpu.memory_space<vmem>>, %arg4: memref<384x256xbf16, #tpu.memory_space<vmem>>, %arg5: memref<256x128xbf16, #tpu.memory_space<vmem>>, %arg6: memref<128x128xbf16, #tpu.memory_space<vmem>>, %arg7: memref<1x512xf32, #tpu.memory_space<vmem>>, %arg8: memref<1x384xf32, #tpu.memory_space<vmem>>, %arg9: memref<1x256xf32, #tpu.memory_space<vmem>>, %arg10: memref<1x128xf32, #tpu.memory_space<vmem>>, %arg11: memref<1x128xf32, #tpu.memory_space<vmem>>, %arg12: memref<128x256xbf16, #tpu.memory_space<vmem>>, %arg13: memref<1x256xf32, #tpu.memory_space<vmem>>, %arg14: memref<128x128xbf16, #tpu.memory_space<vmem>>, %arg15: memref<128x256xbf16, #tpu.memory_space<vmem>>, %arg16: memref<256x384xbf16, #tpu.memory_space<vmem>>, %arg17: memref<384x512xbf16, #tpu.memory_space<vmem>>, %arg18: memref<512x384xbf16, #tpu.memory_space<vmem>>, %arg19: memref<1x128xf32, #tpu.memory_space<vmem>>, %arg20: memref<1x256xf32, #tpu.memory_space<vmem>>, %arg21: memref<1x384xf32, #tpu.memory_space<vmem>>, %arg22: memref<1x512xf32, #tpu.memory_space<vmem>>, %arg23: memref<1x384xf32, #tpu.memory_space<vmem>>, %arg24: memref<8x128xf32, #tpu.memory_space<vmem>>, %arg25: memref<8x384xf32, #tpu.memory_space<vmem>>, %arg26: memref<8x128xf32, #tpu.memory_space<vmem>>, %arg27: memref<8x128xf32, #tpu.memory_space<vmem>>) attributes {dimension_semantics = [], scalar_prefetch = 0 : i64, scratch_operands = 0 : i64, tpu.core_type = #tpu.core_type<tc>} {
    %c0 = arith.constant 0 : index
    %c0_0 = arith.constant 0 : index
    %0 = vector.load %arg0[%c0, %c0_0] : memref<8x384xf32, #tpu.memory_space<vmem>>, vector<8x384xf32>
    %c0_1 = arith.constant 0 : index
    %c0_2 = arith.constant 0 : index
    %1 = vector.load %arg2[%c0_1, %c0_2] : memref<384x512xbf16, #tpu.memory_space<vmem>>, vector<384x512xbf16>
    %2 = arith.truncf %0 : vector<8x384xf32> to vector<8x384xbf16>
    %cst = arith.constant dense<0.000000e+00> : vector<8x512xf32>
    %3 = tpu.matmul %2, %1, %cst {dimension_numbers = #tpu.dot_dimension_numbers<[1], [0], [0], [1], [0, 0, 1, 1], [], []>} : vector<8x384xbf16>, vector<384x512xbf16>, vector<8x512xf32> -> vector<8x512xf32>
    %c0_3 = arith.constant 0 : index
    %c0_4 = arith.constant 0 : index
    %4 = vector.load %arg7[%c0_3, %c0_4] : memref<1x512xf32, #tpu.memory_space<vmem>>, vector<1x512xf32>
    %5 = vector.broadcast %4 : vector<1x512xf32> to vector<8x512xf32>
    %6 = arith.addf %3, %5 : vector<8x512xf32>
    %cst_5 = arith.constant 0.000000e+00 : f32
    %7 = vector.broadcast %cst_5 : f32 to vector<8x512xf32>
    %8 = arith.maximumf %6, %7 : vector<8x512xf32>
    %c0_6 = arith.constant 0 : index
    %c0_7 = arith.constant 0 : index
    %9 = vector.load %arg3[%c0_6, %c0_7] : memref<512x384xbf16, #tpu.memory_space<vmem>>, vector<512x384xbf16>
    %10 = arith.truncf %8 : vector<8x512xf32> to vector<8x512xbf16>
    %cst_8 = arith.constant dense<0.000000e+00> : vector<8x384xf32>
    %11 = tpu.matmul %10, %9, %cst_8 {dimension_numbers = #tpu.dot_dimension_numbers<[1], [0], [0], [1], [0, 0, 1, 1], [], []>} : vector<8x512xbf16>, vector<512x384xbf16>, vector<8x384xf32> -> vector<8x384xf32>
    %c0_9 = arith.constant 0 : index
    %c0_10 = arith.constant 0 : index
    %12 = vector.load %arg8[%c0_9, %c0_10] : memref<1x384xf32, #tpu.memory_space<vmem>>, vector<1x384xf32>
    %13 = vector.broadcast %12 : vector<1x384xf32> to vector<8x384xf32>
    %14 = arith.addf %11, %13 : vector<8x384xf32>
    %cst_11 = arith.constant 0.000000e+00 : f32
    %15 = vector.broadcast %cst_11 : f32 to vector<8x384xf32>
    %16 = arith.maximumf %14, %15 : vector<8x384xf32>
    %c0_12 = arith.constant 0 : index
    %c0_13 = arith.constant 0 : index
    %17 = vector.load %arg4[%c0_12, %c0_13] : memref<384x256xbf16, #tpu.memory_space<vmem>>, vector<384x256xbf16>
    %18 = arith.truncf %16 : vector<8x384xf32> to vector<8x384xbf16>
    %cst_14 = arith.constant dense<0.000000e+00> : vector<8x256xf32>
    %19 = tpu.matmul %18, %17, %cst_14 {dimension_numbers = #tpu.dot_dimension_numbers<[1], [0], [0], [1], [0, 0, 1, 1], [], []>} : vector<8x384xbf16>, vector<384x256xbf16>, vector<8x256xf32> -> vector<8x256xf32>
    %c0_15 = arith.constant 0 : index
    %c0_16 = arith.constant 0 : index
    %20 = vector.load %arg9[%c0_15, %c0_16] : memref<1x256xf32, #tpu.memory_space<vmem>>, vector<1x256xf32>
    %21 = vector.broadcast %20 : vector<1x256xf32> to vector<8x256xf32>
    %22 = arith.addf %19, %21 : vector<8x256xf32>
    %cst_17 = arith.constant 0.000000e+00 : f32
    %23 = vector.broadcast %cst_17 : f32 to vector<8x256xf32>
    %24 = arith.maximumf %22, %23 : vector<8x256xf32>
    %c0_18 = arith.constant 0 : index
    %c0_19 = arith.constant 0 : index
    %25 = vector.load %arg5[%c0_18, %c0_19] : memref<256x128xbf16, #tpu.memory_space<vmem>>, vector<256x128xbf16>
    %26 = arith.truncf %24 : vector<8x256xf32> to vector<8x256xbf16>
    %cst_20 = arith.constant dense<0.000000e+00> : vector<8x128xf32>
    %27 = tpu.matmul %26, %25, %cst_20 {dimension_numbers = #tpu.dot_dimension_numbers<[1], [0], [0], [1], [0, 0, 1, 1], [], []>} : vector<8x256xbf16>, vector<256x128xbf16>, vector<8x128xf32> -> vector<8x128xf32>
    %c0_21 = arith.constant 0 : index
    %c0_22 = arith.constant 0 : index
    %28 = vector.load %arg10[%c0_21, %c0_22] : memref<1x128xf32, #tpu.memory_space<vmem>>, vector<1x128xf32>
    %29 = vector.broadcast %28 : vector<1x128xf32> to vector<8x128xf32>
    %30 = arith.addf %27, %29 : vector<8x128xf32>
    %cst_23 = arith.constant 0.000000e+00 : f32
    %31 = vector.broadcast %cst_23 : f32 to vector<8x128xf32>
    %32 = arith.maximumf %30, %31 : vector<8x128xf32>
    %c0_24 = arith.constant 0 : index
    %c0_25 = arith.constant 0 : index
    %33 = vector.load %arg6[%c0_24, %c0_25] : memref<128x128xbf16, #tpu.memory_space<vmem>>, vector<128x128xbf16>
    %34 = arith.truncf %32 : vector<8x128xf32> to vector<8x128xbf16>
    %cst_26 = arith.constant dense<0.000000e+00> : vector<8x128xf32>
    %35 = tpu.matmul %34, %33, %cst_26 {dimension_numbers = #tpu.dot_dimension_numbers<[1], [0], [0], [1], [0, 0, 1, 1], [], []>} : vector<8x128xbf16>, vector<128x128xbf16>, vector<8x128xf32> -> vector<8x128xf32>
    %c0_27 = arith.constant 0 : index
    %c0_28 = arith.constant 0 : index
    %36 = vector.load %arg11[%c0_27, %c0_28] : memref<1x128xf32, #tpu.memory_space<vmem>>, vector<1x128xf32>
    %37 = vector.broadcast %36 : vector<1x128xf32> to vector<8x128xf32>
    %38 = arith.addf %35, %37 : vector<8x128xf32>
    %cst_29 = arith.constant 0.000000e+00 : f32
    %39 = vector.broadcast %cst_29 : f32 to vector<8x128xf32>
    %40 = arith.maximumf %38, %39 : vector<8x128xf32>
    %c0_30 = arith.constant 0 : index
    %c0_31 = arith.constant 0 : index
    %41 = vector.load %arg24[%c0_30, %c0_31] : memref<8x128xf32, #tpu.memory_space<vmem>>, vector<8x128xf32>
    tpu.vector_store %arg24[%c0_30, %c0_31], %40 {strides = array<i32>} : memref<8x128xf32, #tpu.memory_space<vmem>>, vector<8x128xf32>,
    %42 = arith.truncf %40 : vector<8x128xf32> to vector<8x128xbf16>
    %c0_32 = arith.constant 0 : index
    %c0_33 = arith.constant 0 : index
    %43 = vector.load %arg12[%c0_32, %c0_33] : memref<128x256xbf16, #tpu.memory_space<vmem>>, vector<128x256xbf16>
    %cst_34 = arith.constant dense<0.000000e+00> : vector<8x256xf32>
    %44 = tpu.matmul %42, %43, %cst_34 {dimension_numbers = #tpu.dot_dimension_numbers<[1], [0], [0], [1], [0, 0, 1, 1], [], []>} : vector<8x128xbf16>, vector<128x256xbf16>, vector<8x256xf32> -> vector<8x256xf32>
    %c0_35 = arith.constant 0 : index
    %c0_36 = arith.constant 0 : index
    %45 = vector.load %arg13[%c0_35, %c0_36] : memref<1x256xf32, #tpu.memory_space<vmem>>, vector<1x256xf32>
    %46 = vector.broadcast %45 : vector<1x256xf32> to vector<8x256xf32>
    %47 = arith.addf %44, %46 : vector<8x256xf32>
    %48 = vector.extract_strided_slice %47 {offsets = [0, 0], sizes = [8, 128], strides = [1, 1]} : vector<8x256xf32> to vector<8x128xf32>
    %49 = vector.extract_strided_slice %47 {offsets = [0, 128], sizes = [8, 128], strides = [1, 1]} : vector<8x256xf32> to vector<8x128xf32>
    %c0_37 = arith.constant 0 : index
    %c0_38 = arith.constant 0 : index
    %50 = vector.load %arg26[%c0_37, %c0_38] : memref<8x128xf32, #tpu.memory_space<vmem>>, vector<8x128xf32>
    tpu.vector_store %arg26[%c0_37, %c0_38], %48 {strides = array<i32>} : memref<8x128xf32, #tpu.memory_space<vmem>>, vector<8x128xf32>,
    %c0_39 = arith.constant 0 : index
    %c0_40 = arith.constant 0 : index
    %51 = vector.load %arg27[%c0_39, %c0_40] : memref<8x128xf32, #tpu.memory_space<vmem>>, vector<8x128xf32>
    tpu.vector_store %arg27[%c0_39, %c0_40], %49 {strides = array<i32>} : memref<8x128xf32, #tpu.memory_space<vmem>>, vector<8x128xf32>,
    %c0_41 = arith.constant 0 : index
    %c0_42 = arith.constant 0 : index
    %52 = vector.load %arg1[%c0_41, %c0_42] : memref<8x128xf32, #tpu.memory_space<vmem>>, vector<8x128xf32>
    %cst_43 = arith.constant 5.000000e-01 : f32
    %53 = vector.broadcast %cst_43 : f32 to vector<8x128xf32>
    %54 = arith.mulf %53, %49 : vector<8x128xf32>
    %55 = math.exp %54 : vector<8x128xf32>
    %56 = arith.mulf %52, %55 : vector<8x128xf32>
    %57 = arith.addf %48, %56 : vector<8x128xf32>
    %c0_44 = arith.constant 0 : index
    %c0_45 = arith.constant 0 : index
    %58 = vector.load %arg14[%c0_44, %c0_45] : memref<128x128xbf16, #tpu.memory_space<vmem>>, vector<128x128xbf16>
    %59 = arith.truncf %57 : vector<8x128xf32> to vector<8x128xbf16>
    %cst_46 = arith.constant dense<0.000000e+00> : vector<8x128xf32>
    %60 = tpu.matmul %59, %58, %cst_46 {dimension_numbers = #tpu.dot_dimension_numbers<[1], [0], [0], [1], [0, 0, 1, 1], [], []>} : vector<8x128xbf16>, vector<128x128xbf16>, vector<8x128xf32> -> vector<8x128xf32>
    %c0_47 = arith.constant 0 : index
    %c0_48 = arith.constant 0 : index
    %61 = vector.load %arg19[%c0_47, %c0_48] : memref<1x128xf32, #tpu.memory_space<vmem>>, vector<1x128xf32>
    %62 = vector.broadcast %61 : vector<1x128xf32> to vector<8x128xf32>
    %63 = arith.addf %60, %62 : vector<8x128xf32>
    %cst_49 = arith.constant 0.000000e+00 : f32
    %64 = vector.broadcast %cst_49 : f32 to vector<8x128xf32>
    %65 = arith.maximumf %63, %64 : vector<8x128xf32>
    %c0_50 = arith.constant 0 : index
    %c0_51 = arith.constant 0 : index
    %66 = vector.load %arg15[%c0_50, %c0_51] : memref<128x256xbf16, #tpu.memory_space<vmem>>, vector<128x256xbf16>
    %67 = arith.truncf %65 : vector<8x128xf32> to vector<8x128xbf16>
    %cst_52 = arith.constant dense<0.000000e+00> : vector<8x256xf32>
    %68 = tpu.matmul %67, %66, %cst_52 {dimension_numbers = #tpu.dot_dimension_numbers<[1], [0], [0], [1], [0, 0, 1, 1], [], []>} : vector<8x128xbf16>, vector<128x256xbf16>, vector<8x256xf32> -> vector<8x256xf32>
    %c0_53 = arith.constant 0 : index
    %c0_54 = arith.constant 0 : index
    %69 = vector.load %arg20[%c0_53, %c0_54] : memref<1x256xf32, #tpu.memory_space<vmem>>, vector<1x256xf32>
    %70 = vector.broadcast %69 : vector<1x256xf32> to vector<8x256xf32>
    %71 = arith.addf %68, %70 : vector<8x256xf32>
    %cst_55 = arith.constant 0.000000e+00 : f32
    %72 = vector.broadcast %cst_55 : f32 to vector<8x256xf32>
    %73 = arith.maximumf %71, %72 : vector<8x256xf32>
    %c0_56 = arith.constant 0 : index
    %c0_57 = arith.constant 0 : index
    %74 = vector.load %arg16[%c0_56, %c0_57] : memref<256x384xbf16, #tpu.memory_space<vmem>>, vector<256x384xbf16>
    %75 = arith.truncf %73 : vector<8x256xf32> to vector<8x256xbf16>
    %cst_58 = arith.constant dense<0.000000e+00> : vector<8x384xf32>
    %76 = tpu.matmul %75, %74, %cst_58 {dimension_numbers = #tpu.dot_dimension_numbers<[1], [0], [0], [1], [0, 0, 1, 1], [], []>} : vector<8x256xbf16>, vector<256x384xbf16>, vector<8x384xf32> -> vector<8x384xf32>
    %c0_59 = arith.constant 0 : index
    %c0_60 = arith.constant 0 : index
    %77 = vector.load %arg21[%c0_59, %c0_60] : memref<1x384xf32, #tpu.memory_space<vmem>>, vector<1x384xf32>
    %78 = vector.broadcast %77 : vector<1x384xf32> to vector<8x384xf32>
    %79 = arith.addf %76, %78 : vector<8x384xf32>
    %cst_61 = arith.constant 0.000000e+00 : f32
    %80 = vector.broadcast %cst_61 : f32 to vector<8x384xf32>
    %81 = arith.maximumf %79, %80 : vector<8x384xf32>
    %c0_62 = arith.constant 0 : index
    %c0_63 = arith.constant 0 : index
    %82 = vector.load %arg17[%c0_62, %c0_63] : memref<384x512xbf16, #tpu.memory_space<vmem>>, vector<384x512xbf16>
    %83 = arith.truncf %81 : vector<8x384xf32> to vector<8x384xbf16>
    %cst_64 = arith.constant dense<0.000000e+00> : vector<8x512xf32>
    %84 = tpu.matmul %83, %82, %cst_64 {dimension_numbers = #tpu.dot_dimension_numbers<[1], [0], [0], [1], [0, 0, 1, 1], [], []>} : vector<8x384xbf16>, vector<384x512xbf16>, vector<8x512xf32> -> vector<8x512xf32>
    %c0_65 = arith.constant 0 : index
    %c0_66 = arith.constant 0 : index
    %85 = vector.load %arg22[%c0_65, %c0_66] : memref<1x512xf32, #tpu.memory_space<vmem>>, vector<1x512xf32>
    %86 = vector.broadcast %85 : vector<1x512xf32> to vector<8x512xf32>
    %87 = arith.addf %84, %86 : vector<8x512xf32>
    %cst_67 = arith.constant 0.000000e+00 : f32
    %88 = vector.broadcast %cst_67 : f32 to vector<8x512xf32>
    %89 = arith.maximumf %87, %88 : vector<8x512xf32>
    %c0_68 = arith.constant 0 : index
    %c0_69 = arith.constant 0 : index
    %90 = vector.load %arg18[%c0_68, %c0_69] : memref<512x384xbf16, #tpu.memory_space<vmem>>, vector<512x384xbf16>
    %91 = arith.truncf %89 : vector<8x512xf32> to vector<8x512xbf16>
    %cst_70 = arith.constant dense<0.000000e+00> : vector<8x384xf32>
    %92 = tpu.matmul %91, %90, %cst_70 {dimension_numbers = #tpu.dot_dimension_numbers<[1], [0], [0], [1], [0, 0, 1, 1], [], []>} : vector<8x512xbf16>, vector<512x384xbf16>, vector<8x384xf32> -> vector<8x384xf32>
    %c0_71 = arith.constant 0 : index
    %c0_72 = arith.constant 0 : index
    %93 = vector.load %arg23[%c0_71, %c0_72] : memref<1x384xf32, #tpu.memory_space<vmem>>, vector<1x384xf32>
    %94 = vector.broadcast %93 : vector<1x384xf32> to vector<8x384xf32>
    %95 = arith.addf %92, %94 : vector<8x384xf32>
    %c0_73 = arith.constant 0 : index
    %c0_74 = arith.constant 0 : index
    %96 = vector.load %arg25[%c0_73, %c0_74] : memref<8x384xf32, #tpu.memory_space<vmem>>, vector<8x384xf32>
    tpu.vector_store %arg25[%c0_73, %c0_74], %95 {strides = array<i32>} : memref<8x384xf32, #tpu.memory_space<vmem>>, vector<8x384xf32>,
    return
  }
}

</mosaic_0001>

<bundles_post_ra>
// kernel: tpu_custom_call.1
= control target key start
LH: loop header
LB: loop body
LE: loop exit
PB: predicated region body
PF: predicated region fallthrough
CT: control target
= control target key end

     0   :  { %s7532_s0 = inlined_call_operand.hbm [shape: f32[8,384], index: 0, kind: input, shape index: {}]   ;;  %s7533_s1 = inlined_call_operand.hbm [shape: f32[8,128], index: 1, kind: input, shape index: {}]   ;;  %s7534_s2 = inlined_call_operand.hbm [shape: bf16[384,512], index: 2, kind: input, shape index: {}]   ;;  %s7535_s3 = inlined_call_operand.hbm [shape: bf16[512,384], index: 3, kind: input, shape index: {}]   ;;  %s7536_s4 = inlined_call_operand.hbm [shape: bf16[384,256], index: 4, kind: input, shape index: {}]   ;;  %s7537_s5 = inlined_call_operand.hbm [shape: bf16[256,128], index: 5, kind: input, shape index: {}]   ;;  %s7538_s6 = inlined_call_operand.hbm [shape: bf16[128,128], index: 6, kind: input, shape index: {}]   ;;  %s7539_s7 = inlined_call_operand.vmem [shape: f32[1,512], index: 7, kind: input, shape index: {}]   ;;  %s7540_s8 = inlined_call_operand.vmem [shape: f32[1,384], index: 8, kind: input, shape index: {}]   ;;  %s7541_s9 = inlined_call_operand.vmem [shape: f32[1,256], index: 9, kind: input, shape index: {}]   ;;  %s7542_s10 = inlined_call_operand.vmem [shape: f32[1,128], index: 10, kind: input, shape index: {}]   ;;  %s7543_s11 = inlined_call_operand.vmem [shape: f32[1,128], index: 11, kind: input, shape index: {}]   ;;  %s7544_s12 = inlined_call_operand.hbm [shape: bf16[128,256], index: 12, kind: input, shape index: {}]   ;;  %s7545_s13 = inlined_call_operand.vmem [shape: f32[1,256], index: 13, kind: input, shape index: {}]   ;;  %s7546_s14 = inlined_call_operand.hbm [shape: bf16[128,128], index: 14, kind: input, shape index: {}]   ;;  %s7547_s15 = inlined_call_operand.hbm [shape: bf16[128,256], index: 15, kind: input, shape index: {}]   ;;  %s7548_s16 = inlined_call_operand.hbm [shape: bf16[256,384], index: 16, kind: input, shape index: {}]   ;;  %s7549_s17 = inlined_call_operand.hbm [shape: bf16[384,512], index: 17, kind: input, shape index: {}]   ;;  %s7550_s18 = inlined_call_operand.hbm [shape: bf16[512,384], index: 18, kind: input, shape index: {}]   ;;  %s7551_s19 = inlined_call_operand.vmem [shape: f32[1,128], index: 19, kind: input, shape index: {}]   ;;  %s7552_s20 = inlined_call_operand.vmem [shape: f32[1,256], index: 20, kind: input, shape index: {}]   ;;  %s7553_s21 = inlined_call_operand.vmem [shape: f32[1,384], index: 21, kind: input, shape index: {}]   ;;  %s7554_s22 = inlined_call_operand.vmem [shape: f32[1,512], index: 22, kind: input, shape index: {}]   ;;  %s7555_s23 = inlined_call_operand.vmem [shape: f32[1,384], index: 23, kind: input, shape index: {}]   ;;  %s7556_s24 = inlined_call_operand.hbm [shape: f32[8,128], index: 24, kind: output, shape index: {0}]   ;;  %s7557_s25 = inlined_call_operand.hbm [shape: f32[8,384], index: 25, kind: output, shape index: {1}]   ;;  %s7558_s26 = inlined_call_operand.hbm [shape: f32[8,128], index: 26, kind: output, shape index: {2}]   ;;  %s7559_s27 = inlined_call_operand.hbm [shape: f32[8,128], index: 27, kind: output, shape index: {3}]  }
   0x1   :  { %7577 = sst [smem:[#allocation39_spill]] %s7532_s0 }
   0x2   :  { %7578 = sst [smem:[#allocation40_spill]] %s7533_s1 }
   0x3   :  { %7579 = sst [smem:[#allocation41_spill]] %s7534_s2 }
   0x4   :  { %7580 = sst [smem:[#allocation42_spill]] %s7535_s3 }
   0x5   :  { %7581 = sst [smem:[#allocation43_spill]] %s7536_s4 }
   0x6   :  { %7582 = sst [smem:[#allocation44_spill]] %s7537_s5 }
   0x7   :  { %7583 = sst [smem:[#allocation45_spill]] %s7538_s6 }
   0x8   :  { %7584 = sst [smem:[#allocation46_spill]] %s7539_s7 }
   0x9   :  { %7585 = sst [smem:[#allocation47_spill]] %s7540_s8 }
   0xa   :  { %7586 = sst [smem:[#allocation48_spill]] %s7541_s9 }
   0xb   :  { %7587 = sst [smem:[#allocation49_spill]] %s7542_s10 }
   0xc   :  { %7588 = sst [smem:[#allocation50_spill]] %s7543_s11 }
   0xd   :  { %7589 = sst [smem:[#allocation51_spill]] %s7557_s25 }
   0xe   :  { %7590 = sst [smem:[#allocation52_spill]] %s7558_s26 }
   0xf   :  { %33 = vsyncpa [#allocation3], 0 }
  0x10   :  { %34 = vsyncpa [#allocation6], 0 }
  0x11   :  { %35 = vsyncpa [#allocation9], 0 }
  0x12   :  { %36 = vsyncpa [#allocation12], 0 }
  0x13   :  { %37 = vsyncpa [#allocation15], 0 }
  0x14   :  { %38 = vsyncpa [#allocation18], 0 }
  0x15   :  { %39 = vsyncpa [#allocation21], 0 }
  0x16   :  { %40 = vsyncpa [#allocation4], 0 }
  0x17   :  { %41 = vsyncpa [#allocation25], 0 }
  0x18   :  { %42 = vsyncpa [#allocation28], 0  ;;  %s7000_s7 = smov [#allocation5]   ;;  %s7001_s8 = smov [#allocation8]  }
  0x19   :  { %s59_s4 = sshll.u32 %s7000_s7, 4  ;;  %s80_s30 = sshll.u32 %s7001_s8, 4  ;;  %s60_s4 = int_to_ptr.vmem [resolvable:$true] %s59_s4  ;;  %s7168_s30 = int_to_ptr.vmem [resolvable:$true] %s80_s30 }
  0x1a   :  { %s7591_s28 = sld [smem:[#allocation40_spill]] }
  0x20   :  { %s6606_s0 = scalar_lea.hbm %s7591_s28, 128 }
  0x21   :  { %p6607_p0 = scmp.ne.s32.totalorder %s7591_s28, %s6606_s0  ;;  %p6610_p1 = scmp.lt.u32.totalorder %s6606_s0, %s7591_s28 }
  0x23   :  { %p6612_p2 = pnand %p6610_p1, %p6607_p0 }
  0x25   :  { %6615 = shalt.err (!%p6612_p2)
}
  0x26   :  { %s6616_s11 = scalar_lea.vmem %s60_s4, 128  ;;  %p6621_p4 = scmp.lt.s32.totalorder %s60_s4, %s60_s4 }
  0x27   :  { %p6617_p3 = scmp.ne.s32.totalorder %s60_s4, %s6616_s11  ;;  %p6622_p5 = scmp.lt.s32.totalorder %s6616_s11, %s6616_s11 }
  0x29   :  { %p6623_p6 = por %p6622_p5, %p6621_p4 }
  0x2b   :  { %p6624_p7 = pnand %p6623_p6, %p6617_p3 }
  0x2d   :  { %6627 = shalt.err (!%p6624_p7)
}
  0x2e   :  { %62 = dma.hbm_to_vmem [thread:$0]  %s7591_s28, 128, %s60_s4, [#allocation6]  }
  0x2f   :  { %s7592_s9 = sld [smem:[#allocation42_spill]] }
  0x35   :  { %s6628_s5 = scalar_lea.hbm %s7592_s9, 12288 }
  0x36   :  { %p6629_p8 = scmp.ne.s32.totalorder %s7592_s9, %s6628_s5  ;;  %p6632_p9 = scmp.lt.u32.totalorder %s6628_s5, %s7592_s9 }
  0x38   :  { %p6634_p10 = pnand %p6632_p9, %p6629_p8 }
  0x3a   :  { %6637 = shalt.err (!%p6634_p10)
}
  0x3b   :  { %s6638_s6 = scalar_lea.vmem %s7168_s30, 12288  ;;  %p6643_p12 = scmp.lt.s32.totalorder %s7168_s30, %s7168_s30 }
  0x3c   :  { %p6639_p11 = scmp.ne.s32.totalorder %s7168_s30, %s6638_s6  ;;  %p6644_p13 = scmp.lt.s32.totalorder %s6638_s6, %s6638_s6 }
  0x3e   :  { %p6645_p0 = por %p6644_p13, %p6643_p12 }
  0x40   :  { %p6646_p1 = pnand %p6645_p0, %p6639_p11 }
  0x42   :  { %6649 = shalt.err (!%p6646_p1)
}
  0x43   :  { %s7569_s4 = smov 192   ;;  %s7571_s28 = smov 12  }
  0x44   :  { %86 = dma.hbm_to_vmem [thread:$0]  %s7592_s9, 12288, %s7168_s30, [#allocation9], %s7569_s4, %s7569_s4, %s7571_s28  }
  0x45   :  { %s7004_s3 = smov [#allocation11]   ;;  %s7593_s10 = sld [smem:[#allocation44_spill]] }
  0x46   :  { %s104_s7 = sshll.u32 %s7004_s3, 4  ;;  %s105_s7 = int_to_ptr.vmem [resolvable:$true] %s104_s7 }
  0x4b   :  { %s6650_s29 = scalar_lea.hbm %s7593_s10, 2048 }
  0x4c   :  { %p6651_p2 = scmp.ne.s32.totalorder %s7593_s10, %s6650_s29  ;;  %p6654_p3 = scmp.lt.u32.totalorder %s6650_s29, %s7593_s10 }
  0x4e   :  { %p6656_p4 = pnand %p6654_p3, %p6651_p2 }
  0x50   :  { %6659 = shalt.err (!%p6656_p4)
}
  0x51   :  { %s6660_s25 = scalar_lea.vmem %s105_s7, 2048  ;;  %p6665_p6 = scmp.lt.s32.totalorder %s105_s7, %s105_s7 }
  0x52   :  { %p6661_p5 = scmp.ne.s32.totalorder %s105_s7, %s6660_s25  ;;  %p6666_p7 = scmp.lt.s32.totalorder %s6660_s25, %s6660_s25 }
  0x54   :  { %p6667_p8 = por %p6666_p7, %p6665_p6 }
  0x56   :  { %p6668_p9 = pnand %p6667_p8, %p6661_p5 }
  0x58   :  { %6671 = shalt.err (!%p6668_p9)
}
  0x59   :  { %s7573_s30 = smov 64   ;;  %s7575_s9 = smov 4  }
  0x5a   :  { %110 = dma.hbm_to_vmem [thread:$0]  %s7593_s10, 2048, %s105_s7, [#allocation12], %s7573_s30, %s7573_s30, %s7575_s9  }
  0x5b   :  { %s7007_s26 = smov [#allocation14]   ;;  %s7008_s8 = smov [#allocation17]  }
  0x5c   :  { %s138_s3 = sshll.u32 %s7007_s26, 4  ;;  %s164_s5 = sshll.u32 %s7008_s8, 4  ;;  %s139_s3 = int_to_ptr.vmem [resolvable:$true] %s138_s3  ;;  %s165_s5 = int_to_ptr.vmem [resolvable:$true] %s164_s5 }
  0x5d   :  { %s6672_s25 = scalar_lea.hbm %s7544_s12, 2048 }
  0x5e   :  { %p6673_p10 = scmp.ne.s32.totalorder %s7544_s12, %s6672_s25  ;;  %p6676_p11 = scmp.lt.u32.totalorder %s6672_s25, %s7544_s12 }
  0x60   :  { %p6678_p12 = pnand %p6676_p11, %p6673_p10 }
  0x62   :  { %6681 = shalt.err (!%p6678_p12)
}
  0x63   :  { %s6682_s7 = scalar_lea.vmem %s139_s3, 2048  ;;  %p6687_p0 = scmp.lt.s32.totalorder %s139_s3, %s139_s3 }
  0x64   :  { %p6683_p13 = scmp.ne.s32.totalorder %s139_s3, %s6682_s7  ;;  %p6688_p1 = scmp.lt.s32.totalorder %s6682_s7, %s6682_s7 }
  0x66   :  { %p6689_p2 = por %p6688_p1, %p6687_p0 }
  0x68   :  { %p6690_p3 = pnand %p6689_p2, %p6683_p13 }
  0x6a   :  { %6693 = shalt.err (!%p6690_p3)
}
  0x6b   :  { %s7009_s10 = smov 128   ;;  %s7010_s11 = smov 8  }
  0x6c   :  { %144 = dma.hbm_to_vmem [thread:$0]  %s7544_s12, 2048, %s139_s3, [#allocation15], %s7009_s10, %s7009_s10, %s7010_s11  }
  0x6d   :  { %s6694_s8 = scalar_lea.hbm %s7547_s15, 2048 }
  0x6e   :  { %p6695_p4 = scmp.ne.s32.totalorder %s7547_s15, %s6694_s8  ;;  %p6698_p5 = scmp.lt.u32.totalorder %s6694_s8, %s7547_s15 }
  0x70   :  { %p6700_p6 = pnand %p6698_p5, %p6695_p4 }
  0x72   :  { %6703 = shalt.err (!%p6700_p6)
}
  0x73   :  { %s6704_s6 = scalar_lea.vmem %s165_s5, 2048  ;;  %p6709_p8 = scmp.lt.s32.totalorder %s165_s5, %s165_s5 }
  0x74   :  { %p6705_p7 = scmp.ne.s32.totalorder %s165_s5, %s6704_s6  ;;  %p6710_p9 = scmp.lt.s32.totalorder %s6704_s6, %s6704_s6 }
  0x76   :  { %p6711_p10 = por %p6710_p9, %p6709_p8 }
  0x78   :  { %p6712_p11 = pnand %p6711_p10, %p6705_p7 }
  0x7a   :  { %6715 = shalt.err (!%p6712_p11)
}
  0x7b   :  { %170 = dma.hbm_to_vmem [thread:$0]  %s7547_s15, 2048, %s165_s5, [#allocation18], %s7009_s10, %s7009_s10, %s7010_s11  }
  0x7c   :  { %s7011_s7 = smov [#allocation20]   ;;  %s7012_s26 = smov [#allocation2]  }
  0x7d   :  { %s188_s2 = sshll.u32 %s7011_s7, 4  ;;  %s49_s4 = sshll.u32 %s7012_s26, 4  ;;  %s189_s2 = int_to_ptr.vmem [resolvable:$true] %s188_s2  ;;  %s50_s4 = int_to_ptr.vmem [resolvable:$true] %s49_s4 }
  0x7e   :  { %s6716_s29 = scalar_lea.hbm %s7549_s17, 12288 }
  0x7f   :  { %p6717_p12 = scmp.ne.s32.totalorder %s7549_s17, %s6716_s29  ;;  %p6720_p13 = scmp.lt.u32.totalorder %s6716_s29, %s7549_s17 }
  0x81   :  { %p6722_p0 = pnand %p6720_p13, %p6717_p12 }
  0x83   :  { %6725 = shalt.err (!%p6722_p0)
}
  0x84   :  { %s6726_s15 = scalar_lea.vmem %s189_s2, 12288  ;;  %p6731_p2 = scmp.lt.s32.totalorder %s189_s2, %s189_s2 }
  0x85   :  { %p6727_p1 = scmp.ne.s32.totalorder %s189_s2, %s6726_s15  ;;  %p6732_p3 = scmp.lt.s32.totalorder %s6726_s15, %s6726_s15 }
  0x87   :  { %p6733_p4 = por %p6732_p3, %p6731_p2 }
  0x89   :  { %p6734_p5 = pnand %p6733_p4, %p6727_p1 }
  0x8b   :  { %6737 = shalt.err (!%p6734_p5)
}
  0x8c   :  { %s7013_s5 = smov 256   ;;  %s7014_s12 = smov 16  }
  0x8d   :  { %194 = dma.hbm_to_vmem [thread:$0]  %s7549_s17, 12288, %s189_s2, [#allocation21], %s7013_s5, %s7013_s5, %s7014_s12  }
  0x8e   :  { %s7594_s8 = sld [smem:[#allocation39_spill]] }
  0x94   :  { %s6738_s29 = scalar_lea.hbm %s7594_s8, 384 }
  0x95   :  { %p6739_p6 = scmp.ne.s32.totalorder %s7594_s8, %s6738_s29  ;;  %p6742_p7 = scmp.lt.u32.totalorder %s6738_s29, %s7594_s8 }
  0x97   :  { %p6744_p8 = pnand %p6742_p7, %p6739_p6 }
  0x99   :  { %6747 = shalt.err (!%p6744_p8)
}
  0x9a   :  { %s6748_s15 = scalar_lea.vmem %s50_s4, 384  ;;  %p6753_p10 = scmp.lt.s32.totalorder %s50_s4, %s50_s4 }
  0x9b   :  { %p6749_p9 = scmp.ne.s32.totalorder %s50_s4, %s6748_s15  ;;  %p6754_p11 = scmp.lt.s32.totalorder %s6748_s15, %s6748_s15 }
  0x9d   :  { %p6755_p12 = por %p6754_p11, %p6753_p10 }
  0x9f   :  { %p6756_p13 = pnand %p6755_p12, %p6749_p9 }
  0xa1   :  { %6759 = shalt.err (!%p6756_p13)
}
  0xa2   :  { %52 = dma.hbm_to_vmem [thread:$0]  %s7594_s8, 384, %s50_s4, [#allocation3]  }
  0xa3   :  { %s7015_s3 = smov [#allocation7]   ;;  %s7016_s26 = smov [#allocation10]  }
  0xa4   :  { %s68_s7 = sshll.u32 %s7015_s3, 4  ;;  %s92_s28 = sshll.u32 %s7016_s26, 4  ;;  %s69_s7 = int_to_ptr.vmem [resolvable:$true] %s68_s7  ;;  %s93_s28 = int_to_ptr.vmem [resolvable:$true] %s92_s28 }
  0xa5   :  { %s7595_s25 = sld [smem:[#allocation41_spill]] }
  0xab   :  { %s6760_s1 = scalar_lea.hbm %s7595_s25, 12288 }
  0xac   :  { %p6761_p0 = scmp.ne.s32.totalorder %s7595_s25, %s6760_s1  ;;  %p6764_p1 = scmp.lt.u32.totalorder %s6760_s1, %s7595_s25 }
  0xae   :  { %p6766_p2 = pnand %p6764_p1, %p6761_p0 }
  0xb0   :  { %6769 = shalt.err (!%p6766_p2)
}
  0xb1   :  { %s6770_s4 = scalar_lea.vmem %s69_s7, 12288  ;;  %p6775_p4 = scmp.lt.s32.totalorder %s69_s7, %s69_s7 }
  0xb2   :  { %p6771_p3 = scmp.ne.s32.totalorder %s69_s7, %s6770_s4  ;;  %p6776_p5 = scmp.lt.s32.totalorder %s6770_s4, %s6770_s4 }
  0xb4   :  { %p6777_p6 = por %p6776_p5, %p6775_p4 }
  0xb6   :  { %p6778_p7 = pnand %p6777_p6, %p6771_p3 }
  0xb8   :  { %6781 = shalt.err (!%p6778_p7)
}
  0xb9   :  { %74 = dma.hbm_to_vmem [thread:$0]  %s7595_s25, 12288, %s69_s7, [#allocation6], %s7013_s5, %s7013_s5, %s7014_s12  }
  0xba   :  { %s7596_s2 = sld [smem:[#allocation43_spill]] }
  0xc0   :  { %s6782_s3 = scalar_lea.hbm %s7596_s2, 6144 }
  0xc1   :  { %p6783_p8 = scmp.ne.s32.totalorder %s7596_s2, %s6782_s3  ;;  %p6786_p9 = scmp.lt.u32.totalorder %s6782_s3, %s7596_s2 }
  0xc3   :  { %p6788_p10 = pnand %p6786_p9, %p6783_p8 }
  0xc5   :  { %6791 = shalt.err (!%p6788_p10)
}
  0xc6   :  { %s6792_s6 = scalar_lea.vmem %s93_s28, 6144  ;;  %p6797_p12 = scmp.lt.s32.totalorder %s93_s28, %s93_s28 }
  0xc7   :  { %p6793_p11 = scmp.ne.s32.totalorder %s93_s28, %s6792_s6  ;;  %p6798_p13 = scmp.lt.s32.totalorder %s6792_s6, %s6792_s6 }
  0xc9   :  { %p6799_p0 = por %p6798_p13, %p6797_p12 }
  0xcb   :  { %p6800_p1 = pnand %p6799_p0, %p6793_p11 }
  0xcd   :  { %6803 = shalt.err (!%p6800_p1)
}
  0xce   :  { %98 = dma.hbm_to_vmem [thread:$0]  %s7596_s2, 6144, %s93_s28, [#allocation9], %s7009_s10, %s7009_s10, %s7010_s11  }
  0xcf   :  { %s7017_s7 = smov [#allocation13]   ;;  %s7018_s15 = smov [#allocation16]  }
  0xd0   :  { %s116_s25 = sshll.u32 %s7017_s7, 4  ;;  %s152_s4 = sshll.u32 %s7018_s15, 4  ;;  %s117_s25 = int_to_ptr.vmem [resolvable:$true] %s116_s25  ;;  %s153_s4 = int_to_ptr.vmem [resolvable:$true] %s152_s4 }
  0xd1   :  { %s7597_s30 = sld [smem:[#allocation45_spill]] }
  0xd7   :  { %s6804_s9 = scalar_lea.hbm %s7597_s30, 1024 }
  0xd8   :  { %p6805_p2 = scmp.ne.s32.totalorder %s7597_s30, %s6804_s9  ;;  %p6808_p3 = scmp.lt.u32.totalorder %s6804_s9, %s7597_s30 }
  0xda   :  { %p6810_p4 = pnand %p6808_p3, %p6805_p2 }
  0xdc   :  { %6813 = shalt.err (!%p6810_p4)
}
  0xdd   :  { %s6814_s10 = scalar_lea.vmem %s117_s25, 1024  ;;  %p6819_p6 = scmp.lt.s32.totalorder %s117_s25, %s117_s25 }
  0xde   :  { %p6815_p5 = scmp.ne.s32.totalorder %s117_s25, %s6814_s10  ;;  %p6820_p7 = scmp.lt.s32.totalorder %s6814_s10, %s6814_s10 }
  0xe0   :  { %p6821_p8 = por %p6820_p7, %p6819_p6 }
  0xe2   :  { %p6822_p9 = pnand %p6821_p8, %p6815_p5 }
  0xe4   :  { %6825 = shalt.err (!%p6822_p9)
}
  0xe5   :  { %s7598_s11 = smov 4   ;;  %s7599_s28 = smov 64  }
  0xe6   :  { %122 = dma.hbm_to_vmem [thread:$0]  %s7597_s30, 1024, %s117_s25, [#allocation12], %s7599_s28, %s7599_s28, %s7598_s11  }
  0xe7   :  { %s6826_s12 = scalar_lea.hbm %s7546_s14, 1024 }
  0xe8   :  { %p6827_p10 = scmp.ne.s32.totalorder %s7546_s14, %s6826_s12  ;;  %p6830_p11 = scmp.lt.u32.totalorder %s6826_s12, %s7546_s14 }
  0xea   :  { %p6832_p12 = pnand %p6830_p11, %p6827_p10 }
  0xec   :  { %6835 = shalt.err (!%p6832_p12)
}
  0xed   :  { %s6836_s9 = scalar_lea.vmem %s153_s4, 1024  ;;  %p6841_p0 = scmp.lt.s32.totalorder %s153_s4, %s153_s4 }
  0xee   :  { %p6837_p13 = scmp.ne.s32.totalorder %s153_s4, %s6836_s9  ;;  %p6842_p1 = scmp.lt.s32.totalorder %s6836_s9, %s6836_s9 }
  0xf0   :  { %p6843_p2 = por %p6842_p1, %p6841_p0 }
  0xf2   :  { %p6844_p3 = pnand %p6843_p2, %p6837_p13 }
  0xf4   :  { %6847 = shalt.err (!%p6844_p3)
}
  0xf5   :  { %158 = dma.hbm_to_vmem [thread:$0]  %s7546_s14, 1024, %s153_s4, [#allocation15], %s7599_s28, %s7599_s28, %s7598_s11  }
  0xf6   :  { %s7019_s3 = smov [#allocation19]   ;;  %s7020_s0 = smov [#allocation22]  }
  0xf7   :  { %s176_s26 = sshll.u32 %s7019_s3, 4  ;;  %s200_s29 = sshll.u32 %s7020_s0, 4  ;;  %s177_s26 = int_to_ptr.vmem [resolvable:$true] %s176_s26  ;;  %s201_s29 = int_to_ptr.vmem [resolvable:$true] %s200_s29 }
  0xf8   :  { %s6848_s1 = scalar_lea.hbm %s7548_s16, 6144 }
  0xf9   :  { %p6849_p4 = scmp.ne.s32.totalorder %s7548_s16, %s6848_s1  ;;  %p6852_p5 = scmp.lt.u32.totalorder %s6848_s1, %s7548_s16 }
  0xfb   :  { %p6854_p6 = pnand %p6852_p5, %p6849_p4 }
  0xfd   :  { %6857 = shalt.err (!%p6854_p6)
}
  0xfe   :  { %s6858_s14 = scalar_lea.vmem %s177_s26, 6144  ;;  %p6863_p8 = scmp.lt.s32.totalorder %s177_s26, %s177_s26 }
  0xff   :  { %p6859_p7 = scmp.ne.s32.totalorder %s177_s26, %s6858_s14  ;;  %p6864_p9 = scmp.lt.s32.totalorder %s6858_s14, %s6858_s14 }
 0x101   :  { %p6865_p10 = por %p6864_p9, %p6863_p8 }
 0x103   :  { %p6866_p11 = pnand %p6865_p10, %p6859_p7 }
 0x105   :  { %6869 = shalt.err (!%p6866_p11)
}
 0x106   :  { %s7600_s4 = smov 12   ;;  %s7601_s11 = smov 192  }
 0x107   :  { %182 = dma.hbm_to_vmem [thread:$0]  %s7548_s16, 6144, %s177_s26, [#allocation18], %s7601_s11, %s7601_s11, %s7600_s4  }
 0x108   :  { %s6870_s9 = scalar_lea.hbm %s7550_s18, 12288 }
 0x109   :  { %p6871_p12 = scmp.ne.s32.totalorder %s7550_s18, %s6870_s9  ;;  %p6874_p13 = scmp.lt.u32.totalorder %s6870_s9, %s7550_s18 }
 0x10b   :  { %p6876_p0 = pnand %p6874_p13, %p6871_p12 }
 0x10d   :  { %6879 = shalt.err (!%p6876_p0)
}
 0x10e   :  { %s6880_s10 = scalar_lea.vmem %s201_s29, 12288  ;;  %p6885_p2 = scmp.lt.s32.totalorder %s201_s29, %s201_s29 }
 0x10f   :  { %p6881_p1 = scmp.ne.s32.totalorder %s201_s29, %s6880_s10  ;;  %p6886_p3 = scmp.lt.s32.totalorder %s6880_s10, %s6880_s10 }
 0x111   :  { %p6887_p4 = por %p6886_p3, %p6885_p2 }
 0x113   :  { %p6888_p5 = pnand %p6887_p4, %p6881_p1 }
 0x115   :  { %6891 = shalt.err (!%p6888_p5)
}
 0x116   :  { %206 = dma.hbm_to_vmem [thread:$0]  %s7550_s18, 12288, %s201_s29, [#allocation21], %s7601_s11, %s7601_s11, %s7600_s4  }
 0x117   :  { %6980 = dma.done.wait [#allocation3], 384  }
 0x118   :  { %6981 = vsyncadd [#allocation3], 4294966912 }
 0x119   :  { %6982 = dma.done.wait [#allocation6], 12416  }
 0x11a   :  { %6983 = vsyncadd [#allocation6], 4294954880 }
 0x11b   :  { %6984 = dma.done.wait [#allocation9], 18432  }
 0x11c   :  { %6985 = vsyncadd [#allocation9], 4294948864 }
 0x11d   :  { %6986 = dma.done.wait [#allocation12], 3072  }
 0x11e   :  { %6987 = vsyncadd [#allocation12], 4294964224 }
 0x11f   :  { %6988 = dma.done.wait [#allocation15], 3072  }
 0x120   :  { %6989 = vsyncadd [#allocation15], 4294964224 }
 0x121   :  { %6990 = dma.done.wait [#allocation18], 8192  }
 0x122   :  { %6991 = vsyncadd [#allocation18], 4294959104 }
 0x123   :  { %6992 = dma.done.wait [#allocation21], 24576  }
 0x124   :  { %6993 = vsyncadd [#allocation21], 4294942720  ;;  %v5844_v0 = vld [vmem:[#allocation7 + $0x4] ss:$16 sps:$4 sm:$0xff]   ;;  %v5846_v1 = vld [vmem:[#allocation7] ss:$16 sps:$4 sm:$0xff]  }
 0x125   :  { %861 = vmatprep.subr.bf16.mxu0 %v5844_v0  ;;  %v5847_v2 = vld [vmem:[#allocation7 + $0x24] ss:$16 sps:$4 sm:$0xff]   ;;  %v5849_v3 = vld [vmem:[#allocation7 + $0x20] ss:$16 sps:$4 sm:$0xff]   ;;  %v5868_v8 = vld [vmem:[#allocation7 + $0xc] ss:$16 sps:$4 sm:$0xff]  }
 0x126   :  { %862 = vmatpush1.bf16.msra.mxu0 %v5846_v1  ;;  %v5850_v4 = vld [vmem:[#allocation7 + $0x44] ss:$16 sps:$4 sm:$0xff]   ;;  %v5852_v5 = vld [vmem:[#allocation7 + $0x40] ss:$16 sps:$4 sm:$0xff]   ;;  %v5870_v9 = vld [vmem:[#allocation7 + $0x8] ss:$16 sps:$4 sm:$0xff]   ;;  %943 = vmatprep.subr.bf16.mxu1 %v5868_v8 }
 0x127   :  { %863 = vmatprep.subr.bf16.mxu0 %v5847_v2  ;;  %v5853_v6 = vld [vmem:[#allocation7 + $0x64] ss:$16 sps:$4 sm:$0xff]   ;;  %v5855_v7 = vld [vmem:[#allocation7 + $0x60] ss:$16 sps:$4 sm:$0xff]   ;;  %944 = vmatpush1.bf16.msra.mxu1 %v5870_v9  ;;  %v5874_v11 = vld [vmem:[#allocation7 + $0x2c] ss:$16 sps:$4 sm:$0xff]  }
 0x128   :  { %v5856_v10 = vld [vmem:[#allocation7 + $0x84] ss:$16 sps:$4 sm:$0xff]   ;;  %v5876_v12 = vld [vmem:[#allocation7 + $0x28] ss:$16 sps:$4 sm:$0xff]   ;;  %v5858_v13 = vld [vmem:[#allocation7 + $0x80] ss:$16 sps:$4 sm:$0xff]   ;;  %945 = vmatprep.subr.bf16.mxu1 %v5874_v11 }
 0x129   :  { %v5859_v14 = vld [vmem:[#allocation7 + $0xa4] ss:$16 sps:$4 sm:$0xff]   ;;  %v5880_v15 = vld [vmem:[#allocation7 + $0x4c] ss:$16 sps:$4 sm:$0xff]   ;;  %v5882_v16 = vld [vmem:[#allocation7 + $0x48] ss:$16 sps:$4 sm:$0xff]  }
 0x12a   :  { %864 = vmatpush1.bf16.msra.mxu0 %v5849_v3  ;;  %v5861_v17 = vld [vmem:[#allocation7 + $0xa0] ss:$16 sps:$4 sm:$0xff]   ;;  %v5886_v18 = vld [vmem:[#allocation7 + $0x6c] ss:$16 sps:$4 sm:$0xff]   ;;  %v5862_v19 = vld [vmem:[#allocation7 + $0xc4] ss:$16 sps:$4 sm:$0xff]  }
 0x12b   :  { %865 = vmatprep.subr.bf16.mxu0 %v5850_v4  ;;  %946 = vmatpush1.bf16.msra.mxu1 %v5876_v12  ;;  %v5888_v20 = vld [vmem:[#allocation7 + $0x68] ss:$16 sps:$4 sm:$0xff]   ;;  %v5864_v21 = vld [vmem:[#allocation7 + $0xc0] ss:$16 sps:$4 sm:$0xff]   ;;  %v5892_v22 = vld [vmem:[#allocation7 + $0x8c] ss:$16 sps:$4 sm:$0xff]  }
 0x12c   :  { %947 = vmatprep.subr.bf16.mxu1 %v5880_v15  ;;  %v5865_v23 = vld [vmem:[#allocation7 + $0xe4] ss:$16 sps:$4 sm:$0xff]   ;;  %v5894_v24 = vld [vmem:[#allocation7 + $0x88] ss:$16 sps:$4 sm:$0xff]   ;;  %v5867_v25 = vld [vmem:[#allocation7 + $0xe0] ss:$16 sps:$4 sm:$0xff]  }
 0x12d   :  { %v5898_v26 = vld [vmem:[#allocation7 + $0xac] ss:$16 sps:$4 sm:$0xff]   ;;  %v5871_v27 = vld [vmem:[#allocation7 + $0x104] ss:$16 sps:$4 sm:$0xff]   ;;  %v5900_v28 = vld [vmem:[#allocation7 + $0xa8] ss:$16 sps:$4 sm:$0xff]  }
 0x12e   :  { %866 = vmatpush1.bf16.msra.mxu0 %v5852_v5  ;;  %v5873_v29 = vld [vmem:[#allocation7 + $0x100] ss:$16 sps:$4 sm:$0xff]   ;;  %v5904_v30 = vld [vmem:[#allocation7 + $0xcc] ss:$16 sps:$4 sm:$0xff]   ;;  %v5877_v31 = vld [vmem:[#allocation7 + $0x124] ss:$16 sps:$4 sm:$0xff]  }
 0x12f   :  { %867 = vmatprep.subr.bf16.mxu0 %v5853_v6  ;;  %948 = vmatpush1.bf16.msra.mxu1 %v5882_v16  ;;  %v258_v32 = vld [vmem:[#allocation2 + $0x8] sm:$0xff]  ;;  %v5879_v33 = vld [vmem:[#allocation7 + $0x120] ss:$16 sps:$4 sm:$0xff]   ;;  %v5883_v37 = vld [vmem:[#allocation7 + $0x144] ss:$16 sps:$4 sm:$0xff]   ;;  %v7021_v8 = vmov 0  }
 0x130   :  { %949 = vmatprep.subr.bf16.mxu1 %v5886_v18  ;;  %v5906_v34 = vld [vmem:[#allocation7 + $0xc8] ss:$16 sps:$4 sm:$0xff]   ;;  %v357_v35 = vpack.c.bf16 %v258_v32, %v258_v32  ;;  %v5910_v36 = vld [vmem:[#allocation7 + $0xec] ss:$16 sps:$4 sm:$0xff]   ;;  %v5885_v38 = vld [vmem:[#allocation7 + $0x140] ss:$16 sps:$4 sm:$0xff]  }
 0x131   :  { %v5912_v39 = vld [vmem:[#allocation7 + $0xe8] ss:$16 sps:$4 sm:$0xff]   ;;  %v5916_v40 = vld [vmem:[#allocation7 + $0x10c] ss:$16 sps:$4 sm:$0xff]   ;;  %v5889_v41 = vld [vmem:[#allocation7 + $0x164] ss:$16 sps:$4 sm:$0xff]  }
 0x132   :  { %868 = vmatpush1.bf16.msra.mxu0 %v5855_v7  ;;  %893 = vmatprep.mubr.bf16.mxu0 %v357_v35  ;;  %v5891_v42 = vld [vmem:[#allocation7 + $0x160] ss:$16 sps:$4 sm:$0xff]   ;;  %v5918_v43 = vld [vmem:[#allocation7 + $0x108] ss:$16 sps:$4 sm:$0xff]   ;;  %v5922_v44 = vld [vmem:[#allocation7 + $0x12c] ss:$16 sps:$4 sm:$0xff]  }
 0x133   :  { %869 = vmatprep.subr.bf16.mxu0 %v5856_v10  ;;  %950 = vmatpush1.bf16.msra.mxu1 %v5888_v20  ;;  %v5895_v45 = vld [vmem:[#allocation7 + $0x184] ss:$16 sps:$4 sm:$0xff]   ;;  %v5897_v46 = vld [vmem:[#allocation7 + $0x180] ss:$16 sps:$4 sm:$0xff]   ;;  %v5924_v47 = vld [vmem:[#allocation7 + $0x128] ss:$16 sps:$4 sm:$0xff]  }
 0x134   :  { %951 = vmatprep.subr.bf16.mxu1 %v5892_v22  ;;  %975 = vmatprep.mubr.bf16.mxu1 %v357_v35  ;;  %v5928_v48 = vld [vmem:[#allocation7 + $0x14c] ss:$16 sps:$4 sm:$0xff]   ;;  %v5901_v49 = vld [vmem:[#allocation7 + $0x1a4] ss:$16 sps:$4 sm:$0xff]   ;;  %v5903_v50 = vld [vmem:[#allocation7 + $0x1a0] ss:$16 sps:$4 sm:$0xff]  }
 0x135   :  { %v5930_v51 = vld [vmem:[#allocation7 + $0x148] ss:$16 sps:$4 sm:$0xff]   ;;  %v5934_v52 = vld [vmem:[#allocation7 + $0x16c] ss:$16 sps:$4 sm:$0xff]   ;;  %v5907_v53 = vld [vmem:[#allocation7 + $0x1c4] ss:$16 sps:$4 sm:$0xff]  }
 0x136   :  { %870 = vmatpush1.bf16.msra.mxu0 %v5858_v13  ;;  %v5936_v54 = vld [vmem:[#allocation7 + $0x168] ss:$16 sps:$4 sm:$0xff]   ;;  %v5909_v55 = vld [vmem:[#allocation7 + $0x1c0] ss:$16 sps:$4 sm:$0xff]   ;;  %v5940_v56 = vld [vmem:[#allocation7 + $0x18c] ss:$16 sps:$4 sm:$0xff]  }
 0x137   :  { %871 = vmatprep.subr.bf16.mxu0 %v5859_v14  ;;  %952 = vmatpush1.bf16.msra.mxu1 %v5894_v24  ;;  %v5913_v57 = vld [vmem:[#allocation7 + $0x1e4] ss:$16 sps:$4 sm:$0xff]   ;;  %v5915_v58 = vld [vmem:[#allocation7 + $0x1e0] ss:$16 sps:$4 sm:$0xff]   ;;  %v5942_v59 = vld [vmem:[#allocation7 + $0x188] ss:$16 sps:$4 sm:$0xff]  }
 0x138   :  { %953 = vmatprep.subr.bf16.mxu1 %v5898_v26  ;;  %v257_v60 = vld [vmem:[#allocation2] sm:$0xff]  ;;  %v5946_v61 = vld [vmem:[#allocation7 + $0x1ac] ss:$16 sps:$4 sm:$0xff]   ;;  %v5948_v0 = vld [vmem:[#allocation7 + $0x1a8] ss:$16 sps:$4 sm:$0xff]   ;;  %s7602_s2 = sld [smem:[#allocation46_spill]] }
 0x139   :  { %v5921_v62 = vld [vmem:[#allocation7 + $0x204] ss:$16 sps:$4 sm:$0xff]   ;;  %v356_v63 = vpack.c.bf16 %v257_v60, %v257_v60  ;;  %v5919_v1 = vld [vmem:[#allocation7 + $0x200] ss:$16 sps:$4 sm:$0xff]   ;;  %v5952_v2 = vld [vmem:[#allocation7 + $0x1cc] ss:$16 sps:$4 sm:$0xff]  }
 0x13a   :  { %872 = vmatpush1.bf16.msra.mxu0 %v5861_v17  ;;  %v5927_v3 = vld [vmem:[#allocation7 + $0x224] ss:$16 sps:$4 sm:$0xff]   ;;  %v5954_v4 = vld [vmem:[#allocation7 + $0x1c8] ss:$16 sps:$4 sm:$0xff]   ;;  %v5925_v5 = vld [vmem:[#allocation7 + $0x220] ss:$16 sps:$4 sm:$0xff]  }
 0x13b   :  { %873 = vmatprep.subr.bf16.mxu0 %v5862_v19  ;;  %954 = vmatpush1.bf16.msra.mxu1 %v5900_v28  ;;  %v5958_v6 = vld [vmem:[#allocation7 + $0x1ec] ss:$16 sps:$4 sm:$0xff]   ;;  %v5933_v7 = vld [vmem:[#allocation7 + $0x244] ss:$16 sps:$4 sm:$0xff]   ;;  %v5960_v9 = vld [vmem:[#allocation7 + $0x1e8] ss:$16 sps:$4 sm:$0xff]  }
 0x13c   :  { %955 = vmatprep.subr.bf16.mxu1 %v5904_v30  ;;  %v5931_v10 = vld [vmem:[#allocation7 + $0x240] ss:$16 sps:$4 sm:$0xff]   ;;  %v5966_v11 = vld [vmem:[#allocation7 + $0x20c] ss:$16 sps:$4 sm:$0xff]   ;;  %v5939_v12 = vld [vmem:[#allocation7 + $0x264] ss:$16 sps:$4 sm:$0xff]  }
 0x13d   :  { %v5964_v13 = vld [vmem:[#allocation7 + $0x208] ss:$16 sps:$4 sm:$0xff]   ;;  %v5937_v14 = vld [vmem:[#allocation7 + $0x260] ss:$16 sps:$4 sm:$0xff]   ;;  %v5969_v15 = vld [vmem:[#allocation7 + $0x22c] ss:$16 sps:$4 sm:$0xff]  }
 0x13e   :  { %874 = vmatpush1.bf16.msra.mxu0 %v5864_v21  ;;  %v5945_v16 = vld [vmem:[#allocation7 + $0x284] ss:$16 sps:$4 sm:$0xff]   ;;  %v5943_v17 = vld [vmem:[#allocation7 + $0x280] ss:$16 sps:$4 sm:$0xff]   ;;  %v5967_v18 = vld [vmem:[#allocation7 + $0x228] ss:$16 sps:$4 sm:$0xff]  }
 0x13f   :  { %875 = vmatprep.subr.bf16.mxu0 %v5865_v23  ;;  %956 = vmatpush1.bf16.msra.mxu1 %v5906_v34  ;;  %v5972_v19 = vld [vmem:[#allocation7 + $0x24c] ss:$16 sps:$4 sm:$0xff]   ;;  %v5951_v20 = vld [vmem:[#allocation7 + $0x2a4] ss:$16 sps:$4 sm:$0xff]   ;;  %v5970_v21 = vld [vmem:[#allocation7 + $0x248] ss:$16 sps:$4 sm:$0xff]  }
 0x140   :  { %957 = vmatprep.subr.bf16.mxu1 %v5910_v36  ;;  %v5949_v22 = vld [vmem:[#allocation7 + $0x2a0] ss:$16 sps:$4 sm:$0xff]   ;;  %v5975_v23 = vld [vmem:[#allocation7 + $0x26c] ss:$16 sps:$4 sm:$0xff]   ;;  %v5957_v24 = vld [vmem:[#allocation7 + $0x2c4] ss:$16 sps:$4 sm:$0xff]  }
 0x141   :  { %v5973_v26 = vld [vmem:[#allocation7 + $0x268] ss:$16 sps:$4 sm:$0xff]   ;;  %v5963_v28 = vld [vmem:[#allocation7 + $0x2e4] ss:$16 sps:$4 sm:$0xff]   ;;  %v5981_v32 = vld [vmem:[#allocation7 + $0x2ac] ss:$16 sps:$4 sm:$0xff]  }
 0x142   :  { %876 = vmatpush1.bf16.msra.mxu0 %v5867_v25  ;;  %v5955_v25 = vld [vmem:[#allocation7 + $0x2c0] ss:$16 sps:$4 sm:$0xff]   ;;  %v5979_v34 = vld [vmem:[#allocation7 + $0x2a8] ss:$16 sps:$4 sm:$0xff]   ;;  %v5984_v36 = vld [vmem:[#allocation7 + $0x2cc] ss:$16 sps:$4 sm:$0xff]  }
 0x143   :  { %877 = vmatprep.subr.bf16.mxu0 %v5871_v27  ;;  %958 = vmatpush1.bf16.msra.mxu1 %v5912_v39  ;;  %v5978_v27 = vld [vmem:[#allocation7 + $0x28c] ss:$16 sps:$4 sm:$0xff]   ;;  %v259_v30 = vld [vmem:[#allocation2 + $0x10] sm:$0xff]  ;;  %v5982_v39 = vld [vmem:[#allocation7 + $0x2c8] ss:$16 sps:$4 sm:$0xff]   ;;  %s7603_s5 = sld [smem:[#allocation47_spill]] }
 0x144   :  { %959 = vmatprep.subr.bf16.mxu1 %v5916_v40  ;;  %v358_v35 = vpack.c.bf16 %v259_v30, %v259_v30  ;;  %v5987_v40 = vld [vmem:[#allocation7 + $0x2ec] ss:$16 sps:$4 sm:$0xff]   ;;  %s7604_s14 = sld [smem:[#allocation48_spill]]  ;;  %vm7023_vm0 = vmmov 0   ;;  %s7605_s28 = sld [smem:[#allocation49_spill]] }
 0x145   :  { %v6006_v60 = vld [vmem:[#allocation8 + $0x90] ss:$12 sps:$4 sm:$0xff]   ;;  %s7606_s17 = sld [smem:[#allocation50_spill]] }
 0x146   :  { %878 = vmatpush1.bf16.msra.mxu0 %v5873_v29  ;;  %v5961_v29 = vld [vmem:[#allocation7 + $0x2e0] ss:$16 sps:$4 sm:$0xff]  }
 0x147   :  { %879 = vmatprep.subr.bf16.mxu0 %v5877_v31  ;;  %960 = vmatpush1.bf16.msra.mxu1 %v5918_v43  ;;  %v5976_v31 = vld [vmem:[#allocation7 + $0x288] ss:$16 sps:$4 sm:$0xff]  }
 0x148   :  { %961 = vmatprep.subr.bf16.mxu1 %v5922_v44  ;;  %v5985_v43 = vld [vmem:[#allocation7 + $0x2e8] ss:$16 sps:$4 sm:$0xff]   ;;  %v5994_v44 = vld [vmem:[#allocation8 + $0x30] ss:$12 sps:$4 sm:$0xff]  }
 0x14a   :  { %880 = vmatpush1.bf16.msra.mxu0 %v5879_v33  ;;  %v5990_v33 = vld [vmem:[#allocation8 + $0x4] ss:$12 sps:$4 sm:$0xff]  }
 0x14b   :  { %881 = vmatprep.subr.bf16.mxu0 %v5883_v37  ;;  %962 = vmatpush1.bf16.msra.mxu1 %v5924_v47  ;;  %v5988_v37 = vld [vmem:[#allocation8] ss:$12 sps:$4 sm:$0xff]   ;;  %v6016_v47 = vld [vmem:[#allocation8 + $0x8] ss:$12 sps:$4 sm:$0xff]  }
 0x14c   :  { %963 = vmatprep.subr.bf16.mxu1 %v5928_v48  ;;  %v5997_v48 = vld [vmem:[#allocation8 + $0x48] ss:$12 sps:$4 sm:$0xff]  }
 0x14e   :  { %882 = vmatpush1.bf16.msra.mxu0 %v5885_v38  ;;  %v5993_v38 = vld [vmem:[#allocation8 + $0x1c] ss:$12 sps:$4 sm:$0xff]  }
 0x14f   :  { %883 = vmatprep.subr.bf16.mxu0 %v5889_v41  ;;  %964 = vmatpush1.bf16.msra.mxu1 %v5930_v51  ;;  %v5991_v41 = vld [vmem:[#allocation8 + $0x18] ss:$12 sps:$4 sm:$0xff]   ;;  %v6021_v51 = vld [vmem:[#allocation8 + $0x20] ss:$12 sps:$4 sm:$0xff]  }
 0x150   :  { %965 = vmatprep.subr.bf16.mxu1 %v5934_v52  ;;  %v6000_v52 = vld [vmem:[#allocation8 + $0x60] ss:$12 sps:$4 sm:$0xff]  }
 0x152   :  { %884 = vmatpush1.bf16.msra.mxu0 %v5891_v42  ;;  %v5996_v42 = vld [vmem:[#allocation8 + $0x34] ss:$12 sps:$4 sm:$0xff]  }
 0x153   :  { %885 = vmatprep.subr.bf16.mxu0 %v5895_v45  ;;  %966 = vmatpush1.bf16.msra.mxu1 %v5936_v54  ;;  %v6015_v45 = vld [vmem:[#allocation8 + $0xc8] ss:$12 sps:$4 sm:$0xff]  }
 0x154   :  { %967 = vmatprep.subr.bf16.mxu1 %v5940_v56  ;;  %v6005_v54 = vld [vmem:[#allocation8 + $0x7c] ss:$12 sps:$4 sm:$0xff]   ;;  %v6003_v56 = vld [vmem:[#allocation8 + $0x78] ss:$12 sps:$4 sm:$0xff]  }
 0x156   :  { %886 = vmatpush1.bf16.msra.mxu0 %v5897_v46  ;;  %v5999_v46 = vld [vmem:[#allocation8 + $0x4c] ss:$12 sps:$4 sm:$0xff]  }
 0x157   :  { %887 = vmatprep.subr.bf16.mxu0 %v5901_v49  ;;  %968 = vmatpush1.bf16.msra.mxu1 %v5942_v59  ;;  %v6020_v49 = vld [vmem:[#allocation8 + $0xe0] ss:$12 sps:$4 sm:$0xff]   ;;  %v6031_v59 = vld [vmem:[#allocation8 + $0x50] ss:$12 sps:$4 sm:$0xff]  }
 0x158   :  { %969 = vmatprep.subr.bf16.mxu1 %v5946_v61  ;;  %v6035_v61 = vld [vmem:[#allocation8 + $0x128] ss:$12 sps:$4 sm:$0xff]  }
 0x15a   :  { %888 = vmatpush1.bf16.msra.mxu0 %v5903_v50  ;;  %v6002_v50 = vld [vmem:[#allocation8 + $0x64] ss:$12 sps:$4 sm:$0xff]  }
 0x15b   :  { %889 = vmatprep.subr.bf16.mxu0 %v5907_v53  ;;  %970 = vmatpush1.bf16.msra.mxu1 %v5948_v0  ;;  %v6025_v53 = vld [vmem:[#allocation8 + $0xf8] ss:$12 sps:$4 sm:$0xff]   ;;  %v6009_v0 = vld [vmem:[#allocation8 + $0xa8] ss:$12 sps:$4 sm:$0xff]  }
 0x15c   :  { %971 = vmatprep.subr.bf16.mxu1 %v5952_v2  ;;  %v6014_v2 = vld [vmem:[#allocation8 + $0xc4] ss:$12 sps:$4 sm:$0xff]  }
 0x15e   :  { %890 = vmatpush1.bf16.msra.mxu0 %v5909_v55  ;;  %v6026_v55 = vld [vmem:[#allocation8 + $0x38] ss:$12 sps:$4 sm:$0xff]  }
 0x15f   :  { %891 = vmatprep.subr.bf16.mxu0 %v5913_v57  ;;  %972 = vmatpush1.bf16.msra.mxu1 %v5954_v4  ;;  %v6030_v57 = vld [vmem:[#allocation8 + $0x110] ss:$12 sps:$4 sm:$0xff]   ;;  %v6012_v4 = vld [vmem:[#allocation8 + $0xc0] ss:$12 sps:$4 sm:$0xff]  }
 0x160   :  { %973 = vmatprep.subr.bf16.mxu1 %v5958_v6  ;;  %v6017_v6 = vld [vmem:[#allocation8 + $0xd8] ss:$12 sps:$4 sm:$0xff]  }
 0x162   :  { %892 = vmatpush1.bf16.msra.mxu0 %v5915_v58  ;;  %v6008_v58 = vld [vmem:[#allocation8 + $0x94] ss:$12 sps:$4 sm:$0xff]  }
 0x163   :  { %902 = vmatprep.subr.bf16.mxu0 %v5921_v62  ;;  %974 = vmatpush1.bf16.msra.mxu1 %v5960_v9  ;;  %v6011_v62 = vld [vmem:[#allocation8 + $0xac] ss:$12 sps:$4 sm:$0xff]   ;;  %v6022_v9 = vld [vmem:[#allocation8 + $0xf0] ss:$12 sps:$4 sm:$0xff]  }
 0x164   :  { %984 = vmatprep.subr.bf16.mxu1 %v5966_v11  ;;  %v6027_v11 = vld [vmem:[#allocation8 + $0x108] ss:$12 sps:$4 sm:$0xff]  }
 0x165   :  { %894 = vmatmul.mubr.bf16.vlgmr.msra.gmra.mrb[0].mxu0 %v356_v63 }
 0x166   :  { %903 = vmatpush1.bf16.msra.mxu0 %v5919_v1  ;;  %934 = vmatprep.mubr.bf16.mxu0 %v7021_v8  ;;  %v6040_v1 = vld [vmem:[#allocation8 + $0x140] ss:$12 sps:$4 sm:$0xff]  }
 0x167   :  { %904 = vmatprep.subr.bf16.mxu0 %v5927_v3  ;;  %976 = vmatmul.mubr.bf16.vlgmr.msra.gmra.mrb[0].mxu1 %v356_v63  ;;  %v6036_v63 = vld [vmem:[#allocation8 + $0x68] ss:$12 sps:$4 sm:$0xff]   ;;  %v6041_v3 = vld [vmem:[#allocation8 + $0x80] ss:$12 sps:$4 sm:$0xff]  }
 0x168   :  { %985 = vmatpush1.bf16.msra.mxu1 %v5964_v13  ;;  %1016 = vmatprep.mubr.bf16.mxu1 %v7021_v8  ;;  %v6032_v13 = vld [vmem:[#allocation8 + $0x120] ss:$12 sps:$4 sm:$0xff]  }
 0x169   :  { %986 = vmatprep.subr.bf16.mxu1 %v5969_v15  ;;  %v6037_v15 = vld [vmem:[#allocation8 + $0x138] ss:$12 sps:$4 sm:$0xff]  }
 0x16a   :  { %905 = vmatpush1.bf16.msra.mxu0 %v5925_v5  ;;  %v6019_v5 = vld [vmem:[#allocation8 + $0xdc] ss:$12 sps:$4 sm:$0xff]  }
 0x16b   :  { %906 = vmatprep.subr.bf16.mxu0 %v5933_v7  ;;  %v6024_v7 = vld [vmem:[#allocation8 + $0xf4] ss:$12 sps:$4 sm:$0xff]  }
 0x16c   :  { %987 = vmatpush1.bf16.msra.mxu1 %v5967_v18  ;;  %v6042_v18 = vld [vmem:[#allocation8 + $0x150] ss:$12 sps:$4 sm:$0xff]  }
 0x16d   :  { %988 = vmatprep.subr.bf16.mxu1 %v5972_v19  ;;  %v6046_v19 = vld [vmem:[#allocation8 + $0x98] ss:$12 sps:$4 sm:$0xff]  }
 0x16e   :  { %907 = vmatpush1.bf16.msra.mxu0 %v5931_v10  ;;  %v6029_v10 = vld [vmem:[#allocation8 + $0x10c] ss:$12 sps:$4 sm:$0xff]  }
 0x16f   :  { %908 = vmatprep.subr.bf16.mxu0 %v5939_v12  ;;  %v6034_v12 = vld [vmem:[#allocation8 + $0x124] ss:$12 sps:$4 sm:$0xff]  }
 0x170   :  { %989 = vmatpush1.bf16.msra.mxu1 %v5970_v21  ;;  %v6050_v21 = vld [vmem:[#allocation8 + $0x170] ss:$12 sps:$4 sm:$0xff]  }
 0x171   :  { %990 = vmatprep.subr.bf16.mxu1 %v5975_v23  ;;  %v6051_v23 = vld [vmem:[#allocation8 + $0xb0] ss:$12 sps:$4 sm:$0xff]  }
 0x172   :  { %909 = vmatpush1.bf16.msra.mxu0 %v5937_v14  ;;  %v6039_v14 = vld [vmem:[#allocation8 + $0x13c] ss:$12 sps:$4 sm:$0xff]  }
 0x173   :  { %910 = vmatprep.subr.bf16.mxu0 %v5945_v16  ;;  %v6044_v16 = vld [vmem:[#allocation8 + $0x154] ss:$12 sps:$4 sm:$0xff]  }
 0x174   :  { %991 = vmatpush1.bf16.msra.mxu1 %v5973_v26  ;;  %v361_v26 = vlaneseq }
 0x175   :  { %992 = vmatprep.subr.bf16.mxu1 %v5978_v27 }
 0x176   :  { %911 = vmatpush1.bf16.msra.mxu0 %v5943_v17  ;;  %v6045_v17 = vld [vmem:[#allocation8 + $0x158] ss:$12 sps:$4 sm:$0xff]   ;;  %v7366_v27 = vshrl.u32 %v361_v26, 7  ;;  %v6097_v26 = vld [vmem:[#allocation8 + $0x25c] ss:$12 sps:$4 sm:$0xff]  }
 0x177   :  { %912 = vmatprep.subr.bf16.mxu0 %v5951_v20  ;;  %v6049_v20 = vld [vmem:[#allocation8 + $0x16c] ss:$12 sps:$4 sm:$0xff]  }
 0x178   :  { %993 = vmatpush1.bf16.msra.mxu1 %v5976_v31  ;;  %v7377_v30 = vsub.s32 1, %v7366_v27 }
 0x179   :  { %994 = vmatprep.subr.bf16.mxu1 %v5981_v32 }
 0x17a   :  { %913 = vmatpush1.bf16.msra.mxu0 %v5949_v22  ;;  %v6047_v22 = vld [vmem:[#allocation8 + $0x168] ss:$12 sps:$4 sm:$0xff]  }
 0x17b   :  { %914 = vmatprep.subr.bf16.mxu0 %v5957_v24  ;;  %v6054_v24 = vld [vmem:[#allocation8 + $0x184] ss:$12 sps:$4 sm:$0xff]  }
 0x17c   :  { %995 = vmatpush1.bf16.msra.mxu1 %v5979_v34 }
 0x17d   :  { %996 = vmatprep.subr.bf16.mxu1 %v5984_v36 }
 0x17e   :  { %915 = vmatpush1.bf16.msra.mxu0 %v5955_v25  ;;  %v6055_v25 = vld [vmem:[#allocation8 + $0x248] ss:$12 sps:$4 sm:$0xff]  }
 0x17f   :  { %916 = vmatprep.subr.bf16.mxu0 %v5963_v28  ;;  %v7369_v28 = vsub.s32 0, %v7366_v27 }
 0x180   :  { %997 = vmatpush1.bf16.msra.mxu1 %v5982_v39 }
 0x181   :  { %998 = vmatprep.subr.bf16.mxu1 %v5987_v40 }
 0x182   :  { %917 = vmatpush1.bf16.msra.mxu0 %v5961_v29  ;;  %v7374_v29 = vld [vmem:[%s7602_s2] sm:$0xf] }
 0x183   :  { %1690 = vmatprep.subr.bf16.mxu0 %v5990_v33  ;;  %v364_v31 = vrot.slane %v7374_v29, %v7369_v28  ;;  %v368_v32 = vrot.slane %v7374_v29, %v7377_v30 }
 0x184   :  { %999 = vmatpush1.bf16.msra.mxu1 %v5985_v43  ;;  %v6052_v43 = vld [vmem:[#allocation8 + $0x180] ss:$12 sps:$4 sm:$0xff]  }
 0x185   :  { %935 = vmatmul.mubr.bf16.vlgmr.msra.gmra.mrb[0].mxu0 %v358_v35  ;;  %5584 = vmatprep.subr.bf16.mxu1 %v6015_v45 }
 0x186   :  { %1691 = vmatpush1.bf16.msra.mxu0 %v5988_v37 }
 0x187   :  { %1692 = vmatprep.subr.bf16.mxu0 %v5993_v38  ;;  %1017 = vmatmul.mubr.bf16.vlgmr.msra.gmra.mrb[0].mxu1 %v358_v35 }
 0x188   :  { %5585 = vmatpush3.bf16.msra.mxu1 %v6016_v47  ;;  %v6060_v47 = vld [vmem:[#allocation8 + $0x260] ss:$12 sps:$4 sm:$0xff]  }
 0x189   :  { %5586 = vmatprep.subr.bf16.mxu1 %v6020_v49  ;;  %v6057_v49 = vld [vmem:[#allocation8 + $0x198] ss:$12 sps:$4 sm:$0xff]  }
 0x18a   :  { %1693 = vmatpush1.bf16.msra.mxu0 %v5991_v41  ;;  %v375_v41 = vsub.s32 3, %v7366_v27 }
 0x18b   :  { %1694 = vmatprep.subr.bf16.mxu0 %v5996_v42 }
 0x18c   :  { %5587 = vmatpush3.bf16.msra.mxu1 %v6021_v51  ;;  %v6064_v51 = vld [vmem:[#allocation8 + $0x1b4] ss:$12 sps:$4 sm:$0xff]  }
 0x18d   :  { %5588 = vmatprep.subr.bf16.mxu1 %v6025_v53 }
 0x18e   :  { %1695 = vmatpush1.bf16.msra.mxu0 %v5994_v44  ;;  %v6056_v44 = vld [vmem:[#allocation8 + $0x188] ss:$12 sps:$4 sm:$0xff]  }
 0x18f   :  { %1696 = vmatprep.subr.bf16.mxu0 %v5999_v46  ;;  %v6059_v46 = vld [vmem:[#allocation8 + $0x19c] ss:$12 sps:$4 sm:$0xff]  }
 0x190   :  { %5589 = vmatpush3.bf16.msra.mxu1 %v6026_v55 }
 0x191   :  { %5590 = vmatprep.subr.bf16.mxu1 %v6030_v57  ;;  %v6062_v57 = vld [vmem:[#allocation8 + $0x1b0] ss:$12 sps:$4 sm:$0xff]  }
 0x192   :  { %1697 = vmatpush1.bf16.msra.mxu0 %v5997_v48  ;;  %v376_v48 = vrot.slane %v7374_v29, %v375_v41 }
 0x193   :  { %1698 = vmatprep.subr.bf16.mxu0 %v6002_v50  ;;  %v6061_v50 = vld [vmem:[#allocation8 + $0x1a0] ss:$12 sps:$4 sm:$0xff]  }
 0x194   :  { %5591 = vmatpush3.bf16.msra.mxu1 %v6031_v59 }
 0x195   :  { %5592 = vmatprep.subr.bf16.mxu1 %v6035_v61  ;;  %v6070_v61 = vld [vmem:[#allocation8 + $0x290] ss:$12 sps:$4 sm:$0xff]  }
 0x196   :  { %1699 = vmatpush1.bf16.msra.mxu0 %v6000_v52  ;;  %v6065_v52 = vld [vmem:[#allocation8 + $0x278] ss:$12 sps:$4 sm:$0xff]  }
 0x197   :  { %1700 = vmatprep.subr.bf16.mxu0 %v6005_v54 }
 0x198   :  { %5593 = vmatpush3.bf16.msra.mxu1 %v6036_v63 }
 0x199   :  { %5594 = vmatprep.subr.bf16.mxu1 %v6040_v1  ;;  %v6071_v1 = vld [vmem:[#allocation8 + $0x1d0] ss:$12 sps:$4 sm:$0xff]  }
 0x19a   :  { %1701 = vmatpush1.bf16.msra.mxu0 %v6003_v56 }
 0x19b   :  { %1702 = vmatprep.subr.bf16.mxu0 %v6008_v58  ;;  %v6066_v58 = vld [vmem:[#allocation8 + $0x1b8] ss:$12 sps:$4 sm:$0xff]  }
 0x19c   :  { %5595 = vmatpush3.bf16.msra.mxu1 %v6041_v3  ;;  %v6075_v3 = vld [vmem:[#allocation8 + $0x2a8] ss:$12 sps:$4 sm:$0xff]  }
 0x19d   :  { %5596 = vmatprep.subr.bf16.mxu1 %v6045_v17  ;;  %v6086_v17 = vld [vmem:[#allocation8 + $0x218] ss:$12 sps:$4 sm:$0xff]  }
 0x19e   :  { %1703 = vmatpush1.bf16.msra.mxu0 %v6006_v60  ;;  %v6069_v60 = vld [vmem:[#allocation8 + $0x1cc] ss:$12 sps:$4 sm:$0xff]  }
 0x19f   :  { %1704 = vmatprep.subr.bf16.mxu0 %v6011_v62 }
 0x1a0   :  { %5597 = vmatpush3.bf16.msra.mxu1 %v6046_v19  ;;  %v6090_v19 = vld [vmem:[#allocation8 + $0x2f0] ss:$12 sps:$4 sm:$0xff]  }
 0x1a1   :  { %5598 = vmatprep.subr.bf16.mxu1 %v6050_v21  ;;  %v6087_v21 = vld [vmem:[#allocation8 + $0x228] ss:$12 sps:$4 sm:$0xff]  }
 0x1a2   :  { %1705 = vmatpush1.bf16.msra.mxu0 %v6009_v0  ;;  %v6067_v0 = vld [vmem:[#allocation8 + $0x1c8] ss:$12 sps:$4 sm:$0xff]  }
 0x1a3   :  { %1706 = vmatprep.subr.bf16.mxu0 %v6014_v2  ;;  %v6074_v2 = vld [vmem:[#allocation8 + $0x1e4] ss:$12 sps:$4 sm:$0xff]  }
 0x1a4   :  { %5599 = vmatpush3.bf16.msra.mxu1 %v6051_v23  ;;  %v6094_v23 = vld [vmem:[#allocation8 + $0x244] ss:$12 sps:$4 sm:$0xff]  }
 0x1a5   :  { %5606 = vmatprep.subr.bf16.mxu1 %v6055_v25  ;;  %v6092_v25 = vld [vmem:[#allocation8 + $0x240] ss:$12 sps:$4 sm:$0xff]  }
 0x1a6   :  { %1707 = vmatpush1.bf16.msra.mxu0 %v6012_v4  ;;  %v7388_v4 = vsub.s32 2, %v7366_v27  ;;  %v6544_v27 = vld [vmem:[#allocation22 + $0x188] ss:$12 sps:$4 sm:$0xff]  }
 0x1a7   :  { %1708 = vmatprep.subr.bf16.mxu0 %v6019_v5  ;;  %v6072_v5 = vld [vmem:[#allocation8 + $0x1e0] ss:$12 sps:$4 sm:$0xff]  }
 0x1aa   :  { %1709 = vmatpush1.bf16.msra.mxu0 %v6017_v6  ;;  %v6076_v6 = vld [vmem:[#allocation8 + $0x1e8] ss:$12 sps:$4 sm:$0xff]  }
 0x1ab   :  { %1710 = vmatprep.subr.bf16.mxu0 %v6024_v7  ;;  %v6079_v7 = vld [vmem:[#allocation8 + $0x1fc] ss:$12 sps:$4 sm:$0xff]  }
 0x1ae   :  { %1711 = vmatpush1.bf16.msra.mxu0 %v6022_v9  ;;  %v6080_v9 = vld [vmem:[#allocation8 + $0x2c0] ss:$12 sps:$4 sm:$0xff]  }
 0x1af   :  { %1712 = vmatprep.subr.bf16.mxu0 %v6029_v10  ;;  %v372_v10 = vrot.slane %v7374_v29, %v7388_v4  ;;  %v6095_v29 = vld [vmem:[#allocation8 + $0x258] ss:$12 sps:$4 sm:$0xff]  }
 0x1b2   :  { %1713 = vmatpush1.bf16.msra.mxu0 %v6027_v11  ;;  %v6077_v11 = vld [vmem:[#allocation8 + $0x1f8] ss:$12 sps:$4 sm:$0xff]  }
 0x1b3   :  { %1714 = vmatprep.subr.bf16.mxu0 %v6034_v12  ;;  %v6081_v12 = vld [vmem:[#allocation8 + $0x200] ss:$12 sps:$4 sm:$0xff]  }
 0x1b6   :  { %1715 = vmatpush1.bf16.msra.mxu0 %v6032_v13  ;;  %v6084_v13 = vld [vmem:[#allocation8 + $0x214] ss:$12 sps:$4 sm:$0xff]  }
 0x1b7   :  { %1716 = vmatprep.subr.bf16.mxu0 %v6039_v14  ;;  %v6085_v14 = vld [vmem:[#allocation8 + $0x2d8] ss:$12 sps:$4 sm:$0xff]  }
 0x1ba   :  { %1717 = vmatpush1.bf16.msra.mxu0 %v6037_v15 }
 0x1bb   :  { %1718 = vmatprep.subr.bf16.mxu0 %v6044_v16  ;;  %v6082_v16 = vld [vmem:[#allocation8 + $0x210] ss:$12 sps:$4 sm:$0xff]  }
 0x1be   :  { %1719 = vmatpush1.bf16.msra.mxu0 %v6042_v18  ;;  %v6089_v18 = vld [vmem:[#allocation8 + $0x22c] ss:$12 sps:$4 sm:$0xff]  }
 0x1bf   :  { %1720 = vmatprep.subr.bf16.mxu0 %v6049_v20 }
 0x1c2   :  { %1721 = vmatpush1.bf16.msra.mxu0 %v6047_v22  ;;  %v6091_v22 = vld [vmem:[#allocation8 + $0x230] ss:$12 sps:$4 sm:$0xff]  }
 0x1c3   :  { %1731 = vmatprep.subr.bf16.mxu0 %v6054_v24 }
 0x258   :  { %v936_v33 = vpop.f32.mrb[0].mxu0 }
 0x259   :  { %v5774_v34 = vadd.f32 %v936_v33, %v364_v31  ;;  %v938_v35 = vpop.f32.mrb[1].mxu0  ;;  %v6100_v31 = vld [vmem:[#allocation8 + $0x274] ss:$12 sps:$4 sm:$0xff]   ;;  %v6103_v33 = vld [vmem:[#allocation8 + $0x28c] ss:$12 sps:$4 sm:$0xff]  }
 0x25a   :  { %v5775_v36 = vadd.f32 %v938_v35, %v368_v32  ;;  %v940_v37 = vpop.f32.mrb[2].mxu0  ;;  %v1018_v53 = vpop.f32.mrb[0].mxu1  ;;  %v6098_v32 = vld [vmem:[#allocation8 + $0x270] ss:$12 sps:$4 sm:$0xff]  }
 0x25b   :  { %v1025_v38 = vmax.f32 %v5774_v34, 0.0  ;;  %v941_v39 = vpop.f32.mrb[3].mxu0  ;;  %v1020_v54 = vpop.f32.mrb[1].mxu1  ;;  %v5776_v15 = vadd.f32 %v1018_v53, %v372_v10  ;;  %v6101_v34 = vld [vmem:[#allocation8 + $0x288] ss:$12 sps:$4 sm:$0xff]  }
 0x25c   :  { %v1026_v40 = vmax.f32 %v5775_v36, 0.0  ;;  %v5777_v55 = vadd.f32 %v1020_v54, %v376_v48  ;;  %v1022_v56 = vpop.f32.mrb[2].mxu1  ;;  %v6106_v35 = vld [vmem:[#allocation8 + $0x2a4] ss:$12 sps:$4 sm:$0xff]   ;;  %v6104_v36 = vld [vmem:[#allocation8 + $0x2a0] ss:$12 sps:$4 sm:$0xff]  }
 0x25d   :  { %v1157_v45 = vpack.c.bf16 %v1025_v38, %v1025_v38  ;;  %v1023_v59 = vpop.f32.mrb[3].mxu1  ;;  %v1027_v20 = vmax.f32 %v5776_v15, 0.0  ;;  %v6109_v37 = vld [vmem:[#allocation8 + $0x2bc] ss:$12 sps:$4 sm:$0xff]   ;;  %v6107_v38 = vld [vmem:[#allocation8 + $0x2b8] ss:$12 sps:$4 sm:$0xff]  }
 0x25e   :  { %v1158_v42 = vpack.c.bf16 %v1026_v40, %v1026_v40  ;;  %v1028_v62 = vmax.f32 %v5777_v55, 0.0  ;;  %v6112_v39 = vld [vmem:[#allocation8 + $0x2d4] ss:$12 sps:$4 sm:$0xff]   ;;  %v6110_v40 = vld [vmem:[#allocation8 + $0x2d0] ss:$12 sps:$4 sm:$0xff]  }
 0x25f   :  { %v1159_v24 = vpack.c.bf16 %v1027_v20, %v1027_v20  ;;  %v6124_v48 = vld [vmem:[#allocation10 + $0x24] ss:$8 sps:$4 sm:$0xff]   ;;  %v6128_v53 = vld [vmem:[#allocation10 + $0x40] ss:$8 sps:$4 sm:$0xff]   ;;  %v6133_v54 = vld [vmem:[#allocation10 + $0x54] ss:$8 sps:$4 sm:$0xff]  }
 0x260   :  { %1722 = vmatprep.mubr.bf16.mxu0 %v1158_v42  ;;  %1804 = vmatprep.mubr.bf16.mxu1 %v1158_v42  ;;  %v1160_v63 = vpack.c.bf16 %v1028_v62, %v1028_v62  ;;  %v6115_v42 = vld [vmem:[#allocation8 + $0x2ec] ss:$12 sps:$4 sm:$0xff]   ;;  %v6145_v62 = vld [vmem:[#allocation10 + $0x94] ss:$8 sps:$4 sm:$0xff]   ;;  %v6188_v15 = vld [vmem:[#allocation11 + $0x40] sm:$0xff]  }
 0x261   :  { %1723 = vmatmul.mubr.bf16.vlgmr.msra.gmra.mrb[4].mxu0 %v1157_v45  ;;  %1805 = vmatmul.mubr.bf16.vlgmr.msra.gmra.mrb[4].mxu1 %v1157_v45  ;;  %v6118_v45 = vld [vmem:[#allocation10 + $0x4] ss:$8 sps:$4 sm:$0xff]   ;;  %v6131_v55 = vld [vmem:[#allocation10 + $0x50] ss:$8 sps:$4 sm:$0xff]  }
 0x262   :  { %1732 = vmatpush1.bf16.msra.mxu0 %v6052_v43  ;;  %5607 = vmatpush3.bf16.msra.mxu1 %v6056_v44  ;;  %v6113_v43 = vld [vmem:[#allocation8 + $0x2e8] ss:$12 sps:$4 sm:$0xff]   ;;  %v6136_v56 = vld [vmem:[#allocation10 + $0x64] ss:$8 sps:$4 sm:$0xff]   ;;  %v6137_v59 = vld [vmem:[#allocation10 + $0x70] ss:$8 sps:$4 sm:$0xff]  }
 0x263   :  { %1733 = vmatprep.subr.bf16.mxu0 %v6059_v46  ;;  %5608 = vmatprep.subr.bf16.mxu1 %v6060_v47  ;;  %v6116_v44 = vld [vmem:[#allocation10] ss:$8 sps:$4 sm:$0xff]   ;;  %v6121_v46 = vld [vmem:[#allocation10 + $0x14] ss:$8 sps:$4 sm:$0xff]   ;;  %v6119_v47 = vld [vmem:[#allocation10 + $0x10] ss:$8 sps:$4 sm:$0xff]  }
 0x264   :  { %1763 = vmatprep.mubr.bf16.mxu0 %v1160_v63  ;;  %1844 = vmatprep.mubr.bf16.mxu1 %v1160_v63  ;;  %v6143_v63 = vld [vmem:[#allocation10 + $0x90] ss:$8 sps:$4 sm:$0xff]   ;;  %v6160_v10 = vld [vmem:[#allocation10 + $0xe4] ss:$8 sps:$4 sm:$0xff]  }
 0x265   :  { %v6193_v20 = vld [vmem:[#allocation11 + $0x10] sm:$0xff]  }
 0x266   :  { %1734 = vmatpush1.bf16.msra.mxu0 %v6057_v49  ;;  %5609 = vmatpush3.bf16.msra.mxu1 %v6061_v50  ;;  %v6122_v49 = vld [vmem:[#allocation10 + $0x20] ss:$8 sps:$4 sm:$0xff]   ;;  %v6127_v50 = vld [vmem:[#allocation10 + $0x34] ss:$8 sps:$4 sm:$0xff]  }
 0x267   :  { %1735 = vmatprep.subr.bf16.mxu0 %v6064_v51  ;;  %5610 = vmatprep.subr.bf16.mxu1 %v6065_v52  ;;  %v6125_v51 = vld [vmem:[#allocation10 + $0x30] ss:$8 sps:$4 sm:$0xff]   ;;  %v6130_v52 = vld [vmem:[#allocation10 + $0x44] ss:$8 sps:$4 sm:$0xff]  }
 0x26a   :  { %1736 = vmatpush1.bf16.msra.mxu0 %v6062_v57  ;;  %5611 = vmatpush3.bf16.msra.mxu1 %v6066_v58  ;;  %v6134_v57 = vld [vmem:[#allocation10 + $0x60] ss:$8 sps:$4 sm:$0xff]   ;;  %v6139_v58 = vld [vmem:[#allocation10 + $0x74] ss:$8 sps:$4 sm:$0xff]  }
 0x26b   :  { %1737 = vmatprep.subr.bf16.mxu0 %v6069_v60  ;;  %5612 = vmatprep.subr.bf16.mxu1 %v6070_v61  ;;  %v6142_v60 = vld [vmem:[#allocation10 + $0x84] ss:$8 sps:$4 sm:$0xff]   ;;  %v6140_v61 = vld [vmem:[#allocation10 + $0x80] ss:$8 sps:$4 sm:$0xff]  }
 0x26e   :  { %1738 = vmatpush1.bf16.msra.mxu0 %v6067_v0  ;;  %5613 = vmatpush3.bf16.msra.mxu1 %v6071_v1  ;;  %v6148_v0 = vld [vmem:[#allocation10 + $0xa4] ss:$8 sps:$4 sm:$0xff]   ;;  %v6146_v1 = vld [vmem:[#allocation10 + $0xa0] ss:$8 sps:$4 sm:$0xff]  }
 0x26f   :  { %1739 = vmatprep.subr.bf16.mxu0 %v6074_v2  ;;  %5614 = vmatprep.subr.bf16.mxu1 %v6075_v3  ;;  %v6151_v2 = vld [vmem:[#allocation10 + $0xb4] ss:$8 sps:$4 sm:$0xff]   ;;  %v6149_v3 = vld [vmem:[#allocation10 + $0xb0] ss:$8 sps:$4 sm:$0xff]  }
 0x272   :  { %1740 = vmatpush1.bf16.msra.mxu0 %v6072_v5  ;;  %5615 = vmatpush3.bf16.msra.mxu1 %v6076_v6  ;;  %v6154_v5 = vld [vmem:[#allocation10 + $0xc4] ss:$8 sps:$4 sm:$0xff]   ;;  %v6152_v6 = vld [vmem:[#allocation10 + $0xc0] ss:$8 sps:$4 sm:$0xff]  }
 0x273   :  { %1741 = vmatprep.subr.bf16.mxu0 %v6079_v7  ;;  %5616 = vmatprep.subr.bf16.mxu1 %v6080_v9  ;;  %v6157_v7 = vld [vmem:[#allocation10 + $0xd4] ss:$8 sps:$4 sm:$0xff]   ;;  %v6155_v9 = vld [vmem:[#allocation10 + $0xd0] ss:$8 sps:$4 sm:$0xff]  }
 0x276   :  { %1742 = vmatpush1.bf16.msra.mxu0 %v6077_v11  ;;  %5617 = vmatpush3.bf16.msra.mxu1 %v6081_v12  ;;  %v6158_v11 = vld [vmem:[#allocation10 + $0xe0] ss:$8 sps:$4 sm:$0xff]   ;;  %v6163_v12 = vld [vmem:[#allocation10 + $0xf4] ss:$8 sps:$4 sm:$0xff]  }
 0x277   :  { %1743 = vmatprep.subr.bf16.mxu0 %v6084_v13  ;;  %5618 = vmatprep.subr.bf16.mxu1 %v6085_v14  ;;  %v6161_v13 = vld [vmem:[#allocation10 + $0xf0] ss:$8 sps:$4 sm:$0xff]   ;;  %v6166_v14 = vld [vmem:[#allocation10 + $0x104] ss:$8 sps:$4 sm:$0xff]  }
 0x27a   :  { %1744 = vmatpush1.bf16.msra.mxu0 %v6082_v16  ;;  %5619 = vmatpush3.bf16.msra.mxu1 %v6086_v17  ;;  %v6189_v16 = vld [vmem:[#allocation11] sm:$0xff]   ;;  %v6190_v17 = vld [vmem:[#allocation11 + $0x48] sm:$0xff]  }
 0x27b   :  { %1745 = vmatprep.subr.bf16.mxu0 %v6089_v18  ;;  %5620 = vmatprep.subr.bf16.mxu1 %v6090_v19  ;;  %v6191_v18 = vld [vmem:[#allocation11 + $0x8] sm:$0xff]   ;;  %v6192_v19 = vld [vmem:[#allocation11 + $0x50] sm:$0xff]  }
 0x27e   :  { %1746 = vmatpush1.bf16.msra.mxu0 %v6087_v21  ;;  %5621 = vmatpush3.bf16.msra.mxu1 %v6091_v22  ;;  %v6194_v21 = vld [vmem:[#allocation11 + $0x58] sm:$0xff]  }
 0x27f   :  { %1747 = vmatprep.subr.bf16.mxu0 %v6094_v23  ;;  %2158 = vmatprep.subr.bf16.mxu1 %v6118_v45  ;;  %v6195_v22 = vld [vmem:[#allocation11 + $0x18] sm:$0xff]   ;;  %v6196_v23 = vld [vmem:[#allocation11 + $0x60] sm:$0xff]  }
 0x281   :  { %1845 = vmatmul.mubr.bf16.vlgmr.msra.gmra.mrb[8].mxu1 %v1159_v24 }
 0x282   :  { %1748 = vmatpush1.bf16.msra.mxu0 %v6092_v25  ;;  %2159 = vmatpush1.bf16.msra.mxu1 %v6116_v44  ;;  %v6198_v25 = vld [vmem:[#allocation11 + $0x68] sm:$0xff]  }
 0x283   :  { %1749 = vmatprep.subr.bf16.mxu0 %v6097_v26  ;;  %2160 = vmatprep.subr.bf16.mxu1 %v6121_v46  ;;  %v6199_v26 = vld [vmem:[#allocation11 + $0x28] sm:$0xff]  }
 0x286   :  { %1750 = vmatpush1.bf16.msra.mxu0 %v6095_v29  ;;  %2161 = vmatpush1.bf16.msra.mxu1 %v6119_v47 }
 0x287   :  { %1751 = vmatprep.subr.bf16.mxu0 %v6100_v31  ;;  %2162 = vmatprep.subr.bf16.mxu1 %v6124_v48 }
 0x28a   :  { %1752 = vmatpush1.bf16.msra.mxu0 %v6098_v32  ;;  %2163 = vmatpush1.bf16.msra.mxu1 %v6122_v49 }
 0x28b   :  { %1753 = vmatprep.subr.bf16.mxu0 %v6103_v33  ;;  %2164 = vmatprep.subr.bf16.mxu1 %v6127_v50 }
 0x28e   :  { %1754 = vmatpush1.bf16.msra.mxu0 %v6101_v34  ;;  %2165 = vmatpush1.bf16.msra.mxu1 %v6125_v51 }
 0x28f   :  { %1755 = vmatprep.subr.bf16.mxu0 %v6106_v35  ;;  %2166 = vmatprep.subr.bf16.mxu1 %v6130_v52  ;;  %v1161_v35 = vld [vmem:[%s7603_s5] sm:$0x7] }
 0x290   :  { %v1166_v45 = vrot.slane %v1161_v35, %v7369_v28  ;;  %v1170_v46 = vrot.slane %v1161_v35, %v7377_v30 }
 0x292   :  { %1756 = vmatpush1.bf16.msra.mxu0 %v6104_v36  ;;  %2167 = vmatpush1.bf16.msra.mxu1 %v6128_v53  ;;  %v1174_v36 = vrot.slane %v1161_v35, %v7388_v4  ;;  %v6206_v35 = vld [vmem:[#allocation13 + $0x10] sm:$0xff]  }
 0x293   :  { %1757 = vmatprep.subr.bf16.mxu0 %v6109_v37  ;;  %2168 = vmatprep.subr.bf16.mxu1 %v6133_v54 }
 0x296   :  { %1758 = vmatpush1.bf16.msra.mxu0 %v6107_v38  ;;  %2169 = vmatpush1.bf16.msra.mxu1 %v6131_v55 }
 0x297   :  { %1759 = vmatprep.subr.bf16.mxu0 %v6112_v39  ;;  %2170 = vmatprep.subr.bf16.mxu1 %v6136_v56  ;;  %v6164_v56 = vld [vmem:[#allocation10 + $0x100] ss:$8 sps:$4 sm:$0xff]  }
 0x29a   :  { %1760 = vmatpush1.bf16.msra.mxu0 %v6110_v40  ;;  %2171 = vmatpush1.bf16.msra.mxu1 %v6134_v57 }
 0x29b   :  { %1761 = vmatprep.subr.bf16.mxu0 %v6115_v42  ;;  %2172 = vmatprep.subr.bf16.mxu1 %v6139_v58  ;;  %v6169_v58 = vld [vmem:[#allocation10 + $0x114] ss:$8 sps:$4 sm:$0xff]  }
 0x29e   :  { %1762 = vmatpush1.bf16.msra.mxu0 %v6113_v43  ;;  %2173 = vmatpush1.bf16.msra.mxu1 %v6137_v59  ;;  %v6167_v59 = vld [vmem:[#allocation10 + $0x110] ss:$8 sps:$4 sm:$0xff]  }
 0x29f   :  { %2174 = vmatprep.subr.bf16.mxu1 %v6142_v60  ;;  %5628 = vmatprep.subr.bf16.mxu0 %v6188_v15  ;;  %v6172_v60 = vld [vmem:[#allocation10 + $0x124] ss:$8 sps:$4 sm:$0xff]   ;;  %v6203_v15 = vld [vmem:[#allocation11 + $0x38] sm:$0xff]  }
 0x2a1   :  { %1764 = vmatmul.mubr.bf16.vlgmr.msra.gmra.mrb[4].mxu0 %v1159_v24  ;;  %v6197_v24 = vld [vmem:[#allocation11 + $0x20] sm:$0xff]  }
 0x2a2   :  { %2175 = vmatpush1.bf16.msra.mxu1 %v6140_v61  ;;  %5629 = vmatpush3.bf16.msra.mxu0 %v6189_v16  ;;  %v6170_v61 = vld [vmem:[#allocation10 + $0x120] ss:$8 sps:$4 sm:$0xff]   ;;  %v7022_v16 = vmov 0.0  }
 0x2a3   :  { %2176 = vmatprep.subr.bf16.mxu1 %v6145_v62  ;;  %5630 = vmatprep.subr.bf16.mxu0 %v6190_v17  ;;  %v6175_v62 = vld [vmem:[#allocation10 + $0x134] ss:$8 sps:$4 sm:$0xff]   ;;  %v1906_v17 = vld [vmem:[%s7604_s14] sm:$0x3] }
 0x2a6   :  { %2177 = vmatpush1.bf16.msra.mxu1 %v6143_v63  ;;  %5631 = vmatpush3.bf16.msra.mxu0 %v6191_v18  ;;  %v6173_v63 = vld [vmem:[#allocation10 + $0x130] ss:$8 sps:$4 sm:$0xff]   ;;  %v1911_v18 = vrot.slane %v1906_v17, %v7369_v28 }
 0x2a7   :  { %2178 = vmatprep.subr.bf16.mxu1 %v6148_v0  ;;  %5632 = vmatprep.subr.bf16.mxu0 %v6192_v19  ;;  %v6178_v0 = vld [vmem:[#allocation10 + $0x144] ss:$8 sps:$4 sm:$0xff]   ;;  %v1915_v19 = vrot.slane %v1906_v17, %v7377_v30  ;;  %v6239_v17 = vld [vmem:[#allocation16 + $0x18] sm:$0xff]  }
 0x2aa   :  { %2179 = vmatpush1.bf16.msra.mxu1 %v6146_v1  ;;  %5633 = vmatpush3.bf16.msra.mxu0 %v6193_v20  ;;  %v6176_v1 = vld [vmem:[#allocation10 + $0x140] ss:$8 sps:$4 sm:$0xff]  }
 0x2ab   :  { %2180 = vmatprep.subr.bf16.mxu1 %v6151_v2  ;;  %5634 = vmatprep.subr.bf16.mxu0 %v6194_v21  ;;  %v6181_v2 = vld [vmem:[#allocation10 + $0x154] ss:$8 sps:$4 sm:$0xff]  }
 0x2ae   :  { %2181 = vmatpush1.bf16.msra.mxu1 %v6149_v3  ;;  %5635 = vmatpush3.bf16.msra.mxu0 %v6195_v22  ;;  %v6179_v3 = vld [vmem:[#allocation10 + $0x150] ss:$8 sps:$4 sm:$0xff]  }
 0x2af   :  { %2182 = vmatprep.subr.bf16.mxu1 %v6154_v5  ;;  %5636 = vmatprep.subr.bf16.mxu0 %v6196_v23  ;;  %v6184_v5 = vld [vmem:[#allocation10 + $0x164] ss:$8 sps:$4 sm:$0xff]  }
 0x2b2   :  { %2183 = vmatpush1.bf16.msra.mxu1 %v6152_v6  ;;  %5637 = vmatpush3.bf16.msra.mxu0 %v6197_v24  ;;  %v6182_v6 = vld [vmem:[#allocation10 + $0x160] ss:$8 sps:$4 sm:$0xff]  }
 0x2b3   :  { %2184 = vmatprep.subr.bf16.mxu1 %v6157_v7  ;;  %5638 = vmatprep.subr.bf16.mxu0 %v6198_v25  ;;  %v6187_v7 = vld [vmem:[#allocation10 + $0x174] ss:$8 sps:$4 sm:$0xff]  }
 0x2b6   :  { %2185 = vmatpush1.bf16.msra.mxu1 %v6155_v9  ;;  %5639 = vmatpush3.bf16.msra.mxu0 %v6199_v26  ;;  %v6185_v9 = vld [vmem:[#allocation10 + $0x170] ss:$8 sps:$4 sm:$0xff]  }
 0x2b7   :  { %2186 = vmatprep.subr.bf16.mxu1 %v6160_v10 }
 0x2ba   :  { %2187 = vmatpush1.bf16.msra.mxu1 %v6158_v11 }
 0x2bb   :  { %2188 = vmatprep.subr.bf16.mxu1 %v6163_v12  ;;  %v6200_v12 = vld [vmem:[#allocation11 + $0x70] sm:$0xff]  }
 0x2bc   :  { %5640 = vmatprep.subr.bf16.mxu0 %v6200_v12 }
 0x2be   :  { %2189 = vmatpush1.bf16.msra.mxu1 %v6161_v13  ;;  %v6201_v13 = vld [vmem:[#allocation11 + $0x30] sm:$0xff]  }
 0x2bf   :  { %2199 = vmatprep.subr.bf16.mxu1 %v6166_v14  ;;  %5641 = vmatpush3.bf16.msra.mxu0 %v6201_v13  ;;  %v6202_v14 = vld [vmem:[#allocation11 + $0x78] sm:$0xff]  }
 0x2c0   :  { %5642 = vmatprep.subr.bf16.mxu0 %v6202_v14 }
 0x2c3   :  { %5643 = vmatpush3.bf16.msra.mxu0 %v6203_v15  ;;  %v6238_v15 = vld [vmem:[#allocation16 + $0x10] sm:$0xff]  }
 0x2c4   :  { %5734 = vmatprep.subr.bf16.mxu0 %v7022_v16 }
 0x334   :  { %v5600_v29 = vpop.f32.mrb[4].mxu1 }
 0x335   :  { %v5601_v31 = vpop.f32.mrb[5].mxu1 }
 0x336   :  { %v5602_v32 = vadd.f32 %v5601_v31, %v5600_v29  ;;  %v5603_v33 = vpop.f32.mrb[6].mxu1 }
 0x337   :  { %v5604_v34 = vpop.f32.mrb[7].mxu1 }
 0x338   :  { %v1807_v39 = vadd.f32 %v5602_v32, %v1174_v36  ;;  %v6204_v32 = vld [vmem:[#allocation13] sm:$0xff]   ;;  %v6205_v34 = vld [vmem:[#allocation13 + $0x8] sm:$0xff]   ;;  %v6207_v36 = vld [vmem:[#allocation13 + $0x18] sm:$0xff]  }
 0x354   :  { %v5622_v37 = vpop.f32.mrb[8].mxu1 }
 0x355   :  { %v5623_v38 = vpop.f32.mrb[9].mxu1 }
 0x356   :  { %v5624_v40 = vadd.f32 %v5623_v38, %v5622_v37  ;;  %v5625_v42 = vpop.f32.mrb[10].mxu1  ;;  %v6208_v37 = vld [vmem:[#allocation13 + $0x20] sm:$0xff]   ;;  %v6209_v38 = vld [vmem:[#allocation13 + $0x28] sm:$0xff]  }
 0x357   :  { %v5626_v43 = vpop.f32.mrb[11].mxu1  ;;  %v6212_v42 = vld [vmem:[#allocation14] ss:$8 sps:$4 sm:$0xff]  }
 0x358   :  { %v1847_v44 = vadd.f32 %v5624_v40, %v1807_v39  ;;  %v6210_v39 = vld [vmem:[#allocation13 + $0x30] sm:$0xff]   ;;  %v6211_v40 = vld [vmem:[#allocation13 + $0x38] sm:$0xff]   ;;  %v6214_v43 = vld [vmem:[#allocation14 + $0x4] ss:$8 sps:$4 sm:$0xff]  }
 0x35a   :  { %v1854_v10 = vmax.f32 %v1847_v44, 0.0  ;;  %v6217_v44 = vld [vmem:[#allocation14 + $0x14] ss:$8 sps:$4 sm:$0xff]  }
 0x35c   :  { %v1905_v11 = vpack.c.bf16 %v1854_v10, %v1854_v10 }
 0x374   :  { %v1765_v47 = vpop.f32.mrb[4].mxu0 }
 0x375   :  { %v5778_v48 = vadd.f32 %v1765_v47, %v1166_v45  ;;  %v1767_v49 = vpop.f32.mrb[5].mxu0  ;;  %v6215_v45 = vld [vmem:[#allocation14 + $0x10] ss:$8 sps:$4 sm:$0xff]   ;;  %v6218_v47 = vld [vmem:[#allocation14 + $0x20] ss:$8 sps:$4 sm:$0xff]  }
 0x376   :  { %v5779_v50 = vadd.f32 %v1767_v49, %v1170_v46  ;;  %v1769_v51 = vpop.f32.mrb[6].mxu0  ;;  %v6220_v46 = vld [vmem:[#allocation14 + $0x24] ss:$8 sps:$4 sm:$0xff]   ;;  %v6221_v49 = vld [vmem:[#allocation14 + $0x30] ss:$8 sps:$4 sm:$0xff]  }
 0x377   :  { %v1852_v52 = vmax.f32 %v5778_v48, 0.0  ;;  %v1770_v53 = vpop.f32.mrb[7].mxu0  ;;  %v6223_v48 = vld [vmem:[#allocation14 + $0x34] ss:$8 sps:$4 sm:$0xff]   ;;  %v6224_v51 = vld [vmem:[#allocation14 + $0x40] ss:$8 sps:$4 sm:$0xff]  }
 0x378   :  { %v1853_v54 = vmax.f32 %v5779_v50, 0.0  ;;  %v6226_v50 = vld [vmem:[#allocation14 + $0x44] ss:$8 sps:$4 sm:$0xff]   ;;  %v6227_v53 = vld [vmem:[#allocation14 + $0x50] ss:$8 sps:$4 sm:$0xff]  }
 0x379   :  { %v1903_v57 = vpack.c.bf16 %v1852_v52, %v1852_v52  ;;  %v6229_v52 = vld [vmem:[#allocation14 + $0x54] ss:$8 sps:$4 sm:$0xff]  }
 0x37a   :  { %v1904_v55 = vpack.c.bf16 %v1853_v54, %v1853_v54  ;;  %v6232_v54 = vld [vmem:[#allocation14 + $0x64] ss:$8 sps:$4 sm:$0xff]  }
 0x37c   :  { %2190 = vmatprep.mubr.bf16.mxu1 %v1904_v55  ;;  %v6230_v55 = vld [vmem:[#allocation14 + $0x60] ss:$8 sps:$4 sm:$0xff]  }
 0x37d   :  { %2191 = vmatmul.mubr.bf16.vlgmr.msra.gmra.mrb[12].mxu1 %v1903_v57  ;;  %v5277_v57 = vld [vmem:[%s7605_s28] ss:$0 sm:$0xff] }
 0x37e   :  { %2200 = vmatpush1.bf16.msra.mxu1 %v6164_v56  ;;  %2231 = vmatprep.mubr.bf16.mxu1 %v7021_v8 }
 0x37f   :  { %2201 = vmatprep.subr.bf16.mxu1 %v6169_v58 }
 0x382   :  { %2202 = vmatpush1.bf16.msra.mxu1 %v6167_v59 }
 0x383   :  { %2203 = vmatprep.subr.bf16.mxu1 %v6172_v60 }
 0x386   :  { %2204 = vmatpush1.bf16.msra.mxu1 %v6170_v61 }
 0x387   :  { %2205 = vmatprep.subr.bf16.mxu1 %v6175_v62 }
 0x38a   :  { %2206 = vmatpush1.bf16.msra.mxu1 %v6173_v63 }
 0x38b   :  { %2207 = vmatprep.subr.bf16.mxu1 %v6178_v0 }
 0x38e   :  { %2208 = vmatpush1.bf16.msra.mxu1 %v6176_v1  ;;  %v6235_v1 = vld [vmem:[#allocation14 + $0x74] ss:$8 sps:$4 sm:$0xff]  }
 0x38f   :  { %2209 = vmatprep.subr.bf16.mxu1 %v6181_v2  ;;  %v6233_v2 = vld [vmem:[#allocation14 + $0x70] ss:$8 sps:$4 sm:$0xff]  }
 0x392   :  { %2210 = vmatpush1.bf16.msra.mxu1 %v6179_v3  ;;  %v6236_v3 = vld [vmem:[#allocation16] sm:$0xff]  }
 0x393   :  { %2211 = vmatprep.subr.bf16.mxu1 %v6184_v5  ;;  %v6237_v5 = vld [vmem:[#allocation16 + $0x8] sm:$0xff]  }
 0x396   :  { %2212 = vmatpush1.bf16.msra.mxu1 %v6182_v6  ;;  %v5294_v6 = vld [vmem:[%s7606_s17] ss:$0 sm:$0xff] }
 0x397   :  { %2213 = vmatprep.subr.bf16.mxu1 %v6187_v7 }
 0x39a   :  { %2214 = vmatpush1.bf16.msra.mxu1 %v6185_v9 }
 0x39b   :  { %2643 = vmatprep.subr.bf16.mxu1 %v6214_v43 }
 0x39d   :  { %2232 = vmatmul.mubr.bf16.vlgmr.msra.gmra.mrb[12].mxu1 %v1905_v11 }
 0x39e   :  { %2675 = vmatprep.mubr.bf16.mxu1 %v7021_v8  ;;  %2644 = vmatpush1.bf16.msra.mxu1 %v6212_v42 }
 0x39f   :  { %2645 = vmatprep.subr.bf16.mxu1 %v6217_v44 }
 0x3a2   :  { %2646 = vmatpush1.bf16.msra.mxu1 %v6215_v45 }
 0x3a3   :  { %2647 = vmatprep.subr.bf16.mxu1 %v6220_v46 }
 0x3a6   :  { %2648 = vmatpush1.bf16.msra.mxu1 %v6218_v47 }
 0x3a7   :  { %2649 = vmatprep.subr.bf16.mxu1 %v6223_v48 }
 0x3aa   :  { %2650 = vmatpush1.bf16.msra.mxu1 %v6221_v49 }
 0x3ab   :  { %2651 = vmatprep.subr.bf16.mxu1 %v6226_v50  ;;  %v2686_v50 = vld [vmem:[#allocation5] sm:$0xff] }
 0x3ae   :  { %2652 = vmatpush1.bf16.msra.mxu1 %v6224_v51 }
 0x3af   :  { %2653 = vmatprep.subr.bf16.mxu1 %v6229_v52 }
 0x3b2   :  { %2654 = vmatpush1.bf16.msra.mxu1 %v6227_v53 }
 0x3b3   :  { %2655 = vmatprep.subr.bf16.mxu1 %v6232_v54 }
 0x3b6   :  { %2656 = vmatpush1.bf16.msra.mxu1 %v6230_v55  ;;  %v6267_v55 = vld [vmem:[#allocation17 + $0x74] ss:$8 sps:$4 sm:$0xff]  }
 0x3b7   :  { %2657 = vmatprep.subr.bf16.mxu1 %v6235_v1  ;;  %v6277_v1 = vld [vmem:[#allocation19 + $0x48] ss:$12 sps:$4 sm:$0xff]  }
 0x3ba   :  { %2658 = vmatpush1.bf16.msra.mxu1 %v6233_v2  ;;  %v6282_v2 = vld [vmem:[#allocation19 + $0x64] ss:$12 sps:$4 sm:$0xff]  }
 0x470   :  { %v2233_v20 = vpop.f32.mrb[12].mxu1 }
 0x471   :  { %v5780_v21 = vadd.f32 %v2233_v20, %v1911_v18  ;;  %v2235_v22 = vpop.f32.mrb[13].mxu1  ;;  %v6240_v18 = vld [vmem:[#allocation16 + $0x20] sm:$0xff]   ;;  %v6242_v20 = vld [vmem:[#allocation16 + $0x30] sm:$0xff]  }
 0x472   :  { %v5781_v23 = vadd.f32 %v2235_v22, %v1915_v19  ;;  %v2237_v24 = vpop.f32.mrb[14].mxu1  ;;  %v6241_v19 = vld [vmem:[#allocation16 + $0x28] sm:$0xff]  }
 0x473   :  { %v2240_v25 = vmax.f32 %v5780_v21, 0.0  ;;  %v2238_v26 = vpop.f32.mrb[15].mxu1  ;;  %v6243_v21 = vld [vmem:[#allocation16 + $0x38] sm:$0xff]   ;;  %v6244_v22 = vld [vmem:[#allocation17] ss:$8 sps:$4 sm:$0xff]  }
 0x474   :  { %v2241_v29 = vmax.f32 %v5781_v23, 0.0  ;;  %v6246_v23 = vld [vmem:[#allocation17 + $0x4] ss:$8 sps:$4 sm:$0xff]   ;;  %v6249_v24 = vld [vmem:[#allocation17 + $0x14] ss:$8 sps:$4 sm:$0xff]  }
 0x475   :  { %v2274_v33 = vpack.c.bf16 %v2240_v25, %v2240_v25  ;;  %2914 = vmatprep.subr.bf16.mxu1 %v6246_v23  ;;  %v6247_v25 = vld [vmem:[#allocation17 + $0x10] ss:$8 sps:$4 sm:$0xff]   ;;  %v6252_v26 = vld [vmem:[#allocation17 + $0x24] ss:$8 sps:$4 sm:$0xff]   ;;  %v6319_v23 = vld [vmem:[#allocation19 + $0x13c] ss:$12 sps:$4 sm:$0xff]  }
 0x476   :  { %v2275_v31 = vpack.c.bf16 %v2241_v29, %v2241_v29  ;;  %v6250_v29 = vld [vmem:[#allocation17 + $0x20] ss:$8 sps:$4 sm:$0xff]  }
 0x478   :  { %2411 = vmatprep.mubr.bf16.mxu0 %v2275_v31  ;;  %v6255_v31 = vld [vmem:[#allocation17 + $0x34] ss:$8 sps:$4 sm:$0xff]  }
 0x479   :  { %2412 = vmatmul.mubr.bf16.vlgmr.msra.gmra.mrb[8].mxu0 %v2274_v33  ;;  %v6258_v33 = vld [vmem:[#allocation17 + $0x44] ss:$8 sps:$4 sm:$0xff]  }
 0x47a   :  { %5735 = vmatpush3.bf16.msra.mxu0 %v6204_v32  ;;  %5750 = vmatprep.mubr.msk.bf16.mxu0 %vm7023_vm0, %v7022_v16  ;;  %v6253_v32 = vld [vmem:[#allocation17 + $0x30] ss:$8 sps:$4 sm:$0xff]  }
 0x47b   :  { %5736 = vmatprep.subr.bf16.mxu0 %v7022_v16 }
 0x47e   :  { %5737 = vmatpush3.bf16.msra.mxu0 %v6205_v34  ;;  %v6256_v34 = vld [vmem:[#allocation17 + $0x40] ss:$8 sps:$4 sm:$0xff]  }
 0x47f   :  { %5738 = vmatprep.subr.bf16.mxu0 %v7022_v16 }
 0x482   :  { %5739 = vmatpush3.bf16.msra.mxu0 %v6206_v35  ;;  %v6259_v35 = vld [vmem:[#allocation17 + $0x50] ss:$8 sps:$4 sm:$0xff]  }
 0x483   :  { %5740 = vmatprep.subr.bf16.mxu0 %v7022_v16 }
 0x486   :  { %5741 = vmatpush3.bf16.msra.mxu0 %v6207_v36  ;;  %v6264_v36 = vld [vmem:[#allocation17 + $0x64] ss:$8 sps:$4 sm:$0xff]  }
 0x487   :  { %5742 = vmatprep.subr.bf16.mxu0 %v7022_v16 }
 0x48a   :  { %5743 = vmatpush3.bf16.msra.mxu0 %v6208_v37  ;;  %v6262_v37 = vld [vmem:[#allocation17 + $0x60] ss:$8 sps:$4 sm:$0xff]  }
 0x48b   :  { %5744 = vmatprep.subr.bf16.mxu0 %v7022_v16 }
 0x48e   :  { %5745 = vmatpush3.bf16.msra.mxu0 %v6209_v38  ;;  %v2551_v38 = vld [vmem:[%s7545_s13] sm:$0x3] }
 0x48f   :  { %5746 = vmatprep.subr.bf16.mxu0 %v7022_v16 }
 0x492   :  { %5747 = vmatpush3.bf16.msra.mxu0 %v6210_v39  ;;  %v2556_v39 = vrot.slane %v2551_v38, %v7369_v28 }
 0x493   :  { %5748 = vmatprep.subr.bf16.mxu0 %v7022_v16 }
 0x496   :  { %5749 = vmatpush3.bf16.msra.mxu0 %v6211_v40  ;;  %v2560_v40 = vrot.slane %v2551_v38, %v7377_v30  ;;  %v6305_v38 = vld [vmem:[#allocation19 + $0xf8] ss:$12 sps:$4 sm:$0xff]  }
 0x497   :  { %5754 = vmatprep.subr.bf16.mxu0 %v7022_v16 }
 0x54c   :  { %v5644_v56 = vpop.f32.mrb[8].mxu0 }
 0x54d   :  { %v5645_v58 = vpop.f32.mrb[9].mxu0 }
 0x54e   :  { %v5646_v59 = vadd.f32 %v5645_v58, %v5644_v56  ;;  %v5647_v60 = vpop.f32.mrb[10].mxu0  ;;  %v6265_v56 = vld [vmem:[#allocation17 + $0x70] ss:$8 sps:$4 sm:$0xff]  }
 0x54f   :  { %v5648_v61 = vpop.f32.mrb[11].mxu0  ;;  %v6270_v58 = vld [vmem:[#allocation19 + $0x4] ss:$12 sps:$4 sm:$0xff]  }
 0x550   :  { %v2414_v62 = vadd.f32 %v5646_v59, %v5277_v57  ;;  %v6268_v57 = vld [vmem:[#allocation19] ss:$12 sps:$4 sm:$0xff]   ;;  %v6273_v59 = vld [vmem:[#allocation19 + $0x1c] ss:$12 sps:$4 sm:$0xff]   ;;  %v6271_v60 = vld [vmem:[#allocation19 + $0x18] ss:$12 sps:$4 sm:$0xff]  }
 0x551   :  { %v6276_v61 = vld [vmem:[#allocation19 + $0x34] ss:$12 sps:$4 sm:$0xff]  }
 0x552   :  { %v2419_v63 = vmax.f32 %v2414_v62, 0.0  ;;  %v6295_v62 = vld [vmem:[#allocation19 + $0xc8] ss:$12 sps:$4 sm:$0xff]  }
 0x554   :  { %v2436_v0 = vpack.c.bf16 %v2419_v63, %v2419_v63  ;;  %v6274_v63 = vld [vmem:[#allocation19 + $0x30] ss:$12 sps:$4 sm:$0xff]  }
 0x556   :  { %5751 = vmatmul.mubr.bf16.vlgmr.msra.gmra.mrb[12].mxu0 %v2436_v0  ;;  %v6279_v0 = vld [vmem:[#allocation19 + $0x4c] ss:$12 sps:$4 sm:$0xff]  }
 0x557   :  { %5770 = vmatprep.mubr.msk.bf16.mxu0 %vm7023_vm0, %v7022_v16  ;;  %5755 = vmatpush3.bf16.msra.mxu0 %v6236_v3  ;;  %v6280_v3 = vld [vmem:[#allocation19 + $0x60] ss:$12 sps:$4 sm:$0xff]  }
 0x558   :  { %5756 = vmatprep.subr.bf16.mxu0 %v7022_v16 }
 0x55b   :  { %5757 = vmatpush3.bf16.msra.mxu0 %v6237_v5  ;;  %v6285_v5 = vld [vmem:[#allocation19 + $0x7c] ss:$12 sps:$4 sm:$0xff]  }
 0x55c   :  { %5758 = vmatprep.subr.bf16.mxu0 %v7022_v16 }
 0x55f   :  { %5759 = vmatpush3.bf16.msra.mxu0 %v6238_v15  ;;  %v6297_v15 = vld [vmem:[#allocation19 + $0xd8] ss:$12 sps:$4 sm:$0xff]  }
 0x560   :  { %5760 = vmatprep.subr.bf16.mxu0 %v7022_v16 }
 0x563   :  { %5761 = vmatpush3.bf16.msra.mxu0 %v6239_v17  ;;  %v6304_v17 = vld [vmem:[#allocation19 + $0xf4] ss:$12 sps:$4 sm:$0xff]  }
 0x564   :  { %5762 = vmatprep.subr.bf16.mxu0 %v7022_v16 }
 0x567   :  { %5763 = vmatpush3.bf16.msra.mxu0 %v6240_v18  ;;  %v6302_v18 = vld [vmem:[#allocation19 + $0xf0] ss:$12 sps:$4 sm:$0xff]  }
 0x568   :  { %5764 = vmatprep.subr.bf16.mxu0 %v7022_v16 }
 0x56b   :  { %5765 = vmatpush3.bf16.msra.mxu0 %v6241_v19  ;;  %v6309_v19 = vld [vmem:[#allocation19 + $0x10c] ss:$12 sps:$4 sm:$0xff]  }
 0x56c   :  { %5766 = vmatprep.subr.bf16.mxu0 %v7022_v16 }
 0x56f   :  { %5767 = vmatpush3.bf16.msra.mxu0 %v6242_v20  ;;  %v6307_v20 = vld [vmem:[#allocation19 + $0x108] ss:$12 sps:$4 sm:$0xff]  }
 0x570   :  { %5768 = vmatprep.subr.bf16.mxu0 %v7022_v16  ;;  %v6261_v16 = vld [vmem:[#allocation17 + $0x54] ss:$8 sps:$4 sm:$0xff]  }
 0x573   :  { %5769 = vmatpush3.bf16.msra.mxu0 %v6243_v21  ;;  %v6314_v21 = vld [vmem:[#allocation19 + $0x124] ss:$12 sps:$4 sm:$0xff]  }
 0x574   :  { %3296 = vmatprep.subr.bf16.mxu0 %v6270_v58 }
 0x629   :  { %v2526_v7 = vpop.f32.mrb[12].mxu0 }
 0x62a   :  { %v2527_v9 = vadd.f32 %v5294_v6, %v2526_v7  ;;  %v5752_v10 = vpop.f32.mrb[13].mxu0  ;;  %v6283_v6 = vld [vmem:[#allocation19 + $0x78] ss:$12 sps:$4 sm:$0xff]   ;;  %v6288_v7 = vld [vmem:[#allocation19 + $0x94] ss:$12 sps:$4 sm:$0xff]  }
 0x62b   :  { %v2529_v11 = vpop.f32.mrb[14].mxu0  ;;  %v6291_v10 = vld [vmem:[#allocation19 + $0xac] ss:$12 sps:$4 sm:$0xff]  }
 0x62c   :  { %v2532_v12 = vmax.f32 %v2527_v9, 0.0  ;;  %v5753_v13 = vpop.f32.mrb[15].mxu0  ;;  %v6286_v9 = vld [vmem:[#allocation19 + $0x90] ss:$12 sps:$4 sm:$0xff]   ;;  %v6289_v11 = vld [vmem:[#allocation19 + $0xa8] ss:$12 sps:$4 sm:$0xff]  }
 0x62d   :  { %v6292_v13 = vld [vmem:[#allocation19 + $0xc0] ss:$12 sps:$4 sm:$0xff]  }
 0x62e   :  { %v2534_v14 = vpack.c.bf16 %v2532_v12, %v2532_v12  ;;  %2533 = vst [vmem:[#allocation23] sm:$0xff] %v2532_v12  ;;  %v6294_v12 = vld [vmem:[#allocation19 + $0xc4] ss:$12 sps:$4 sm:$0xff]  }
 0x630   :  { %2676 = vmatmul.mubr.bf16.vlgmr.msra.gmra.mrb[16].mxu1 %v2534_v14  ;;  %v6299_v14 = vld [vmem:[#allocation19 + $0xdc] ss:$12 sps:$4 sm:$0xff]  }
 0x631   :  { %2946 = vmatprep.mubr.bf16.mxu1 %v7021_v8  ;;  %2915 = vmatpush1.bf16.msra.mxu1 %v6244_v22  ;;  %v6312_v22 = vld [vmem:[#allocation19 + $0x120] ss:$12 sps:$4 sm:$0xff]  }
 0x632   :  { %2916 = vmatprep.subr.bf16.mxu1 %v6249_v24  ;;  %v6317_v24 = vld [vmem:[#allocation19 + $0x138] ss:$12 sps:$4 sm:$0xff]  }
 0x635   :  { %2917 = vmatpush1.bf16.msra.mxu1 %v6247_v25  ;;  %v5319_v25 = vld [vmem:[%s7551_s19] ss:$0 sm:$0xff] }
 0x636   :  { %2918 = vmatprep.subr.bf16.mxu1 %v6252_v26 }
 0x639   :  { %2919 = vmatpush1.bf16.msra.mxu1 %v6250_v29 }
 0x63a   :  { %2920 = vmatprep.subr.bf16.mxu1 %v6255_v31 }
 0x63d   :  { %2921 = vmatpush1.bf16.msra.mxu1 %v6253_v32 }
 0x63e   :  { %2922 = vmatprep.subr.bf16.mxu1 %v6258_v33 }
 0x641   :  { %2923 = vmatpush1.bf16.msra.mxu1 %v6256_v34 }
 0x642   :  { %2924 = vmatprep.subr.bf16.mxu1 %v6261_v16  ;;  %v6296_v16 = vld [vmem:[#allocation19 + $0x8] ss:$12 sps:$4 sm:$0xff]  }
 0x645   :  { %2925 = vmatpush1.bf16.msra.mxu1 %v6259_v35 }
 0x646   :  { %2926 = vmatprep.subr.bf16.mxu1 %v6264_v36  ;;  %v6300_v36 = vld [vmem:[#allocation19 + $0xe0] ss:$12 sps:$4 sm:$0xff]  }
 0x649   :  { %2927 = vmatpush1.bf16.msra.mxu1 %v6262_v37  ;;  %v6301_v37 = vld [vmem:[#allocation19 + $0x20] ss:$12 sps:$4 sm:$0xff]  }
 0x64a   :  { %2928 = vmatprep.subr.bf16.mxu1 %v6267_v55  ;;  %v6334_v55 = vld [vmem:[#allocation20 + $0x4] ss:$16 sps:$4 sm:$0xff]  }
 0x64d   :  { %2929 = vmatpush1.bf16.msra.mxu1 %v6265_v56  ;;  %v6337_v56 = vld [vmem:[#allocation20 + $0xc] ss:$16 sps:$4 sm:$0xff]  }
 0x64e   :  { %5668 = vmatprep.subr.bf16.mxu1 %v6295_v62 }
 0x703   :  { %v2677_v42 = vpop.f32.mrb[16].mxu1 }
 0x704   :  { %v2678_v43 = vadd.f32 %v2677_v42, %v2556_v39  ;;  %v2679_v44 = vpop.f32.mrb[17].mxu1  ;;  %v6306_v39 = vld [vmem:[#allocation19 + $0x38] ss:$12 sps:$4 sm:$0xff]   ;;  %v6311_v42 = vld [vmem:[#allocation19 + $0x50] ss:$12 sps:$4 sm:$0xff]  }
 0x705   :  { %v2680_v45 = vadd.f32 %v2679_v44, %v2560_v40  ;;  %v2681_v46 = vpop.f32.mrb[18].mxu1  ;;  %v6310_v40 = vld [vmem:[#allocation19 + $0x110] ss:$12 sps:$4 sm:$0xff]   ;;  %v6316_v44 = vld [vmem:[#allocation19 + $0x68] ss:$12 sps:$4 sm:$0xff]  }
 0x706   :  { %2684 = vst [vmem:[#allocation26] sm:$0xff] %v2678_v43  ;;  %v2682_v47 = vpop.f32.mrb[19].mxu1  ;;  %v6321_v46 = vld [vmem:[#allocation19 + $0x80] ss:$12 sps:$4 sm:$0xff]  }
 0x707   :  { %v2687_v48 = vmul.f32 0.5, %v2680_v45  ;;  %2685 = vst [vmem:[#allocation27] sm:$0xff] %v2680_v45  ;;  %v6320_v45 = vld [vmem:[#allocation19 + $0x140] ss:$12 sps:$4 sm:$0xff]  }
 0x708   :  { %v6324_v47 = vld [vmem:[#allocation19 + $0x154] ss:$12 sps:$4 sm:$0xff]  }
 0x709   :  { %v2688_v49 = vmul.f32 1.442695, %v2687_v48  ;;  %v6325_v48 = vld [vmem:[#allocation19 + $0x158] ss:$12 sps:$4 sm:$0xff]  }
 0x70b   :  { %6604 = vpow2.f32 %v2688_v49  ;;  %v6322_v49 = vld [vmem:[#allocation19 + $0x150] ss:$12 sps:$4 sm:$0xff]  }
 0x715   :  { %v6605_v51 = vpop.eup %6604 }
 0x716   :  { %v2690_v52 = vmul.f32 %v6605_v51, %v2686_v50  ;;  %v6326_v50 = vld [vmem:[#allocation19 + $0x98] ss:$12 sps:$4 sm:$0xff]  }
 0x717   :  { %v6329_v51 = vld [vmem:[#allocation19 + $0x16c] ss:$12 sps:$4 sm:$0xff]  }
 0x718   :  { %v2691_v53 = vadd.f32 %v2690_v52, %v2678_v43  ;;  %v6315_v43 = vld [vmem:[#allocation19 + $0x128] ss:$12 sps:$4 sm:$0xff]   ;;  %v6330_v52 = vld [vmem:[#allocation19 + $0x170] ss:$12 sps:$4 sm:$0xff]  }
 0x71a   :  { %v2708_v54 = vpack.c.bf16 %v2691_v53, %v2691_v53  ;;  %v6327_v53 = vld [vmem:[#allocation19 + $0x168] ss:$12 sps:$4 sm:$0xff]  }
 0x71c   :  { %5771 = vmatmul.mubr.bf16.vlgmr.msra.gmra.mrb[16].mxu0 %v2708_v54  ;;  %v6331_v54 = vld [vmem:[#allocation19 + $0xb0] ss:$12 sps:$4 sm:$0xff]  }
 0x71d   :  { %3297 = vmatpush1.bf16.msra.mxu0 %v6268_v57  ;;  %v2822_v57 = vld [vmem:[%s7552_s20] sm:$0x3] }
 0x71e   :  { %3298 = vmatprep.subr.bf16.mxu0 %v6273_v59  ;;  %v2827_v58 = vrot.slane %v2822_v57, %v7369_v28  ;;  %v2831_v59 = vrot.slane %v2822_v57, %v7377_v30  ;;  %v6401_v57 = vld [vmem:[#allocation20 + $0x168] ss:$16 sps:$4 sm:$0xff]  }
 0x721   :  { %3299 = vmatpush1.bf16.msra.mxu0 %v6271_v60 }
 0x722   :  { %3300 = vmatprep.subr.bf16.mxu0 %v6276_v61 }
 0x725   :  { %3301 = vmatpush1.bf16.msra.mxu0 %v6274_v63 }
 0x726   :  { %3302 = vmatprep.subr.bf16.mxu0 %v6279_v0 }
 0x729   :  { %3303 = vmatpush1.bf16.msra.mxu0 %v6277_v1 }
 0x72a   :  { %3304 = vmatprep.subr.bf16.mxu0 %v6282_v2 }
 0x72d   :  { %3305 = vmatpush1.bf16.msra.mxu0 %v6280_v3 }
 0x72e   :  { %3306 = vmatprep.subr.bf16.mxu0 %v6285_v5 }
 0x731   :  { %3307 = vmatpush1.bf16.msra.mxu0 %v6283_v6  ;;  %v6332_v6 = vld [vmem:[#allocation20] ss:$16 sps:$4 sm:$0xff]  }
 0x732   :  { %3308 = vmatprep.subr.bf16.mxu0 %v6288_v7  ;;  %v6335_v7 = vld [vmem:[#allocation20 + $0x8] ss:$16 sps:$4 sm:$0xff]  }
 0x735   :  { %3309 = vmatpush1.bf16.msra.mxu0 %v6286_v9 }
 0x736   :  { %3310 = vmatprep.subr.bf16.mxu0 %v6291_v10  ;;  %v6340_v10 = vld [vmem:[#allocation20 + $0x24] ss:$16 sps:$4 sm:$0xff]  }
 0x739   :  { %3311 = vmatpush1.bf16.msra.mxu0 %v6289_v11  ;;  %v6343_v11 = vld [vmem:[#allocation20 + $0x2c] ss:$16 sps:$4 sm:$0xff]  }
 0x73a   :  { %3312 = vmatprep.subr.bf16.mxu0 %v6294_v12  ;;  %v6338_v12 = vld [vmem:[#allocation20 + $0x20] ss:$16 sps:$4 sm:$0xff]  }
 0x73d   :  { %3313 = vmatpush1.bf16.msra.mxu0 %v6292_v13  ;;  %v6341_v13 = vld [vmem:[#allocation20 + $0x28] ss:$16 sps:$4 sm:$0xff]  }
 0x73e   :  { %3314 = vmatprep.subr.bf16.mxu0 %v6299_v14  ;;  %v6346_v14 = vld [vmem:[#allocation20 + $0x44] ss:$16 sps:$4 sm:$0xff]  }
 0x741   :  { %3315 = vmatpush1.bf16.msra.mxu0 %v6297_v15  ;;  %v6349_v15 = vld [vmem:[#allocation20 + $0x4c] ss:$16 sps:$4 sm:$0xff]  }
 0x742   :  { %3316 = vmatprep.subr.bf16.mxu0 %v6304_v17  ;;  %v6344_v17 = vld [vmem:[#allocation20 + $0x40] ss:$16 sps:$4 sm:$0xff]  }
 0x745   :  { %3317 = vmatpush1.bf16.msra.mxu0 %v6302_v18  ;;  %v6347_v18 = vld [vmem:[#allocation20 + $0x48] ss:$16 sps:$4 sm:$0xff]  }
 0x746   :  { %3318 = vmatprep.subr.bf16.mxu0 %v6309_v19  ;;  %v6352_v19 = vld [vmem:[#allocation20 + $0x64] ss:$16 sps:$4 sm:$0xff]  }
 0x749   :  { %3319 = vmatpush1.bf16.msra.mxu0 %v6307_v20  ;;  %v6355_v20 = vld [vmem:[#allocation20 + $0x6c] ss:$16 sps:$4 sm:$0xff]  }
 0x74a   :  { %3320 = vmatprep.subr.bf16.mxu0 %v6314_v21  ;;  %v6350_v21 = vld [vmem:[#allocation20 + $0x60] ss:$16 sps:$4 sm:$0xff]  }
 0x74d   :  { %3321 = vmatpush1.bf16.msra.mxu0 %v6312_v22  ;;  %v6353_v22 = vld [vmem:[#allocation20 + $0x68] ss:$16 sps:$4 sm:$0xff]  }
 0x74e   :  { %3322 = vmatprep.subr.bf16.mxu0 %v6319_v23  ;;  %v6358_v23 = vld [vmem:[#allocation20 + $0x84] ss:$16 sps:$4 sm:$0xff]  }
 0x751   :  { %3323 = vmatpush1.bf16.msra.mxu0 %v6317_v24  ;;  %v6361_v24 = vld [vmem:[#allocation20 + $0x8c] ss:$16 sps:$4 sm:$0xff]  }
 0x752   :  { %3324 = vmatprep.subr.bf16.mxu0 %v6324_v47  ;;  %v6391_v47 = vld [vmem:[#allocation20 + $0x12c] ss:$16 sps:$4 sm:$0xff]  }
 0x755   :  { %3325 = vmatpush1.bf16.msra.mxu0 %v6322_v49  ;;  %v6389_v49 = vld [vmem:[#allocation20 + $0x128] ss:$16 sps:$4 sm:$0xff]  }
 0x756   :  { %3326 = vmatprep.subr.bf16.mxu0 %v6329_v51  ;;  %v6397_v51 = vld [vmem:[#allocation20 + $0x14c] ss:$16 sps:$4 sm:$0xff]  }
 0x759   :  { %3327 = vmatpush1.bf16.msra.mxu0 %v6327_v53  ;;  %v6395_v53 = vld [vmem:[#allocation20 + $0x148] ss:$16 sps:$4 sm:$0xff]  }
 0x75a   :  { %4063 = vmatprep.subr.bf16.mxu0 %v6337_v56  ;;  %v6398_v56 = vld [vmem:[#allocation20 + $0x160] ss:$16 sps:$4 sm:$0xff]  }
 0x7ef   :  { %v2798_v26 = vpop.f32.mrb[16].mxu0 }
 0x7f0   :  { %v2799_v29 = vadd.f32 %v5319_v25, %v2798_v26  ;;  %v5772_v31 = vpop.f32.mrb[17].mxu0  ;;  %v6356_v25 = vld [vmem:[#allocation20 + $0x80] ss:$16 sps:$4 sm:$0xff]   ;;  %v6359_v26 = vld [vmem:[#allocation20 + $0x88] ss:$16 sps:$4 sm:$0xff]  }
 0x7f1   :  { %v2801_v32 = vpop.f32.mrb[18].mxu0  ;;  %v6367_v31 = vld [vmem:[#allocation20 + $0xac] ss:$16 sps:$4 sm:$0xff]  }
 0x7f2   :  { %v2804_v33 = vmax.f32 %v2799_v29, 0.0  ;;  %v5773_v34 = vpop.f32.mrb[19].mxu0  ;;  %v6364_v29 = vld [vmem:[#allocation20 + $0xa4] ss:$16 sps:$4 sm:$0xff]   ;;  %v6362_v32 = vld [vmem:[#allocation20 + $0xa0] ss:$16 sps:$4 sm:$0xff]  }
 0x7f3   :  { %v6370_v34 = vld [vmem:[#allocation20 + $0xc4] ss:$16 sps:$4 sm:$0xff]  }
 0x7f4   :  { %v2821_v35 = vpack.c.bf16 %v2804_v33, %v2804_v33  ;;  %v6365_v33 = vld [vmem:[#allocation20 + $0xa8] ss:$16 sps:$4 sm:$0xff]  }
 0x7f6   :  { %2947 = vmatmul.mubr.bf16.vlgmr.msra.gmra.mrb[20].mxu1 %v2821_v35  ;;  %v6368_v35 = vld [vmem:[#allocation20 + $0xc0] ss:$16 sps:$4 sm:$0xff]  }
 0x7f7   :  { %5669 = vmatpush3.bf16.msra.mxu1 %v6296_v16  ;;  %v6373_v16 = vld [vmem:[#allocation20 + $0xcc] ss:$16 sps:$4 sm:$0xff]  }
 0x7f8   :  { %5670 = vmatprep.subr.bf16.mxu1 %v6300_v36  ;;  %v6371_v36 = vld [vmem:[#allocation20 + $0xc8] ss:$16 sps:$4 sm:$0xff]  }
 0x7fb   :  { %5671 = vmatpush3.bf16.msra.mxu1 %v6301_v37  ;;  %v6376_v37 = vld [vmem:[#allocation20 + $0xe4] ss:$16 sps:$4 sm:$0xff]  }
 0x7fc   :  { %5672 = vmatprep.subr.bf16.mxu1 %v6305_v38  ;;  %v6379_v38 = vld [vmem:[#allocation20 + $0xec] ss:$16 sps:$4 sm:$0xff]  }
 0x7ff   :  { %5673 = vmatpush3.bf16.msra.mxu1 %v6306_v39  ;;  %v6374_v39 = vld [vmem:[#allocation20 + $0xe0] ss:$16 sps:$4 sm:$0xff]  }
 0x800   :  { %5674 = vmatprep.subr.bf16.mxu1 %v6310_v40  ;;  %v6377_v40 = vld [vmem:[#allocation20 + $0xe8] ss:$16 sps:$4 sm:$0xff]  }
 0x803   :  { %5675 = vmatpush3.bf16.msra.mxu1 %v6311_v42  ;;  %v6382_v42 = vld [vmem:[#allocation20 + $0x104] ss:$16 sps:$4 sm:$0xff]  }
 0x804   :  { %5676 = vmatprep.subr.bf16.mxu1 %v6315_v43  ;;  %v6385_v43 = vld [vmem:[#allocation20 + $0x10c] ss:$16 sps:$4 sm:$0xff]  }
 0x807   :  { %5677 = vmatpush3.bf16.msra.mxu1 %v6316_v44  ;;  %v6380_v44 = vld [vmem:[#allocation20 + $0x100] ss:$16 sps:$4 sm:$0xff]  }
 0x808   :  { %5678 = vmatprep.subr.bf16.mxu1 %v6320_v45  ;;  %v6383_v45 = vld [vmem:[#allocation20 + $0x108] ss:$16 sps:$4 sm:$0xff]  }
 0x80b   :  { %5679 = vmatpush3.bf16.msra.mxu1 %v6321_v46  ;;  %v6388_v46 = vld [vmem:[#allocation20 + $0x124] ss:$16 sps:$4 sm:$0xff]  }
 0x80c   :  { %5680 = vmatprep.subr.bf16.mxu1 %v6325_v48  ;;  %v6386_v48 = vld [vmem:[#allocation20 + $0x120] ss:$16 sps:$4 sm:$0xff]  }
 0x80f   :  { %5681 = vmatpush3.bf16.msra.mxu1 %v6326_v50  ;;  %v6394_v50 = vld [vmem:[#allocation20 + $0x144] ss:$16 sps:$4 sm:$0xff]  }
 0x810   :  { %5682 = vmatprep.subr.bf16.mxu1 %v6330_v52  ;;  %v6392_v52 = vld [vmem:[#allocation20 + $0x140] ss:$16 sps:$4 sm:$0xff]  }
 0x813   :  { %5683 = vmatpush3.bf16.msra.mxu1 %v6331_v54  ;;  %v6400_v54 = vld [vmem:[#allocation20 + $0x164] ss:$16 sps:$4 sm:$0xff]  }
 0x814   :  { %3981 = vmatprep.subr.bf16.mxu1 %v6334_v55  ;;  %v6403_v55 = vld [vmem:[#allocation20 + $0x16c] ss:$16 sps:$4 sm:$0xff]  }
 0x8c9   :  { %v2948_v60 = vpop.f32.mrb[20].mxu1 }
 0x8ca   :  { %v2949_v61 = vadd.f32 %v2948_v60, %v2827_v58  ;;  %v2950_v62 = vpop.f32.mrb[21].mxu1  ;;  %v6406_v58 = vld [vmem:[#allocation20 + $0x184] ss:$16 sps:$4 sm:$0xff]   ;;  %v6404_v60 = vld [vmem:[#allocation20 + $0x180] ss:$16 sps:$4 sm:$0xff]  }
 0x8cb   :  { %v2951_v63 = vadd.f32 %v2950_v62, %v2831_v59  ;;  %v2952_v0 = vpop.f32.mrb[22].mxu1  ;;  %v6409_v59 = vld [vmem:[#allocation20 + $0x18c] ss:$16 sps:$4 sm:$0xff]   ;;  %v6412_v62 = vld [vmem:[#allocation20 + $0x1a4] ss:$16 sps:$4 sm:$0xff]  }
 0x8cc   :  { %v2955_v1 = vmax.f32 %v2949_v61, 0.0  ;;  %v2953_v2 = vpop.f32.mrb[23].mxu1  ;;  %v6407_v61 = vld [vmem:[#allocation20 + $0x188] ss:$16 sps:$4 sm:$0xff]   ;;  %v6410_v0 = vld [vmem:[#allocation20 + $0x1a0] ss:$16 sps:$4 sm:$0xff]  }
 0x8cd   :  { %v2956_v3 = vmax.f32 %v2951_v63, 0.0  ;;  %v6415_v63 = vld [vmem:[#allocation20 + $0x1ac] ss:$16 sps:$4 sm:$0xff]   ;;  %v6418_v2 = vld [vmem:[#allocation20 + $0x1c4] ss:$16 sps:$4 sm:$0xff]  }
 0x8ce   :  { %v3021_v9 = vpack.c.bf16 %v2955_v1, %v2955_v1  ;;  %v6413_v1 = vld [vmem:[#allocation20 + $0x1a8] ss:$16 sps:$4 sm:$0xff]  }
 0x8cf   :  { %v3022_v5 = vpack.c.bf16 %v2956_v3, %v2956_v3  ;;  %v6421_v3 = vld [vmem:[#allocation20 + $0x1cc] ss:$16 sps:$4 sm:$0xff]  }
 0x8d1   :  { %3328 = vmatprep.mubr.bf16.mxu0 %v3022_v5  ;;  %3369 = vmatprep.mubr.bf16.mxu1 %v3022_v5  ;;  %v6416_v5 = vld [vmem:[#allocation20 + $0x1c0] ss:$16 sps:$4 sm:$0xff]  }
 0x8d2   :  { %3329 = vmatmul.mubr.bf16.vlgmr.msra.gmra.mrb[20].mxu0 %v3021_v9  ;;  %3370 = vmatmul.mubr.bf16.vlgmr.msra.gmra.mrb[24].mxu1 %v3021_v9  ;;  %v6427_v9 = vld [vmem:[#allocation20 + $0x1ec] ss:$16 sps:$4 sm:$0xff]  }
 0x8d3   :  { %3982 = vmatpush1.bf16.msra.mxu1 %v6332_v6  ;;  %4064 = vmatpush1.bf16.msra.mxu0 %v6335_v7  ;;  %v6419_v6 = vld [vmem:[#allocation20 + $0x1c8] ss:$16 sps:$4 sm:$0xff]   ;;  %v6424_v7 = vld [vmem:[#allocation20 + $0x1e4] ss:$16 sps:$4 sm:$0xff]  }
 0x8d4   :  { %3983 = vmatprep.subr.bf16.mxu1 %v6340_v10  ;;  %4065 = vmatprep.subr.bf16.mxu0 %v6343_v11  ;;  %v6422_v10 = vld [vmem:[#allocation20 + $0x1e0] ss:$16 sps:$4 sm:$0xff]   ;;  %v6425_v11 = vld [vmem:[#allocation20 + $0x1e8] ss:$16 sps:$4 sm:$0xff]  }
 0x8d7   :  { %3984 = vmatpush1.bf16.msra.mxu1 %v6338_v12  ;;  %4066 = vmatpush1.bf16.msra.mxu0 %v6341_v13  ;;  %v6430_v12 = vld [vmem:[#allocation20 + $0x204] ss:$16 sps:$4 sm:$0xff]   ;;  %v6433_v13 = vld [vmem:[#allocation20 + $0x20c] ss:$16 sps:$4 sm:$0xff]  }
 0x8d8   :  { %3985 = vmatprep.subr.bf16.mxu1 %v6346_v14  ;;  %4067 = vmatprep.subr.bf16.mxu0 %v6349_v15  ;;  %v7448_v14 = vld [vmem:[%s7553_s21] sm:$0x7] }
 0x8d9   :  { %v3028_v15 = vrot.slane %v7448_v14, %v7369_v28 }
 0x8db   :  { %3986 = vmatpush1.bf16.msra.mxu1 %v6344_v17  ;;  %4068 = vmatpush1.bf16.msra.mxu0 %v6347_v18  ;;  %v3032_v17 = vrot.slane %v7448_v14, %v7377_v30 }
 0x8dc   :  { %3987 = vmatprep.subr.bf16.mxu1 %v6352_v19  ;;  %4069 = vmatprep.subr.bf16.mxu0 %v6355_v20 }
 0x8df   :  { %3988 = vmatpush1.bf16.msra.mxu1 %v6350_v21  ;;  %4070 = vmatpush1.bf16.msra.mxu0 %v6353_v22 }
 0x8e0   :  { %3989 = vmatprep.subr.bf16.mxu1 %v6358_v23  ;;  %4071 = vmatprep.subr.bf16.mxu0 %v6361_v24 }
 0x8e3   :  { %3990 = vmatpush1.bf16.msra.mxu1 %v6356_v25  ;;  %4072 = vmatpush1.bf16.msra.mxu0 %v6359_v26 }
 0x8e4   :  { %3991 = vmatprep.subr.bf16.mxu1 %v6364_v29  ;;  %4073 = vmatprep.subr.bf16.mxu0 %v6367_v31 }
 0x8e7   :  { %3992 = vmatpush1.bf16.msra.mxu1 %v6362_v32  ;;  %4074 = vmatpush1.bf16.msra.mxu0 %v6365_v33 }
 0x8e8   :  { %3993 = vmatprep.subr.bf16.mxu1 %v6370_v34  ;;  %4075 = vmatprep.subr.bf16.mxu0 %v6373_v16  ;;  %v6428_v16 = vld [vmem:[#allocation20 + $0x200] ss:$16 sps:$4 sm:$0xff]  }
 0x8eb   :  { %3994 = vmatpush1.bf16.msra.mxu1 %v6368_v35  ;;  %4076 = vmatpush1.bf16.msra.mxu0 %v6371_v36  ;;  %v6431_v35 = vld [vmem:[#allocation20 + $0x208] ss:$16 sps:$4 sm:$0xff]  }
 0x8ec   :  { %3995 = vmatprep.subr.bf16.mxu1 %v6376_v37  ;;  %4077 = vmatprep.subr.bf16.mxu0 %v6379_v38  ;;  %v6436_v37 = vld [vmem:[#allocation20 + $0x224] ss:$16 sps:$4 sm:$0xff]   ;;  %v6439_v38 = vld [vmem:[#allocation20 + $0x22c] ss:$16 sps:$4 sm:$0xff]  }
 0x8ef   :  { %3996 = vmatpush1.bf16.msra.mxu1 %v6374_v39  ;;  %4078 = vmatpush1.bf16.msra.mxu0 %v6377_v40  ;;  %v6434_v39 = vld [vmem:[#allocation20 + $0x220] ss:$16 sps:$4 sm:$0xff]   ;;  %v6437_v40 = vld [vmem:[#allocation20 + $0x228] ss:$16 sps:$4 sm:$0xff]  }
 0x8f0   :  { %3997 = vmatprep.subr.bf16.mxu1 %v6382_v42  ;;  %4079 = vmatprep.subr.bf16.mxu0 %v6385_v43  ;;  %v6442_v42 = vld [vmem:[#allocation20 + $0x244] ss:$16 sps:$4 sm:$0xff]   ;;  %v6445_v43 = vld [vmem:[#allocation20 + $0x24c] ss:$16 sps:$4 sm:$0xff]  }
 0x8f3   :  { %3998 = vmatpush1.bf16.msra.mxu1 %v6380_v44  ;;  %4080 = vmatpush1.bf16.msra.mxu0 %v6383_v45  ;;  %v6440_v44 = vld [vmem:[#allocation20 + $0x240] ss:$16 sps:$4 sm:$0xff]   ;;  %v6443_v45 = vld [vmem:[#allocation20 + $0x248] ss:$16 sps:$4 sm:$0xff]  }
 0x8f4   :  { %3999 = vmatprep.subr.bf16.mxu1 %v6388_v46  ;;  %4081 = vmatprep.subr.bf16.mxu0 %v6391_v47  ;;  %v6448_v46 = vld [vmem:[#allocation20 + $0x264] ss:$16 sps:$4 sm:$0xff]   ;;  %v6451_v47 = vld [vmem:[#allocation20 + $0x26c] ss:$16 sps:$4 sm:$0xff]  }
 0x8f7   :  { %4000 = vmatpush1.bf16.msra.mxu1 %v6386_v48  ;;  %4082 = vmatpush1.bf16.msra.mxu0 %v6389_v49  ;;  %v6446_v48 = vld [vmem:[#allocation20 + $0x260] ss:$16 sps:$4 sm:$0xff]   ;;  %v6449_v49 = vld [vmem:[#allocation20 + $0x268] ss:$16 sps:$4 sm:$0xff]  }
 0x8f8   :  { %4001 = vmatprep.subr.bf16.mxu1 %v6394_v50  ;;  %4083 = vmatprep.subr.bf16.mxu0 %v6397_v51  ;;  %v6454_v50 = vld [vmem:[#allocation20 + $0x284] ss:$16 sps:$4 sm:$0xff]   ;;  %v6457_v51 = vld [vmem:[#allocation20 + $0x28c] ss:$16 sps:$4 sm:$0xff]  }
 0x8fb   :  { %4002 = vmatpush1.bf16.msra.mxu1 %v6392_v52  ;;  %4084 = vmatpush1.bf16.msra.mxu0 %v6395_v53  ;;  %v6452_v52 = vld [vmem:[#allocation20 + $0x280] ss:$16 sps:$4 sm:$0xff]   ;;  %v6460_v53 = vld [vmem:[#allocation20 + $0x2a4] ss:$16 sps:$4 sm:$0xff]  }
 0x8fc   :  { %4003 = vmatprep.subr.bf16.mxu1 %v6400_v54  ;;  %4085 = vmatprep.subr.bf16.mxu0 %v6403_v55  ;;  %v6463_v54 = vld [vmem:[#allocation20 + $0x2ac] ss:$16 sps:$4 sm:$0xff]   ;;  %v6458_v55 = vld [vmem:[#allocation20 + $0x2a0] ss:$16 sps:$4 sm:$0xff]  }
 0x8ff   :  { %4004 = vmatpush1.bf16.msra.mxu1 %v6398_v56  ;;  %4086 = vmatpush1.bf16.msra.mxu0 %v6401_v57  ;;  %v6461_v56 = vld [vmem:[#allocation20 + $0x2a8] ss:$16 sps:$4 sm:$0xff]   ;;  %v3036_v57 = vrot.slane %v7448_v14, %v7388_v4  ;;  %v6509_v14 = vld [vmem:[#allocation22 + $0x20] ss:$12 sps:$4 sm:$0xff]  }
 0x900   :  { %4005 = vmatprep.subr.bf16.mxu1 %v6406_v58  ;;  %4087 = vmatprep.subr.bf16.mxu0 %v6409_v59  ;;  %v6466_v58 = vld [vmem:[#allocation20 + $0x2c4] ss:$16 sps:$4 sm:$0xff]   ;;  %v6469_v59 = vld [vmem:[#allocation20 + $0x2cc] ss:$16 sps:$4 sm:$0xff]  }
 0x903   :  { %4006 = vmatpush1.bf16.msra.mxu1 %v6404_v60  ;;  %4088 = vmatpush1.bf16.msra.mxu0 %v6407_v61  ;;  %v6464_v60 = vld [vmem:[#allocation20 + $0x2c0] ss:$16 sps:$4 sm:$0xff]   ;;  %v6467_v61 = vld [vmem:[#allocation20 + $0x2c8] ss:$16 sps:$4 sm:$0xff]  }
 0x904   :  { %4007 = vmatprep.subr.bf16.mxu1 %v6412_v62  ;;  %4089 = vmatprep.subr.bf16.mxu0 %v6415_v63  ;;  %v6472_v63 = vld [vmem:[#allocation20 + $0x2e4] ss:$16 sps:$4 sm:$0xff]  }
 0x907   :  { %4008 = vmatpush1.bf16.msra.mxu1 %v6410_v0  ;;  %4090 = vmatpush1.bf16.msra.mxu0 %v6413_v1  ;;  %v6475_v0 = vld [vmem:[#allocation20 + $0x2ec] ss:$16 sps:$4 sm:$0xff]   ;;  %v6470_v1 = vld [vmem:[#allocation20 + $0x2e0] ss:$16 sps:$4 sm:$0xff]  }
 0x908   :  { %4009 = vmatprep.subr.bf16.mxu1 %v6418_v2  ;;  %4091 = vmatprep.subr.bf16.mxu0 %v6421_v3  ;;  %v6473_v2 = vld [vmem:[#allocation20 + $0x2e8] ss:$16 sps:$4 sm:$0xff]  }
 0x90b   :  { %4010 = vmatpush1.bf16.msra.mxu1 %v6416_v5  ;;  %4092 = vmatpush1.bf16.msra.mxu0 %v6419_v6  ;;  %v6478_v5 = vld [vmem:[#allocation22 + $0x4] ss:$12 sps:$4 sm:$0xff]   ;;  %v6503_v6 = vld [vmem:[#allocation22 + $0xc8] ss:$12 sps:$4 sm:$0xff]  }
 0x90c   :  { %4011 = vmatprep.subr.bf16.mxu1 %v6424_v7  ;;  %4093 = vmatprep.subr.bf16.mxu0 %v6427_v9  ;;  %v6476_v7 = vld [vmem:[#allocation22] ss:$12 sps:$4 sm:$0xff]   ;;  %v6504_v9 = vld [vmem:[#allocation22 + $0x8] ss:$12 sps:$4 sm:$0xff]  }
 0x90f   :  { %4012 = vmatpush1.bf16.msra.mxu1 %v6422_v10  ;;  %4094 = vmatpush1.bf16.msra.mxu0 %v6425_v11  ;;  %v6481_v11 = vld [vmem:[#allocation22 + $0x1c] ss:$12 sps:$4 sm:$0xff]  }
 0x910   :  { %4022 = vmatprep.subr.bf16.mxu1 %v6430_v12  ;;  %4104 = vmatprep.subr.bf16.mxu0 %v6433_v13  ;;  %v6508_v12 = vld [vmem:[#allocation22 + $0xe0] ss:$12 sps:$4 sm:$0xff]   ;;  %v6479_v13 = vld [vmem:[#allocation22 + $0x18] ss:$12 sps:$4 sm:$0xff]  }
 0x9a5   :  { %v3330_v18 = vpop.f32.mrb[20].mxu0  ;;  %v5684_v19 = vpop.f32.mrb[24].mxu1 }
 0x9a6   :  { %v3331_v20 = vadd.f32 %v3330_v18, %v3028_v15  ;;  %v3332_v21 = vpop.f32.mrb[21].mxu0  ;;  %v5685_v22 = vpop.f32.mrb[25].mxu1  ;;  %v6484_v15 = vld [vmem:[#allocation22 + $0x34] ss:$12 sps:$4 sm:$0xff]   ;;  %v6482_v18 = vld [vmem:[#allocation22 + $0x30] ss:$12 sps:$4 sm:$0xff]  }
 0x9a7   :  { %v3333_v23 = vadd.f32 %v3332_v21, %v3032_v17  ;;  %v7454_v24 = vadd.f32 %v5685_v22, %v5684_v19  ;;  %v3334_v25 = vpop.f32.mrb[22].mxu0  ;;  %v5687_v26 = vpop.f32.mrb[26].mxu1  ;;  %v6513_v17 = vld [vmem:[#allocation22 + $0xf8] ss:$12 sps:$4 sm:$0xff]   ;;  %v6518_v21 = vld [vmem:[#allocation22 + $0x110] ss:$12 sps:$4 sm:$0xff]  }
 0x9a8   :  { %v3377_v29 = vmax.f32 %v3331_v20, 0.0  ;;  %v3335_v31 = vpop.f32.mrb[23].mxu0  ;;  %v5688_v32 = vpop.f32.mrb[27].mxu1  ;;  %v6514_v19 = vld [vmem:[#allocation22 + $0x38] ss:$12 sps:$4 sm:$0xff]  }
 0x9a9   :  { %v3378_v33 = vmax.f32 %v3333_v23, 0.0  ;;  %v3372_v62 = vadd.f32 %v7454_v24, %v3036_v57  ;;  %v6487_v20 = vld [vmem:[#allocation22 + $0x4c] ss:$12 sps:$4 sm:$0xff]   ;;  %v6485_v22 = vld [vmem:[#allocation22 + $0x48] ss:$12 sps:$4 sm:$0xff]  }
 0x9aa   :  { %v3476_v36 = vpack.c.bf16 %v3377_v29, %v3377_v29  ;;  %v6519_v23 = vld [vmem:[#allocation22 + $0x50] ss:$12 sps:$4 sm:$0xff]   ;;  %v6523_v25 = vld [vmem:[#allocation22 + $0x128] ss:$12 sps:$4 sm:$0xff]   ;;  %v6488_v26 = vld [vmem:[#allocation22 + $0x60] ss:$12 sps:$4 sm:$0xff]  }
 0x9ab   :  { %v3477_v34 = vpack.c.bf16 %v3378_v33, %v3378_v33  ;;  %v3379_v3 = vmax.f32 %v3372_v62, 0.0  ;;  %v6490_v24 = vld [vmem:[#allocation22 + $0x64] ss:$12 sps:$4 sm:$0xff]   ;;  %v6524_v29 = vld [vmem:[#allocation22 + $0x68] ss:$12 sps:$4 sm:$0xff]  }
 0x9ac   :  { %v6493_v31 = vld [vmem:[#allocation22 + $0x7c] ss:$12 sps:$4 sm:$0xff]   ;;  %v6528_v32 = vld [vmem:[#allocation22 + $0x140] ss:$12 sps:$4 sm:$0xff]   ;;  %v6491_v33 = vld [vmem:[#allocation22 + $0x78] ss:$12 sps:$4 sm:$0xff]  }
 0x9ad   :  { %4013 = vmatprep.mubr.bf16.mxu1 %v3477_v34  ;;  %4095 = vmatprep.mubr.bf16.mxu0 %v3477_v34  ;;  %v3478_v10 = vpack.c.bf16 %v3379_v3, %v3379_v3  ;;  %v6529_v34 = vld [vmem:[#allocation22 + $0x80] ss:$12 sps:$4 sm:$0xff]   ;;  %v6539_v57 = vld [vmem:[#allocation22 + $0xb0] ss:$12 sps:$4 sm:$0xff]  }
 0x9ae   :  { %4014 = vmatmul.mubr.bf16.vlgmr.msra.gmra.mrb[28].mxu1 %v3476_v36  ;;  %4096 = vmatmul.mubr.bf16.vlgmr.msra.gmra.mrb[24].mxu0 %v3476_v36  ;;  %v6499_v36 = vld [vmem:[#allocation22 + $0xac] ss:$12 sps:$4 sm:$0xff]  }
 0x9af   :  { %4023 = vmatpush1.bf16.msra.mxu1 %v6428_v16  ;;  %4105 = vmatpush1.bf16.msra.mxu0 %v6431_v35  ;;  %v6496_v16 = vld [vmem:[#allocation22 + $0x94] ss:$12 sps:$4 sm:$0xff]   ;;  %v6494_v35 = vld [vmem:[#allocation22 + $0x90] ss:$12 sps:$4 sm:$0xff]  }
 0x9b0   :  { %4024 = vmatprep.subr.bf16.mxu1 %v6436_v37  ;;  %4106 = vmatprep.subr.bf16.mxu0 %v6439_v38  ;;  %v6497_v37 = vld [vmem:[#allocation22 + $0xa8] ss:$12 sps:$4 sm:$0xff]   ;;  %v6502_v38 = vld [vmem:[#allocation22 + $0xc4] ss:$12 sps:$4 sm:$0xff]  }
 0x9b1   :  { %4054 = vmatprep.mubr.bf16.mxu1 %v7021_v8  ;;  %4136 = vmatprep.mubr.bf16.mxu0 %v7021_v8  ;;  %v6455_v8 = vld [vmem:[#allocation20 + $0x288] ss:$16 sps:$4 sm:$0xff]  }
 0x9b3   :  { %4025 = vmatpush1.bf16.msra.mxu1 %v6434_v39  ;;  %4107 = vmatpush1.bf16.msra.mxu0 %v6437_v40  ;;  %v6500_v39 = vld [vmem:[#allocation22 + $0xc0] ss:$12 sps:$4 sm:$0xff]   ;;  %v6507_v40 = vld [vmem:[#allocation22 + $0xdc] ss:$12 sps:$4 sm:$0xff]  }
 0x9b4   :  { %4026 = vmatprep.subr.bf16.mxu1 %v6442_v42  ;;  %4108 = vmatprep.subr.bf16.mxu0 %v6445_v43  ;;  %v6505_v42 = vld [vmem:[#allocation22 + $0xd8] ss:$12 sps:$4 sm:$0xff]   ;;  %v6512_v43 = vld [vmem:[#allocation22 + $0xf4] ss:$12 sps:$4 sm:$0xff]  }
 0x9b7   :  { %4027 = vmatpush1.bf16.msra.mxu1 %v6440_v44  ;;  %4109 = vmatpush1.bf16.msra.mxu0 %v6443_v45  ;;  %v6510_v44 = vld [vmem:[#allocation22 + $0xf0] ss:$12 sps:$4 sm:$0xff]   ;;  %v6517_v45 = vld [vmem:[#allocation22 + $0x10c] ss:$12 sps:$4 sm:$0xff]  }
 0x9b8   :  { %4028 = vmatprep.subr.bf16.mxu1 %v6448_v46  ;;  %4110 = vmatprep.subr.bf16.mxu0 %v6451_v47  ;;  %v6515_v46 = vld [vmem:[#allocation22 + $0x108] ss:$12 sps:$4 sm:$0xff]   ;;  %v6522_v47 = vld [vmem:[#allocation22 + $0x124] ss:$12 sps:$4 sm:$0xff]  }
 0x9bb   :  { %4029 = vmatpush1.bf16.msra.mxu1 %v6446_v48  ;;  %4111 = vmatpush1.bf16.msra.mxu0 %v6449_v49  ;;  %v6520_v48 = vld [vmem:[#allocation22 + $0x120] ss:$12 sps:$4 sm:$0xff]   ;;  %v6527_v49 = vld [vmem:[#allocation22 + $0x13c] ss:$12 sps:$4 sm:$0xff]  }
 0x9bc   :  { %4030 = vmatprep.subr.bf16.mxu1 %v6454_v50  ;;  %4112 = vmatprep.subr.bf16.mxu0 %v6457_v51  ;;  %v6525_v50 = vld [vmem:[#allocation22 + $0x138] ss:$12 sps:$4 sm:$0xff]   ;;  %v6532_v51 = vld [vmem:[#allocation22 + $0x154] ss:$12 sps:$4 sm:$0xff]  }
 0x9bf   :  { %4031 = vmatpush1.bf16.msra.mxu1 %v6452_v52  ;;  %4113 = vmatpush1.bf16.msra.mxu0 %v6455_v8  ;;  %v6533_v52 = vld [vmem:[#allocation22 + $0x158] ss:$12 sps:$4 sm:$0xff]   ;;  %v6530_v8 = vld [vmem:[#allocation22 + $0x150] ss:$12 sps:$4 sm:$0xff]  }
 0x9c0   :  { %4032 = vmatprep.subr.bf16.mxu1 %v6460_v53  ;;  %4114 = vmatprep.subr.bf16.mxu0 %v6463_v54  ;;  %v6534_v53 = vld [vmem:[#allocation22 + $0x98] ss:$12 sps:$4 sm:$0xff]  }
 0x9c1   :  { %v6537_v54 = vld [vmem:[#allocation22 + $0x16c] ss:$12 sps:$4 sm:$0xff]  }
 0x9c3   :  { %4033 = vmatpush1.bf16.msra.mxu1 %v6458_v55  ;;  %4115 = vmatpush1.bf16.msra.mxu0 %v6461_v56  ;;  %v6538_v55 = vld [vmem:[#allocation22 + $0x170] ss:$12 sps:$4 sm:$0xff]   ;;  %v6535_v56 = vld [vmem:[#allocation22 + $0x168] ss:$12 sps:$4 sm:$0xff]  }
 0x9c4   :  { %4034 = vmatprep.subr.bf16.mxu1 %v6466_v58  ;;  %4116 = vmatprep.subr.bf16.mxu0 %v6469_v59  ;;  %v6542_v58 = vld [vmem:[#allocation22 + $0x184] ss:$12 sps:$4 sm:$0xff]   ;;  %v6543_v59 = vld [vmem:[#allocation22 + $0x248] ss:$12 sps:$4 sm:$0xff]  }
 0x9c7   :  { %4035 = vmatpush1.bf16.msra.mxu1 %v6464_v60  ;;  %4117 = vmatpush1.bf16.msra.mxu0 %v6467_v61  ;;  %v7464_v60 = vld [vmem:[%s7554_s22] sm:$0xf]  ;;  %s7024_s22 = smov [#allocation23]  }
 0x9c8   :  { %4036 = vmatprep.subr.bf16.mxu1 %v6472_v63  ;;  %4118 = vmatprep.subr.bf16.mxu0 %v6475_v0  ;;  %v3484_v61 = vrot.slane %v7464_v60, %v7369_v28  ;;  %v3488_v62 = vrot.slane %v7464_v60, %v7377_v30  ;;  %v3496_v63 = vrot.slane %v7464_v60, %v375_v41  ;;  %v6547_v41 = vld [vmem:[#allocation22 + $0x19c] ss:$12 sps:$4 sm:$0xff]   ;;  %s4981_s16 = sshll.u32 %s7024_s22, 4  ;;  %s4982_s16 = int_to_ptr.vmem [resolvable:$true] %s4981_s16 }
 0x9c9   :  { %s6892_s26 = scalar_lea.vmem %s4982_s16, 128  ;;  %p6897_p7 = scmp.lt.s32.totalorder %s4982_s16, %s4982_s16 }
 0x9ca   :  { %p6893_p6 = scmp.ne.s32.totalorder %s4982_s16, %s6892_s26  ;;  %p6898_p8 = scmp.lt.s32.totalorder %s6892_s26, %s6892_s26 }
 0x9cb   :  { %4037 = vmatpush1.bf16.msra.mxu1 %v6470_v1  ;;  %4119 = vmatpush1.bf16.msra.mxu0 %v6473_v2 }
 0x9cc   :  { %4810 = vmatprep.subr.bf16.mxu1 %v6478_v5  ;;  %5690 = vmatprep.subr.bf16.mxu0 %v6503_v6  ;;  %p6899_p9 = por %p6898_p8, %p6897_p7 }
 0x9ce   :  { %4055 = vmatmul.mubr.bf16.vlgmr.msra.gmra.mrb[28].mxu1 %v3478_v10  ;;  %4137 = vmatmul.mubr.bf16.vlgmr.msra.gmra.mrb[24].mxu0 %v3478_v10  ;;  %p6900_p10 = pnand %p6899_p9, %p6893_p6 }
 0x9cf   :  { %4811 = vmatpush1.bf16.msra.mxu1 %v6476_v7  ;;  %5691 = vmatpush3.bf16.msra.mxu0 %v6504_v9 }
 0x9d0   :  { %4812 = vmatprep.subr.bf16.mxu1 %v6481_v11  ;;  %5692 = vmatprep.subr.bf16.mxu0 %v6508_v12 }
 0x9d3   :  { %4813 = vmatpush1.bf16.msra.mxu1 %v6479_v13  ;;  %5693 = vmatpush3.bf16.msra.mxu0 %v6509_v14 }
 0x9d4   :  { %4814 = vmatprep.subr.bf16.mxu1 %v6484_v15  ;;  %5694 = vmatprep.subr.bf16.mxu0 %v6513_v17 }
 0x9d7   :  { %4815 = vmatpush1.bf16.msra.mxu1 %v6482_v18  ;;  %5695 = vmatpush3.bf16.msra.mxu0 %v6514_v19  ;;  %v6540_v18 = vld [vmem:[#allocation22 + $0x180] ss:$12 sps:$4 sm:$0xff]  }
 0x9d8   :  { %4816 = vmatprep.subr.bf16.mxu1 %v6487_v20  ;;  %5696 = vmatprep.subr.bf16.mxu0 %v6518_v21  ;;  %v6548_v20 = vld [vmem:[#allocation22 + $0x260] ss:$12 sps:$4 sm:$0xff]  }
 0x9db   :  { %4817 = vmatpush1.bf16.msra.mxu1 %v6485_v22  ;;  %5697 = vmatpush3.bf16.msra.mxu0 %v6519_v23  ;;  %v6545_v22 = vld [vmem:[#allocation22 + $0x198] ss:$12 sps:$4 sm:$0xff]   ;;  %v6549_v23 = vld [vmem:[#allocation22 + $0x1a0] ss:$12 sps:$4 sm:$0xff]  }
 0x9dc   :  { %4818 = vmatprep.subr.bf16.mxu1 %v6490_v24  ;;  %5698 = vmatprep.subr.bf16.mxu0 %v6523_v25  ;;  %v6552_v24 = vld [vmem:[#allocation22 + $0x1b4] ss:$12 sps:$4 sm:$0xff]   ;;  %v6553_v25 = vld [vmem:[#allocation22 + $0x278] ss:$12 sps:$4 sm:$0xff]  }
 0x9df   :  { %4819 = vmatpush1.bf16.msra.mxu1 %v6488_v26  ;;  %5699 = vmatpush3.bf16.msra.mxu0 %v6524_v29  ;;  %v6550_v26 = vld [vmem:[#allocation22 + $0x1b0] ss:$12 sps:$4 sm:$0xff]   ;;  %v6554_v29 = vld [vmem:[#allocation22 + $0x1b8] ss:$12 sps:$4 sm:$0xff]  }
 0x9e0   :  { %4820 = vmatprep.subr.bf16.mxu1 %v6493_v31  ;;  %5700 = vmatprep.subr.bf16.mxu0 %v6528_v32  ;;  %v6557_v31 = vld [vmem:[#allocation22 + $0x1cc] ss:$12 sps:$4 sm:$0xff]   ;;  %v6558_v32 = vld [vmem:[#allocation22 + $0x290] ss:$12 sps:$4 sm:$0xff]  }
 0x9e3   :  { %4821 = vmatpush1.bf16.msra.mxu1 %v6491_v33  ;;  %5701 = vmatpush3.bf16.msra.mxu0 %v6529_v34  ;;  %v6555_v33 = vld [vmem:[#allocation22 + $0x1c8] ss:$12 sps:$4 sm:$0xff]   ;;  %v6559_v34 = vld [vmem:[#allocation22 + $0x1d0] ss:$12 sps:$4 sm:$0xff]  }
 0x9e4   :  { %4822 = vmatprep.subr.bf16.mxu1 %v6496_v16  ;;  %5702 = vmatprep.subr.bf16.mxu0 %v6533_v52  ;;  %v6562_v16 = vld [vmem:[#allocation22 + $0x1e4] ss:$12 sps:$4 sm:$0xff]  }
 0x9e5   :  { %v6579_v52 = vld [vmem:[#allocation22 + $0x230] ss:$12 sps:$4 sm:$0xff]  }
 0x9e7   :  { %4823 = vmatpush1.bf16.msra.mxu1 %v6494_v35  ;;  %5703 = vmatpush3.bf16.msra.mxu0 %v6534_v53  ;;  %v6563_v35 = vld [vmem:[#allocation22 + $0x2a8] ss:$12 sps:$4 sm:$0xff]   ;;  %v6582_v53 = vld [vmem:[#allocation22 + $0x244] ss:$12 sps:$4 sm:$0xff]  }
 0x9e8   :  { %4824 = vmatprep.subr.bf16.mxu1 %v6499_v36  ;;  %5704 = vmatprep.subr.bf16.mxu0 %v6538_v55  ;;  %v6560_v36 = vld [vmem:[#allocation22 + $0x1e0] ss:$12 sps:$4 sm:$0xff]  }
 0x9eb   :  { %4825 = vmatpush1.bf16.msra.mxu1 %v6497_v37  ;;  %5705 = vmatpush3.bf16.msra.mxu0 %v6539_v57  ;;  %v6564_v37 = vld [vmem:[#allocation22 + $0x1e8] ss:$12 sps:$4 sm:$0xff]   ;;  %v6583_v57 = vld [vmem:[#allocation22 + $0x258] ss:$12 sps:$4 sm:$0xff]  }
 0x9ec   :  { %4826 = vmatprep.subr.bf16.mxu1 %v6502_v38  ;;  %5712 = vmatprep.subr.bf16.mxu0 %v6543_v59  ;;  %v6567_v38 = vld [vmem:[#allocation22 + $0x1fc] ss:$12 sps:$4 sm:$0xff]  }
 0x9ed   :  { %v6586_v59 = vld [vmem:[#allocation22 + $0x270] ss:$12 sps:$4 sm:$0xff]  }
 0x9ef   :  { %4827 = vmatpush1.bf16.msra.mxu1 %v6500_v39  ;;  %v6568_v39 = vld [vmem:[#allocation22 + $0x2c0] ss:$12 sps:$4 sm:$0xff]  }
 0x9f0   :  { %4828 = vmatprep.subr.bf16.mxu1 %v6507_v40  ;;  %v6565_v40 = vld [vmem:[#allocation22 + $0x1f8] ss:$12 sps:$4 sm:$0xff]  }
 0x9f3   :  { %4829 = vmatpush1.bf16.msra.mxu1 %v6505_v42  ;;  %v6569_v42 = vld [vmem:[#allocation22 + $0x200] ss:$12 sps:$4 sm:$0xff]  }
 0x9f4   :  { %4830 = vmatprep.subr.bf16.mxu1 %v6512_v43  ;;  %v3492_v43 = vrot.slane %v7464_v60, %v7388_v4  ;;  %v6591_v60 = vld [vmem:[#allocation22 + $0x28c] ss:$12 sps:$4 sm:$0xff]  }
 0x9f7   :  { %4831 = vmatpush1.bf16.msra.mxu1 %v6510_v44  ;;  %v6572_v44 = vld [vmem:[#allocation22 + $0x214] ss:$12 sps:$4 sm:$0xff]  }
 0x9f8   :  { %4832 = vmatprep.subr.bf16.mxu1 %v6517_v45  ;;  %v6573_v45 = vld [vmem:[#allocation22 + $0x2d8] ss:$12 sps:$4 sm:$0xff]  }
 0x9fb   :  { %4833 = vmatpush1.bf16.msra.mxu1 %v6515_v46  ;;  %v6570_v46 = vld [vmem:[#allocation22 + $0x210] ss:$12 sps:$4 sm:$0xff]  }
 0x9fc   :  { %4834 = vmatprep.subr.bf16.mxu1 %v6522_v47  ;;  %v6574_v47 = vld [vmem:[#allocation22 + $0x218] ss:$12 sps:$4 sm:$0xff]  }
 0x9ff   :  { %4835 = vmatpush1.bf16.msra.mxu1 %v6520_v48 }
 0xa00   :  { %4836 = vmatprep.subr.bf16.mxu1 %v6527_v49  ;;  %v6577_v49 = vld [vmem:[#allocation22 + $0x22c] ss:$12 sps:$4 sm:$0xff]  }
 0xa03   :  { %4837 = vmatpush1.bf16.msra.mxu1 %v6525_v50  ;;  %v6578_v50 = vld [vmem:[#allocation22 + $0x2f0] ss:$12 sps:$4 sm:$0xff]  }
 0xa04   :  { %4838 = vmatprep.subr.bf16.mxu1 %v6532_v51  ;;  %v6575_v51 = vld [vmem:[#allocation22 + $0x228] ss:$12 sps:$4 sm:$0xff]  }
 0xa07   :  { %4839 = vmatpush1.bf16.msra.mxu1 %v6530_v8 }
 0xa08   :  { %4840 = vmatprep.subr.bf16.mxu1 %v6537_v54  ;;  %v6580_v54 = vld [vmem:[#allocation22 + $0x240] ss:$12 sps:$4 sm:$0xff]  }
 0xa0b   :  { %4841 = vmatpush1.bf16.msra.mxu1 %v6535_v56  ;;  %v6585_v56 = vld [vmem:[#allocation22 + $0x25c] ss:$12 sps:$4 sm:$0xff]  }
 0xa0c   :  { %4851 = vmatprep.subr.bf16.mxu1 %v6542_v58  ;;  %v6588_v58 = vld [vmem:[#allocation22 + $0x274] ss:$12 sps:$4 sm:$0xff]  }
 0xaa1   :  { %v4056_v0 = vpop.f32.mrb[28].mxu1  ;;  %v7473_v1 = vpop.f32.mrb[24].mxu0 }
 0xaa2   :  { %v5782_v2 = vadd.f32 %v4056_v0, %v3484_v61  ;;  %v4058_v3 = vpop.f32.mrb[29].mxu1  ;;  %v4140_v5 = vpop.f32.mrb[25].mxu0  ;;  %v5784_v48 = vadd.f32 %v7473_v1, %v3492_v43  ;;  %v6589_v61 = vld [vmem:[#allocation22 + $0x288] ss:$12 sps:$4 sm:$0xff]   ;;  %v6595_v1 = vld [vmem:[#allocation22 + $0x2b8] ss:$12 sps:$4 sm:$0xff]  }
 0xaa3   :  { %v5783_v6 = vadd.f32 %v4058_v3, %v3488_v62  ;;  %v5785_v7 = vadd.f32 %v4140_v5, %v3496_v63  ;;  %v4060_v9 = vpop.f32.mrb[30].mxu1  ;;  %v4142_v10 = vpop.f32.mrb[26].mxu0  ;;  %v6594_v62 = vld [vmem:[#allocation22 + $0x2a4] ss:$12 sps:$4 sm:$0xff]   ;;  %v6592_v63 = vld [vmem:[#allocation22 + $0x2a0] ss:$12 sps:$4 sm:$0xff]  }
 0xaa4   :  { %v4145_v11 = vmax.f32 %v5782_v2, 0.0  ;;  %v4061_v12 = vpop.f32.mrb[31].mxu1  ;;  %v4143_v13 = vpop.f32.mrb[27].mxu0  ;;  %v4147_v8 = vmax.f32 %v5784_v48, 0.0  ;;  %v6597_v0 = vld [vmem:[#allocation22 + $0x2bc] ss:$12 sps:$4 sm:$0xff]  }
 0xaa5   :  { %v4146_v14 = vmax.f32 %v5783_v6, 0.0  ;;  %v4148_v15 = vmax.f32 %v5785_v7, 0.0  ;;  %v6600_v2 = vld [vmem:[#allocation22 + $0x2d4] ss:$12 sps:$4 sm:$0xff]   ;;  %v6598_v3 = vld [vmem:[#allocation22 + $0x2d0] ss:$12 sps:$4 sm:$0xff]  }
 0xaa6   :  { %v4277_v19 = vpack.c.bf16 %v4145_v11, %v4145_v11  ;;  %v4279_v55 = vpack.c.bf16 %v4147_v8, %v4147_v8  ;;  %v6603_v5 = vld [vmem:[#allocation22 + $0x2ec] ss:$12 sps:$4 sm:$0xff]   ;;  %v6601_v6 = vld [vmem:[#allocation22 + $0x2e8] ss:$12 sps:$4 sm:$0xff]  }
 0xaa7   :  { %v4278_v17 = vpack.c.bf16 %v4146_v14, %v4146_v14  ;;  %v4280_v21 = vpack.c.bf16 %v4148_v15, %v4148_v15 }
 0xaa9   :  { %4842 = vmatprep.mubr.bf16.mxu1 %v4278_v17  ;;  %4924 = vmatprep.mubr.bf16.mxu0 %v4278_v17 }
 0xaaa   :  { %4843 = vmatmul.mubr.bf16.vlgmr.msra.gmra.mrb[32].mxu1 %v4277_v19  ;;  %4925 = vmatmul.mubr.bf16.vlgmr.msra.gmra.mrb[28].mxu0 %v4277_v19 }
 0xaab   :  { %4852 = vmatpush1.bf16.msra.mxu1 %v6540_v18  ;;  %5713 = vmatpush3.bf16.msra.mxu0 %v6544_v27 }
 0xaac   :  { %4883 = vmatprep.mubr.bf16.mxu1 %v4280_v21  ;;  %4964 = vmatprep.mubr.bf16.mxu0 %v4280_v21 }
 0xaad   :  { %4853 = vmatprep.subr.bf16.mxu1 %v6547_v41  ;;  %5714 = vmatprep.subr.bf16.mxu0 %v6548_v20 }
 0xaaf   :  { %4854 = vmatpush1.bf16.msra.mxu1 %v6545_v22  ;;  %5715 = vmatpush3.bf16.msra.mxu0 %v6549_v23 }
 0xab0   :  { %4855 = vmatprep.subr.bf16.mxu1 %v6552_v24  ;;  %5716 = vmatprep.subr.bf16.mxu0 %v6553_v25 }
 0xab3   :  { %4856 = vmatpush1.bf16.msra.mxu1 %v6550_v26  ;;  %5717 = vmatpush3.bf16.msra.mxu0 %v6554_v29 }
 0xab4   :  { %4857 = vmatprep.subr.bf16.mxu1 %v6557_v31  ;;  %5718 = vmatprep.subr.bf16.mxu0 %v6558_v32 }
 0xab7   :  { %4858 = vmatpush1.bf16.msra.mxu1 %v6555_v33  ;;  %5719 = vmatpush3.bf16.msra.mxu0 %v6559_v34 }
 0xab8   :  { %4859 = vmatprep.subr.bf16.mxu1 %v6562_v16  ;;  %5720 = vmatprep.subr.bf16.mxu0 %v6563_v35 }
 0xabb   :  { %4860 = vmatpush1.bf16.msra.mxu1 %v6560_v36  ;;  %5721 = vmatpush3.bf16.msra.mxu0 %v6564_v37 }
 0xabc   :  { %4861 = vmatprep.subr.bf16.mxu1 %v6567_v38  ;;  %5722 = vmatprep.subr.bf16.mxu0 %v6568_v39 }
 0xabf   :  { %4862 = vmatpush1.bf16.msra.mxu1 %v6565_v40  ;;  %5723 = vmatpush3.bf16.msra.mxu0 %v6569_v42 }
 0xac0   :  { %4863 = vmatprep.subr.bf16.mxu1 %v6572_v44  ;;  %5724 = vmatprep.subr.bf16.mxu0 %v6573_v45 }
 0xac3   :  { %4864 = vmatpush1.bf16.msra.mxu1 %v6570_v46  ;;  %5725 = vmatpush3.bf16.msra.mxu0 %v6574_v47 }
 0xac4   :  { %4865 = vmatprep.subr.bf16.mxu1 %v6577_v49  ;;  %5726 = vmatprep.subr.bf16.mxu0 %v6578_v50 }
 0xac7   :  { %4866 = vmatpush1.bf16.msra.mxu1 %v6575_v51  ;;  %5727 = vmatpush3.bf16.msra.mxu0 %v6579_v52 }
 0xac8   :  { %4867 = vmatprep.subr.bf16.mxu1 %v6582_v53 }
 0xaca   :  { %4965 = vmatmul.mubr.bf16.vlgmr.msra.gmra.mrb[32].mxu0 %v4279_v55 }
 0xacb   :  { %4868 = vmatpush1.bf16.msra.mxu1 %v6580_v54 }
 0xacc   :  { %4869 = vmatprep.subr.bf16.mxu1 %v6585_v56 }
 0xacf   :  { %4870 = vmatpush1.bf16.msra.mxu1 %v6583_v57 }
 0xad0   :  { %4871 = vmatprep.subr.bf16.mxu1 %v6588_v58 }
 0xad3   :  { %4872 = vmatpush1.bf16.msra.mxu1 %v6586_v59 }
 0xad4   :  { %4873 = vmatprep.subr.bf16.mxu1 %v6591_v60 }
 0xad7   :  { %4874 = vmatpush1.bf16.msra.mxu1 %v6589_v61 }
 0xad8   :  { %4875 = vmatprep.subr.bf16.mxu1 %v6594_v62 }
 0xadb   :  { %4876 = vmatpush1.bf16.msra.mxu1 %v6592_v63 }
 0xadc   :  { %4877 = vmatprep.subr.bf16.mxu1 %v6597_v0 }
 0xadf   :  { %4878 = vmatpush1.bf16.msra.mxu1 %v6595_v1 }
 0xae0   :  { %4879 = vmatprep.subr.bf16.mxu1 %v6600_v2 }
 0xae3   :  { %4880 = vmatpush1.bf16.msra.mxu1 %v6598_v3 }
 0xae4   :  { %4881 = vmatprep.subr.bf16.mxu1 %v6603_v5 }
 0xae7   :  { %4882 = vmatpush1.bf16.msra.mxu1 %v6601_v6 }
 0xaea   :  { %4884 = vmatmul.mubr.bf16.vlgmr.msra.gmra.mrb[32].mxu1 %v4279_v55 }
 0xaeb   :  { %6903 = shalt.err (!%p6900_p10)
}
 0xaec   :  { %s6904_s2 = scalar_lea.hbm %s7556_s24, 128 }
 0xaed   :  { %p6905_p11 = scmp.ne.s32.totalorder %s7556_s24, %s6904_s2  ;;  %p6908_p12 = scmp.lt.u32.totalorder %s6904_s2, %s7556_s24 }
 0xaef   :  { %p6910_p13 = pnand %p6908_p12, %p6905_p11 }
 0xaf1   :  { %6913 = shalt.err (!%p6910_p13)
}
 0xaf2   :  { %4984 = dma.vmem_to_hbm [thread:$0]  %s4982_s16, 128, %s7556_s24, [#allocation4]  }
 0xaf3   :  { %s7025_s4 = smov [#allocation27]  }
 0xaf4   :  { %s5011_s11 = sshll.u32 %s7025_s4, 4  ;;  %s5012_s11 = int_to_ptr.vmem [resolvable:$true] %s5011_s11 }
 0xaf5   :  { %s6914_s28 = scalar_lea.vmem %s5012_s11, 128  ;;  %p6919_p1 = scmp.lt.s32.totalorder %s5012_s11, %s5012_s11 }
 0xaf6   :  { %p6915_p0 = scmp.ne.s32.totalorder %s5012_s11, %s6914_s28  ;;  %p6920_p2 = scmp.lt.s32.totalorder %s6914_s28, %s6914_s28 }
 0xaf8   :  { %p6921_p3 = por %p6920_p2, %p6919_p1 }
 0xafa   :  { %p6922_p4 = pnand %p6921_p3, %p6915_p0 }
 0xafc   :  { %6925 = shalt.err (!%p6922_p4)
}
 0xafd   :  { %s6926_s17 = scalar_lea.hbm %s7559_s27, 128 }
 0xafe   :  { %p6927_p5 = scmp.ne.s32.totalorder %s7559_s27, %s6926_s17  ;;  %p6930_p6 = scmp.lt.u32.totalorder %s6926_s17, %s7559_s27 }
 0xb00   :  { %p6932_p7 = pnand %p6930_p6, %p6927_p5 }
 0xb02   :  { %6935 = shalt.err (!%p6932_p7)
}
 0xb03   :  { %5014 = dma.vmem_to_hbm [thread:$0]  %s5012_s11, 128, %s7559_s27, [#allocation28]   ;;  %v4281_v13 = vld [vmem:[%s7555_s23] sm:$0x7] }
 0xb04   :  { %v4294_v14 = vrot.slane %v4281_v13, %v7388_v4  ;;  %v4286_v21 = vrot.slane %v4281_v13, %v7369_v28  ;;  %v4290_v22 = vrot.slane %v4281_v13, %v7377_v30  ;;  %s7026_s27 = smov [#allocation24]   ;;  %s7027_s21 = smov [#allocation26]  }
 0xb05   :  { %s4991_s0 = sshll.u32 %s7026_s27, 4  ;;  %s5001_s10 = sshll.u32 %s7027_s21, 4  ;;  %s4992_s0 = int_to_ptr.vmem [resolvable:$true] %s4991_s0  ;;  %s5002_s10 = int_to_ptr.vmem [resolvable:$true] %s5001_s10 }
 0xb06   :  { %s6936_s23 = scalar_lea.vmem %s4992_s0, 384  ;;  %p6941_p9 = scmp.lt.s32.totalorder %s4992_s0, %s4992_s0 }
 0xb07   :  { %p6937_p8 = scmp.ne.s32.totalorder %s4992_s0, %s6936_s23  ;;  %p6942_p10 = scmp.lt.s32.totalorder %s6936_s23, %s6936_s23 }
 0xb09   :  { %p6943_p11 = por %p6942_p10, %p6941_p9 }
 0xb0b   :  { %p6944_p12 = pnand %p6943_p11, %p6937_p8 }
 0xb7d   :  { %v5706_v7 = vpop.f32.mrb[28].mxu0 }
 0xb7e   :  { %v5707_v9 = vpop.f32.mrb[29].mxu0 }
 0xb7f   :  { %v5708_v10 = vadd.f32 %v5707_v9, %v5706_v7  ;;  %v5709_v11 = vpop.f32.mrb[30].mxu0 }
 0xb80   :  { %v5710_v12 = vpop.f32.mrb[31].mxu0 }
 0xb81   :  { %v4927_v18 = vadd.f32 %v5708_v10, %v4294_v14 }
 0xb9d   :  { %v5728_v15 = vpop.f32.mrb[32].mxu0 }
 0xb9e   :  { %v5729_v17 = vpop.f32.mrb[33].mxu0 }
 0xb9f   :  { %v5730_v27 = vadd.f32 %v5729_v17, %v5728_v15  ;;  %v5731_v19 = vpop.f32.mrb[34].mxu0 }
 0xba0   :  { %v5732_v41 = vpop.f32.mrb[35].mxu0 }
 0xba1   :  { %v4967_v20 = vadd.f32 %v5730_v27, %v4927_v18 }
 0xba3   :  { %4974 = vst [vmem:[#allocation24 + $0x10] sm:$0xff] %v4967_v20 }
 0xbbd   :  { %v4885_v23 = vpop.f32.mrb[32].mxu1 }
 0xbbe   :  { %v5786_v24 = vadd.f32 %v4885_v23, %v4286_v21  ;;  %v4887_v25 = vpop.f32.mrb[33].mxu1 }
 0xbbf   :  { %v5787_v4 = vadd.f32 %v4887_v25, %v4290_v22  ;;  %v4889_v26 = vpop.f32.mrb[34].mxu1 }
 0xbc0   :  { %4972 = vst [vmem:[#allocation24] sm:$0xff] %v5786_v24  ;;  %v4890_v29 = vpop.f32.mrb[35].mxu1 }
 0xbc1   :  { %4973 = vst [vmem:[#allocation24 + $0x8] sm:$0xff] %v5787_v4 }
 0xbc2   :  { %6947 = shalt.err (!%p6944_p12)
}
 0xbc3   :  { %s7607_s26 = sld [smem:[#allocation51_spill]] }
 0xbc9   :  { %s6948_s18 = scalar_lea.hbm %s7607_s26, 384 }
 0xbca   :  { %p6949_p13 = scmp.ne.s32.totalorder %s7607_s26, %s6948_s18  ;;  %p6952_p0 = scmp.lt.u32.totalorder %s6948_s18, %s7607_s26 }
 0xbcc   :  { %p6954_p1 = pnand %p6952_p0, %p6949_p13 }
 0xbce   :  { %6957 = shalt.err (!%p6954_p1)
}
 0xbcf   :  { %4994 = dma.vmem_to_hbm [thread:$0]  %s4992_s0, 384, %s7607_s26, [#allocation25]  }
 0xbd0   :  { %s6958_s7 = scalar_lea.vmem %s5002_s10, 128  ;;  %p6963_p3 = scmp.lt.s32.totalorder %s5002_s10, %s5002_s10 }
 0xbd1   :  { %p6959_p2 = scmp.ne.s32.totalorder %s5002_s10, %s6958_s7  ;;  %p6964_p4 = scmp.lt.s32.totalorder %s6958_s7, %s6958_s7 }
 0xbd3   :  { %p6965_p5 = por %p6964_p4, %p6963_p3 }
 0xbd5   :  { %p6966_p6 = pnand %p6965_p5, %p6959_p2 }
 0xbd7   :  { %6969 = shalt.err (!%p6966_p6)
}
 0xbd8   :  { %s7608_s11 = sld [smem:[#allocation52_spill]] }
 0xbde   :  { %s6970_s28 = scalar_lea.hbm %s7608_s11, 128 }
 0xbdf   :  { %p6971_p7 = scmp.ne.s32.totalorder %s7608_s11, %s6970_s28  ;;  %p6974_p8 = scmp.lt.u32.totalorder %s6970_s28, %s7608_s11 }
 0xbe1   :  { %p6976_p9 = pnand %p6974_p8, %p6971_p7 }
 0xbe3   :  { %6979 = shalt.err (!%p6976_p9)
}
 0xbe4   :  { %5004 = dma.vmem_to_hbm [thread:$0]  %s5002_s10, 128, %s7608_s11, [#allocation25]  }
 0xbe5   :  { %6994 = dma.done.wait [#allocation4], 128  }
 0xbe6   :  { %6995 = vsyncadd [#allocation4], 4294967168 }
 0xbe7   :  { %6996 = dma.done.wait [#allocation25], 512  }
 0xbe8   :  { %6997 = vsyncadd [#allocation25], 4294966784 }
 0xbe9   :  { %6998 = dma.done.wait [#allocation28], 128  }
 0xbea   :  { %6999 = vsyncadd [#allocation28], 4294967168 }
 0xbeb   :  { %5027 = vsyncpa [#allocation3], 1 }
 0xbec   :  { %5028 = vsyncpa [#allocation6], 1 }
 0xbed   :  { %5029 = vsyncpa [#allocation9], 1 }
 0xbee   :  { %5030 = vsyncpa [#allocation12], 1 }
 0xbef   :  { %5031 = vsyncpa [#allocation15], 1 }
 0xbf0   :  { %5032 = vsyncpa [#allocation18], 1 }
 0xbf1   :  { %5033 = vsyncpa [#allocation21], 1 }
 0xbf2   :  { %5034 = vsyncpa [#allocation4], 1 }
 0xbf3   :  { %5035 = vsyncpa [#allocation25], 1 }
 0xbf4   :  { %5036 = vsyncpa [#allocation28], 1 }

</bundles_post_ra>
